<compile_context>
chip_gen: v7x
topology: tpu7x:2x2x1
jax: 0.10.0
libtpu: 0.0.40
codegen_flags: <defaults>
</compile_context>

<pallas_src>
import functools

import jax
import jax.numpy as jnp
from jax import lax
from jax.experimental import pallas as pl
from jax.experimental.pallas import tpu as pltpu

EPS = 1e-5


def _instance_norm(y):
    # y: (H*W, C) f32 for one batch element. Per-channel stats over the spatial
    # (sublane) axis; biased variance via E[y^2] - E[y]^2 in a single data pass.
    mean = jnp.mean(y, axis=0, keepdims=True)
    mean_sq = jnp.mean(y * y, axis=0, keepdims=True)
    var = mean_sq - mean * mean
    return (y - mean) * lax.rsqrt(var + EPS)


def bottleneck_kernel(x_ref, w1_ref, w2_ref, w3_ref, o_ref, *, W):
    # x_ref: (1, H*W, Cin) f32         (Cin == 4*planes)
    # w1_ref: (Cin, P)     bf16        1x1 conv
    # w2_ref: (3, 3P, P)   bf16        3x3 conv; dim0 = ky, dim1 = (kx, Cin_tap)
    # w3_ref: (P, Cin)     bf16        1x1 conv
    HW = x_ref.shape[1]
    bf16, f32 = jnp.bfloat16, jnp.float32

    x2d = x_ref[0]                                            # (HW, Cin) f32

    # ---- conv1 (1x1) + IN + relu.  Bias omitted: exactly cancelled by IN mean. ----
    y = jnp.dot(x2d.astype(bf16), w1_ref[...], preferred_element_type=f32)  # (HW, P)
    y = jnp.maximum(_instance_norm(y), 0.0)

    # ---- conv2 (3x3, stride 1, pad 1) as 3 MXU matmuls over K = 3P ----
    # dx (column) taps: roll the flattened spatial axis by +/-1 (XLU) and zero
    # the wrapped boundary column; pack the three taps into one K=3P operand.
    flat = lax.broadcasted_iota(jnp.int32, (HW, 1), 0)        # flat spatial index
    col = flat % W                                            # w coordinate per row
    y_m1 = jnp.where(col == 0, 0.0, pltpu.roll(y, 1, axis=0))             # y[h, w-1]
    y_p1 = jnp.where(col == W - 1, 0.0, pltpu.roll(y, HW - 1, axis=0))    # y[h, w+1]
    z = jnp.concatenate([y_m1, y, y_p1], axis=-1)             # (HW, 3P) f32

    # dy (row) taps: roll the packed operand by +/-W (XLU) and zero the first /
    # last image row that wrapped around.  No padded temporary, no sliced copies.
    z_up = jnp.where(flat < W, 0.0, pltpu.roll(z, W, axis=0))             # row h-1
    z_dn = jnp.where(flat >= HW - W, 0.0, pltpu.roll(z, HW - W, axis=0))  # row h+1

    y2 = jnp.dot(z_up.astype(bf16), w2_ref[0], preferred_element_type=f32)
    y2 = y2 + jnp.dot(z.astype(bf16), w2_ref[1], preferred_element_type=f32)
    y2 = y2 + jnp.dot(z_dn.astype(bf16), w2_ref[2], preferred_element_type=f32)
    y2 = jnp.maximum(_instance_norm(y2), 0.0)

    # ---- conv3 (1x1 -> 4P) + IN, residual add, relu ----
    y3 = jnp.dot(y2.astype(bf16), w3_ref[...], preferred_element_type=f32)  # (HW, Cin)
    y3 = _instance_norm(y3)
    o_ref[0] = jnp.maximum(y3 + x2d, 0.0).astype(o_ref.dtype)


def bottleneck_pallas(x_nhwc, params, *, vmem_limit_bytes=64 * 1024 * 1024):
    """x_nhwc: (N, H, W, Cin) with Cin == 4*planes (identity residual path).

    NHWC in / NHWC out (no HBM transpose round trips; only free reshapes).
    vmem_limit_bytes: 64 MiB default fits all chips (<= v7x physical); on
    v5e/v6e it can be raised toward ~100 MiB for large feature maps.
    """
    w1, _b1, w2, _b2, w3, _b3 = params   # biases are no-ops under affine-free IN
    N, H, W, Cin = x_nhwc.shape
    P = w1.shape[1]
    assert Cin == 4 * P, "identity residual requires inplanes == 4*planes"
    HW = H * W

    x = x_nhwc.astype(jnp.float32).reshape(N, HW, Cin)        # free reshape
    w1b = w1.astype(jnp.bfloat16)                             # (Cin, P)
    w2b = w2.reshape(3, 3 * P, P).astype(jnp.bfloat16)        # (ky, (kx, Cin_tap), P)
    w3b = w3.astype(jnp.bfloat16)                             # (P, Cin)

    kernel = functools.partial(bottleneck_kernel, W=W)
    out = pl.pallas_call(
        kernel,
        out_shape=jax.ShapeDtypeStruct((N, HW, Cin), jnp.float32),
        grid_spec=pltpu.PrefetchScalarGridSpec(
            num_scalar_prefetch=0,
            grid=(N,),  # keep N even per call so both v7x TensorCores stay busy
            in_specs=[
                pl.BlockSpec((1, HW, Cin), lambda n: (n, 0, 0)),
                pl.BlockSpec((Cin, P), lambda n: (0, 0)),
                pl.BlockSpec((3, 3 * P, P), lambda n: (0, 0, 0)),
                pl.BlockSpec((P, Cin), lambda n: (0, 0)),
            ],
            out_specs=pl.BlockSpec((1, HW, Cin), lambda n: (n, 0, 0)),
        ),
        compiler_params=pltpu.CompilerParams(
            dimension_semantics=("parallel",),
            vmem_limit_bytes=vmem_limit_bytes,
        ),
    )(x, w1b, w2b, w3b)

    return out.reshape(N, H, W, Cin)


def bottleneck_reference(x_nhwc, params):
    """Pure-JAX f32 reference (lax.conv, biases included) matching the PyTorch module."""
    w1, b1, w2, b2, w3, b3 = params
    x = x_nhwc.astype(jnp.float32)
    P = w1.shape[1]
    dn = ("NHWC", "HWIO", "NHWC")

    def inorm(y):
        m = jnp.mean(y, axis=(1, 2), keepdims=True)
        v = jnp.mean((y - m) ** 2, axis=(1, 2), keepdims=True)
        return (y - m) / jnp.sqrt(v + EPS)

    y = lax.conv_general_dilated(
        x, w1.reshape(1, 1, *w1.shape), (1, 1), "VALID", dimension_numbers=dn) + b1
    y = jax.nn.relu(inorm(y))
    y = lax.conv_general_dilated(
        y, w2.reshape(3, 3, P, P), (1, 1), ((1, 1), (1, 1)), dimension_numbers=dn) + b2
    y = jax.nn.relu(inorm(y))
    y = lax.conv_general_dilated(
        y, w3.reshape(1, 1, *w3.shape), (1, 1), "VALID", dimension_numbers=dn) + b3
    y = inorm(y)
    return jax.nn.relu(y + x)


def make_params(key, inplanes, planes):
    """Deterministic synthetic weights (Conv2d bias=True; biases only used by the reference)."""
    k = jax.random.split(key, 6)
    s1 = 1.0 / jnp.sqrt(inplanes)
    s2 = 1.0 / jnp.sqrt(planes * 9)
    s3 = 1.0 / jnp.sqrt(planes)
    w1 = jax.random.uniform(k[0], (inplanes, planes), jnp.float32, -s1, s1)    # IO 1x1
    b1 = jax.random.uniform(k[1], (planes,), jnp.float32, -s1, s1)
    w2 = jax.random.uniform(k[2], (9, planes, planes), jnp.float32, -s2, s2)   # (ky*3+kx, I, O)
    b2 = jax.random.uniform(k[3], (planes,), jnp.float32, -s2, s2)
    w3 = jax.random.uniform(k[4], (planes, planes * 4), jnp.float32, -s3, s3)  # IO 1x1
    b3 = jax.random.uniform(k[5], (planes * 4,), jnp.float32, -s3, s3)
    return (w1, b1, w2, b2, w3, b3)


if __name__ == "__main__":
    # Small shapes consistent with the module defaults (downsample=None, stride=1
    # => inplanes = planes * 4).  planes=32 makes the residual/output channel
    # axis 128-wide, i.e. lane-dense on TPU.
    N, planes, H, W = 2, 32, 16, 16
    inplanes = planes * 4  # 128

    key = jax.random.PRNGKey(0)
    kx, kp = jax.random.split(key)
    x = jax.random.normal(kx, (N, H, W, inplanes), jnp.float32)   # NHWC
    params = make_params(kp, inplanes, planes)

    out = jax.block_until_ready(bottleneck_pallas(x, params))
    ref = jax.block_until_ready(bottleneck_reference(x, params))

    assert out.shape == (N, H, W, inplanes)
    err = float(jnp.max(jnp.abs(out - ref)))
    # Tolerance loosened vs. the f32 reference because the kernel runs the MXU
    # with bf16 operands (f32 accumulation / f32 elementwise).
    assert err < 1e-1, f"max err {err}"
    print("KERNEL_OK")
</pallas_src>

<mosaic_0001>
module attributes {stable_mosaic.version = 11 : i64} {
  func.func @bottleneck_kernel(%arg0: i32, %arg1: memref<1x256x128xf32, #tpu.memory_space<vmem>>, %arg2: memref<128x32xbf16, #tpu.memory_space<vmem>>, %arg3: memref<3x96x32xbf16, #tpu.memory_space<vmem>>, %arg4: memref<32x128xbf16, #tpu.memory_space<vmem>>, %arg5: memref<1x256x128xf32, #tpu.memory_space<vmem>>) attributes {dimension_semantics = [#tpu.dimension_semantics<parallel>], iteration_bounds = array<i64: 2>, scalar_prefetch = 0 : i64, scratch_operands = 0 : i64, tpu.core_type = #tpu.core_type<tc>, window_params = [{transform_indices = @transform_0, window_bounds = array<i64: 1, 256, 128>}, {pipeline_mode = #tpu.pipeline_mode<synchronous>, transform_indices = @transform_1, window_bounds = array<i64: 128, 32>}, {pipeline_mode = #tpu.pipeline_mode<synchronous>, transform_indices = @transform_2, window_bounds = array<i64: 3, 96, 32>}, {pipeline_mode = #tpu.pipeline_mode<synchronous>, transform_indices = @transform_3, window_bounds = array<i64: 32, 128>}, {transform_indices = @transform_4, window_bounds = array<i64: 1, 256, 128>}]} {
    %c0 = arith.constant 0 : index
    %c0_0 = arith.constant 0 : index
    %c0_1 = arith.constant 0 : index
    %0 = vector.load %arg1[%c0, %c0_0, %c0_1] : memref<1x256x128xf32, #tpu.memory_space<vmem>>, vector<1x256x128xf32>
    %1 = vector.shape_cast %0 : vector<1x256x128xf32> to vector<256x128xf32>
    %2 = arith.truncf %1 : vector<256x128xf32> to vector<256x128xbf16>
    %c0_2 = arith.constant 0 : index
    %c0_3 = arith.constant 0 : index
    %3 = vector.load %arg2[%c0_2, %c0_3] : memref<128x32xbf16, #tpu.memory_space<vmem>>, vector<128x32xbf16>
    %cst = arith.constant dense<0.000000e+00> : vector<256x32xf32>
    %4 = tpu.matmul %2, %3, %cst {dimension_numbers = #tpu.dot_dimension_numbers<[1], [0], [0], [1], [0, 0, 1, 1], [], []>} : vector<256x128xbf16>, vector<128x32xbf16>, vector<256x32xf32> -> vector<256x32xf32>
    %cst_4 = arith.constant dense<0.000000e+00> : vector<32xf32>
    %5 = vector.multi_reduction <add>, %4, %cst_4 [0] : vector<256x32xf32> to vector<32xf32>
    %6 = vector.shape_cast %5 : vector<32xf32> to vector<1x32xf32>
    %cst_5 = arith.constant 2.560000e+02 : f32
    %7 = vector.broadcast %cst_5 : f32 to vector<1x32xf32>
    %8 = arith.divf %6, %7 : vector<1x32xf32>
    %9 = arith.mulf %4, %4 : vector<256x32xf32>
    %cst_6 = arith.constant dense<0.000000e+00> : vector<32xf32>
    %10 = vector.multi_reduction <add>, %9, %cst_6 [0] : vector<256x32xf32> to vector<32xf32>
    %11 = vector.shape_cast %10 : vector<32xf32> to vector<1x32xf32>
    %cst_7 = arith.constant 2.560000e+02 : f32
    %12 = vector.broadcast %cst_7 : f32 to vector<1x32xf32>
    %13 = arith.divf %11, %12 : vector<1x32xf32>
    %14 = arith.mulf %8, %8 : vector<1x32xf32>
    %15 = arith.subf %13, %14 : vector<1x32xf32>
    %16 = vector.broadcast %8 : vector<1x32xf32> to vector<256x32xf32>
    %17 = arith.subf %4, %16 : vector<256x32xf32>
    %cst_8 = arith.constant 9.99999974E-6 : f32
    %18 = vector.broadcast %cst_8 : f32 to vector<1x32xf32>
    %19 = arith.addf %15, %18 : vector<1x32xf32>
    %20 = math.rsqrt %19 : vector<1x32xf32>
    %21 = vector.broadcast %20 : vector<1x32xf32> to vector<256x32xf32>
    %22 = arith.mulf %17, %21 : vector<256x32xf32>
    %cst_9 = arith.constant 0.000000e+00 : f32
    %23 = vector.broadcast %cst_9 : f32 to vector<256x32xf32>
    %24 = arith.maximumf %22, %23 : vector<256x32xf32>
    %25 = tpu.iota {dimensions = array<i32: 0>} : vector<256x1xi32>
    %c16_i32 = arith.constant 16 : i32
    %c0_i32 = arith.constant 0 : i32
    %26 = arith.cmpi eq, %c16_i32, %c0_i32 : i32
    %c1_i32 = arith.constant 1 : i32
    %27 = arith.select %26, %c1_i32, %c16_i32 : i32
    %28 = vector.broadcast %27 : i32 to vector<256x1xi32>
    %29 = arith.remsi %25, %28 : vector<256x1xi32>
    %c0_i32_10 = arith.constant 0 : i32
    %30 = vector.broadcast %c0_i32_10 : i32 to vector<256x1xi32>
    %31 = arith.cmpi ne, %29, %30 : vector<256x1xi32>
    %c0_i32_11 = arith.constant 0 : i32
    %32 = vector.broadcast %c0_i32_11 : i32 to vector<256x1xi32>
    %33 = arith.cmpi slt, %29, %32 : vector<256x1xi32>
    %c0_i32_12 = arith.constant 0 : i32
    %34 = arith.cmpi slt, %27, %c0_i32_12 : i32
    %35 = vector.broadcast %34 : i1 to vector<256x1xi1>
    %36 = vector.broadcast %35 : vector<256x1xi1> to vector<256x1xi1>
    %37 = arith.xori %33, %36 : vector<256x1xi1>
    %38 = arith.andi %37, %31 : vector<256x1xi1>
    %39 = vector.broadcast %27 : i32 to vector<256x1xi32>
    %40 = arith.addi %29, %39 : vector<256x1xi32>
    %41 = arith.select %38, %40, %29 : vector<256x1xi1>, vector<256x1xi32>
    %c0_i32_13 = arith.constant 0 : i32
    %42 = vector.broadcast %c0_i32_13 : i32 to vector<256x1xi32>
    %43 = arith.cmpi eq, %41, %42 : vector<256x1xi32>
    %c1_i32_14 = arith.constant 1 : i32
    %44 = tpu.dynamic_rotate %24 by %c1_i32_14 dim 0 : vector<256x32xf32>, i32 -> vector<256x32xf32>
    %cst_15 = arith.constant 0.000000e+00 : f32
    %45 = vector.shape_cast %43 : vector<256x1xi1> to vector<256x1xi1>
    %46 = vector.broadcast %45 : vector<256x1xi1> to vector<256x32xi1>
    %47 = vector.broadcast %cst_15 : f32 to vector<256x32xf32>
    %48 = arith.select %46, %47, %44 : vector<256x32xi1>, vector<256x32xf32>
    %c15_i32 = arith.constant 15 : i32
    %49 = vector.broadcast %c15_i32 : i32 to vector<256x1xi32>
    %50 = arith.cmpi eq, %41, %49 : vector<256x1xi32>
    %c255_i32 = arith.constant 255 : i32
    %51 = tpu.dynamic_rotate %24 by %c255_i32 dim 0 : vector<256x32xf32>, i32 -> vector<256x32xf32>
    %cst_16 = arith.constant 0.000000e+00 : f32
    %52 = vector.shape_cast %50 : vector<256x1xi1> to vector<256x1xi1>
    %53 = vector.broadcast %52 : vector<256x1xi1> to vector<256x32xi1>
    %54 = vector.broadcast %cst_16 : f32 to vector<256x32xf32>
    %55 = arith.select %53, %54, %51 : vector<256x32xi1>, vector<256x32xf32>
    %56 = tpu.concatenate %48, %24, %55 in 1 : vector<256x32xf32>, vector<256x32xf32>, vector<256x32xf32> -> vector<256x96xf32>
    %c16_i32_17 = arith.constant 16 : i32
    %57 = vector.broadcast %c16_i32_17 : i32 to vector<256x1xi32>
    %58 = arith.cmpi slt, %25, %57 : vector<256x1xi32>
    %c16_i32_18 = arith.constant 16 : i32
    %59 = tpu.dynamic_rotate %56 by %c16_i32_18 dim 0 : vector<256x96xf32>, i32 -> vector<256x96xf32>
    %cst_19 = arith.constant 0.000000e+00 : f32
    %60 = vector.shape_cast %58 : vector<256x1xi1> to vector<256x1xi1>
    %61 = vector.broadcast %60 : vector<256x1xi1> to vector<256x96xi1>
    %62 = vector.broadcast %cst_19 : f32 to vector<256x96xf32>
    %63 = arith.select %61, %62, %59 : vector<256x96xi1>, vector<256x96xf32>
    %c240_i32 = arith.constant 240 : i32
    %64 = vector.broadcast %c240_i32 : i32 to vector<256x1xi32>
    %65 = arith.cmpi sge, %25, %64 : vector<256x1xi32>
    %c240_i32_20 = arith.constant 240 : i32
    %66 = tpu.dynamic_rotate %56 by %c240_i32_20 dim 0 : vector<256x96xf32>, i32 -> vector<256x96xf32>
    %cst_21 = arith.constant 0.000000e+00 : f32
    %67 = vector.shape_cast %65 : vector<256x1xi1> to vector<256x1xi1>
    %68 = vector.broadcast %67 : vector<256x1xi1> to vector<256x96xi1>
    %69 = vector.broadcast %cst_21 : f32 to vector<256x96xf32>
    %70 = arith.select %68, %69, %66 : vector<256x96xi1>, vector<256x96xf32>
    %71 = arith.truncf %63 : vector<256x96xf32> to vector<256x96xbf16>
    %c0_22 = arith.constant 0 : index
    %c0_23 = arith.constant 0 : index
    %c0_24 = arith.constant 0 : index
    %72 = vector.load %arg3[%c0_22, %c0_23, %c0_24] : memref<3x96x32xbf16, #tpu.memory_space<vmem>>, vector<1x96x32xbf16>
    %73 = vector.shape_cast %72 : vector<1x96x32xbf16> to vector<96x32xbf16>
    %cst_25 = arith.constant dense<0.000000e+00> : vector<256x32xf32>
    %74 = tpu.matmul %71, %73, %cst_25 {dimension_numbers = #tpu.dot_dimension_numbers<[1], [0], [0], [1], [0, 0, 1, 1], [], []>} : vector<256x96xbf16>, vector<96x32xbf16>, vector<256x32xf32> -> vector<256x32xf32>
    %75 = arith.truncf %56 : vector<256x96xf32> to vector<256x96xbf16>
    %c1 = arith.constant 1 : index
    %c0_26 = arith.constant 0 : index
    %c0_27 = arith.constant 0 : index
    %76 = vector.load %arg3[%c1, %c0_26, %c0_27] : memref<3x96x32xbf16, #tpu.memory_space<vmem>>, vector<1x96x32xbf16>
    %77 = vector.shape_cast %76 : vector<1x96x32xbf16> to vector<96x32xbf16>
    %cst_28 = arith.constant dense<0.000000e+00> : vector<256x32xf32>
    %78 = tpu.matmul %75, %77, %cst_28 {dimension_numbers = #tpu.dot_dimension_numbers<[1], [0], [0], [1], [0, 0, 1, 1], [], []>} : vector<256x96xbf16>, vector<96x32xbf16>, vector<256x32xf32> -> vector<256x32xf32>
    %79 = arith.addf %74, %78 : vector<256x32xf32>
    %80 = arith.truncf %70 : vector<256x96xf32> to vector<256x96xbf16>
    %c2 = arith.constant 2 : index
    %c0_29 = arith.constant 0 : index
    %c0_30 = arith.constant 0 : index
    %81 = vector.load %arg3[%c2, %c0_29, %c0_30] : memref<3x96x32xbf16, #tpu.memory_space<vmem>>, vector<1x96x32xbf16>
    %82 = vector.shape_cast %81 : vector<1x96x32xbf16> to vector<96x32xbf16>
    %cst_31 = arith.constant dense<0.000000e+00> : vector<256x32xf32>
    %83 = tpu.matmul %80, %82, %cst_31 {dimension_numbers = #tpu.dot_dimension_numbers<[1], [0], [0], [1], [0, 0, 1, 1], [], []>} : vector<256x96xbf16>, vector<96x32xbf16>, vector<256x32xf32> -> vector<256x32xf32>
    %84 = arith.addf %79, %83 : vector<256x32xf32>
    %cst_32 = arith.constant dense<0.000000e+00> : vector<32xf32>
    %85 = vector.multi_reduction <add>, %84, %cst_32 [0] : vector<256x32xf32> to vector<32xf32>
    %86 = vector.shape_cast %85 : vector<32xf32> to vector<1x32xf32>
    %cst_33 = arith.constant 2.560000e+02 : f32
    %87 = vector.broadcast %cst_33 : f32 to vector<1x32xf32>
    %88 = arith.divf %86, %87 : vector<1x32xf32>
    %89 = arith.mulf %84, %84 : vector<256x32xf32>
    %cst_34 = arith.constant dense<0.000000e+00> : vector<32xf32>
    %90 = vector.multi_reduction <add>, %89, %cst_34 [0] : vector<256x32xf32> to vector<32xf32>
    %91 = vector.shape_cast %90 : vector<32xf32> to vector<1x32xf32>
    %cst_35 = arith.constant 2.560000e+02 : f32
    %92 = vector.broadcast %cst_35 : f32 to vector<1x32xf32>
    %93 = arith.divf %91, %92 : vector<1x32xf32>
    %94 = arith.mulf %88, %88 : vector<1x32xf32>
    %95 = arith.subf %93, %94 : vector<1x32xf32>
    %96 = vector.broadcast %88 : vector<1x32xf32> to vector<256x32xf32>
    %97 = arith.subf %84, %96 : vector<256x32xf32>
    %cst_36 = arith.constant 9.99999974E-6 : f32
    %98 = vector.broadcast %cst_36 : f32 to vector<1x32xf32>
    %99 = arith.addf %95, %98 : vector<1x32xf32>
    %100 = math.rsqrt %99 : vector<1x32xf32>
    %101 = vector.broadcast %100 : vector<1x32xf32> to vector<256x32xf32>
    %102 = arith.mulf %97, %101 : vector<256x32xf32>
    %cst_37 = arith.constant 0.000000e+00 : f32
    %103 = vector.broadcast %cst_37 : f32 to vector<256x32xf32>
    %104 = arith.maximumf %102, %103 : vector<256x32xf32>
    %105 = arith.truncf %104 : vector<256x32xf32> to vector<256x32xbf16>
    %c0_38 = arith.constant 0 : index
    %c0_39 = arith.constant 0 : index
    %106 = vector.load %arg4[%c0_38, %c0_39] : memref<32x128xbf16, #tpu.memory_space<vmem>>, vector<32x128xbf16>
    %cst_40 = arith.constant dense<0.000000e+00> : vector<256x128xf32>
    %107 = tpu.matmul %105, %106, %cst_40 {dimension_numbers = #tpu.dot_dimension_numbers<[1], [0], [0], [1], [0, 0, 1, 1], [], []>} : vector<256x32xbf16>, vector<32x128xbf16>, vector<256x128xf32> -> vector<256x128xf32>
    %cst_41 = arith.constant dense<0.000000e+00> : vector<128xf32>
    %108 = vector.multi_reduction <add>, %107, %cst_41 [0] : vector<256x128xf32> to vector<128xf32>
    %109 = vector.shape_cast %108 : vector<128xf32> to vector<1x128xf32>
    %cst_42 = arith.constant 2.560000e+02 : f32
    %110 = vector.broadcast %cst_42 : f32 to vector<1x128xf32>
    %111 = arith.divf %109, %110 : vector<1x128xf32>
    %112 = arith.mulf %107, %107 : vector<256x128xf32>
    %cst_43 = arith.constant dense<0.000000e+00> : vector<128xf32>
    %113 = vector.multi_reduction <add>, %112, %cst_43 [0] : vector<256x128xf32> to vector<128xf32>
    %114 = vector.shape_cast %113 : vector<128xf32> to vector<1x128xf32>
    %cst_44 = arith.constant 2.560000e+02 : f32
    %115 = vector.broadcast %cst_44 : f32 to vector<1x128xf32>
    %116 = arith.divf %114, %115 : vector<1x128xf32>
    %117 = arith.mulf %111, %111 : vector<1x128xf32>
    %118 = arith.subf %116, %117 : vector<1x128xf32>
    %119 = vector.broadcast %111 : vector<1x128xf32> to vector<256x128xf32>
    %120 = arith.subf %107, %119 : vector<256x128xf32>
    %cst_45 = arith.constant 9.99999974E-6 : f32
    %121 = vector.broadcast %cst_45 : f32 to vector<1x128xf32>
    %122 = arith.addf %118, %121 : vector<1x128xf32>
    %123 = math.rsqrt %122 : vector<1x128xf32>
    %124 = vector.broadcast %123 : vector<1x128xf32> to vector<256x128xf32>
    %125 = arith.mulf %120, %124 : vector<256x128xf32>
    %126 = arith.addf %125, %1 : vector<256x128xf32>
    %cst_46 = arith.constant 0.000000e+00 : f32
    %127 = vector.broadcast %cst_46 : f32 to vector<256x128xf32>
    %128 = arith.maximumf %126, %127 : vector<256x128xf32>
    %c0_47 = arith.constant 0 : index
    %c0_48 = arith.constant 0 : index
    %c0_49 = arith.constant 0 : index
    %129 = vector.load %arg5[%c0_47, %c0_48, %c0_49] : memref<1x256x128xf32, #tpu.memory_space<vmem>>, vector<1x256x128xf32>
    %130 = vector.shape_cast %129 : vector<1x256x128xf32> to vector<256x128xf32>
    %131 = vector.shape_cast %128 : vector<256x128xf32> to vector<1x256x128xf32>
    tpu.vector_store %arg5[%c0_47, %c0_48, %c0_49], %131 {strides = array<i32>} : memref<1x256x128xf32, #tpu.memory_space<vmem>>, vector<1x256x128xf32>,
    return
  }
  func.func @transform_0(%arg0: i32) -> (i32, i32, i32) {
    %c0_i32 = arith.constant 0 : i32
    %c0_i32_0 = arith.constant 0 : i32
    %c0_i32_1 = arith.constant 0 : i32
    return %arg0, %c0_i32, %c0_i32_0 : i32, i32, i32
  }
  func.func @transform_1(%arg0: i32) -> (i32, i32) {
    %c0_i32 = arith.constant 0 : i32
    %c0_i32_0 = arith.constant 0 : i32
    %c0_i32_1 = arith.constant 0 : i32
    return %c0_i32, %c0_i32_0 : i32, i32
  }
  func.func @transform_2(%arg0: i32) -> (i32, i32, i32) {
    %c0_i32 = arith.constant 0 : i32
    %c0_i32_0 = arith.constant 0 : i32
    %c0_i32_1 = arith.constant 0 : i32
    %c0_i32_2 = arith.constant 0 : i32
    return %c0_i32, %c0_i32_0, %c0_i32_1 : i32, i32, i32
  }
  func.func @transform_3(%arg0: i32) -> (i32, i32) {
    %c0_i32 = arith.constant 0 : i32
    %c0_i32_0 = arith.constant 0 : i32
    %c0_i32_1 = arith.constant 0 : i32
    return %c0_i32, %c0_i32_0 : i32, i32
  }
  func.func @transform_4(%arg0: i32) -> (i32, i32, i32) {
    %c0_i32 = arith.constant 0 : i32
    %c0_i32_0 = arith.constant 0 : i32
    %c0_i32_1 = arith.constant 0 : i32
    return %arg0, %c0_i32, %c0_i32_0 : i32, i32, i32
  }
}

</mosaic_0001>

<bundles_post_ra>
// kernel: tpu_custom_call.1
= control target key start
LH: loop header
LB: loop body
LE: loop exit
PB: predicated region body
PF: predicated region fallthrough
CT: control target
= control target key end

     0   :  { %9 = vsyncpa [#allocation3], 0  ;;  %s7618_s0 = inlined_call_operand.hbm [shape: f32[2,256,128], index: 0, kind: input, shape index: {}]   ;;  %s7619_s1 = inlined_call_operand.hbm [shape: bf16[128,32], index: 1, kind: input, shape index: {}]   ;;  %s7620_s2 = inlined_call_operand.hbm [shape: bf16[3,96,32], index: 2, kind: input, shape index: {}]   ;;  %s7621_s3 = inlined_call_operand.hbm [shape: bf16[32,128], index: 3, kind: input, shape index: {}]   ;;  %s7622_s4 = inlined_call_operand.hbm [shape: f32[2,256,128], index: 4, kind: output, shape index: {}]  }
   0x1   :  { %11 = vsyncpa [#allocation3 + $0x1], 0 }
   0x2   :  { %12 = vsyncpa [#allocation6], 0 }
   0x3   :  { %13 = vsyncpa [#allocation9], 0 }
   0x4   :  { %14 = vsyncpa [#allocation4], 0 }
   0x5   :  { %16 = vsyncpa [#allocation4 + $0x1], 0  ;;  %s4996_s15 = smov 0   ;;  %s4998_s16 = smov 0  }
   0x6   :  { %s5000_s17 = smov 0   ;;  %s5002_s18 = smov 0  }
   0x7 LB: > { %s5017_s19 = sadd.s32 4294967295, %s4955_s18   ;;  %s3943_s20 = sadd.s32 4294967294, %s4955_s18   ;;  %s4955_s18 = sphi %s5002_s18, %s8151_s18   ;;  %s4951_s17 = sphi %s5000_s17, %s8150_s17   ;;  %s4947_s16 = sphi %s4998_s16, %s8149_s16   ;;  %s4943_s15 = sphi %s4996_s15, %s8148_s15  }
   0x8   : > { %p42_p0 = scmp.ne.s32.totalorder %s4947_s16, %s4943_s15  ;;  %p7623_p1 = scmp.eq.s32.totalorder %s5017_s19, 0 }
   0x9   : > { %p135_p3 = scmp.eq.s32.totalorder %s3943_s20, 1  ;;  %p3944_p5 = scmp.ge.s32.totalorder %s4955_s18, 1 }
   0xa   : > { %p5026_p4 = por %p7623_p1, %p42_p0  ;;  %p142_p7 = scmp.lt.s32.totalorder %s4955_s18, 3 }
   0xb   : > { %p5031_p6 = por %p135_p3, %p42_p0  ;;  %s4957_s24 = smov [#allocation5]  }
   0xc   : > { %s7665_s21 = scalar_select %p5026_p4, 1, 0 }
   0xd   : > { %s7666_s22 = scalar_select %p5031_p6, 1, 0 }
   0xe   : > { %p5036_p8 = pnand %p3944_p5, %p142_p7  ;;  %s154_s25 = sshll.u32 %s4957_s24, 4  ;;  %s5040_s25 = int_to_ptr.vmem [resolvable:$true] %s154_s25 }
   0xf   : > { %s4958_s27 = smov [#allocation7]   ;;  %s4959_s29 = smov [#allocation8]  }
  0x10   : > { %s7667_s23 = scalar_select %p5036_p8, 1, 0 }
  0x11   : > { %p4471_p9 = pneg %p5036_p8  ;;  %s167_s28 = sshll.u32 %s4958_s27, 4  ;;  %s5051_s28 = int_to_ptr.vmem [resolvable:$true] %s167_s28 }
  0x12   : > { %s5053_s30 = sshll.u32 %s4959_s29, 4  ;;  %s4767_s7 = scalar_lea.hbm %s7619_s1, 1024  ;;  %s181_s30 = int_to_ptr.vmem [resolvable:$true] %s5053_s30 }
  0x13   : > { %p5047_p11 = pnand %p4471_p9, %p7623_p1  ;;  %p4768_p12 = scmp.ne.s32.totalorder %s7619_s1, %s4767_s7 }
  0x14   : > { %p4774_p5 = scmp.lt.u32.totalorder %s4767_s7, %s7619_s1 }
  0x15   : > { %p5063_p13 = pneg %p5047_p11 }
  0x17   : > { %p4770_p0 = pnand %p5063_p13, %p4768_p12 }
  0x19   : > { %p4771_p3 = pneg %p4770_p0 }
  0x1b   : > { %p4776_p7 = pnand %p4774_p5, %p4771_p3 }
  0x1d   : > { %4779 = shalt.err (!%p4776_p7)
}
  0x1e   : > { %s4780_s13 = scalar_lea.vmem %s5040_s25, 1024  ;;  %p4788_p2 = scmp.lt.s32.totalorder %s5040_s25, %s5040_s25 }
  0x1f   : > { %p4781_p9 = scmp.ne.s32.totalorder %s5040_s25, %s4780_s13  ;;  %p4789_p6 = scmp.lt.s32.totalorder %s4780_s13, %s4780_s13 }
  0x21   : > { %p4783_p10 = pnand %p4781_p9, %p5063_p13  ;;  %p4790_p12 = por %p4789_p6, %p4788_p2 }
  0x23   : > { %p4784_p1 = pneg %p4783_p10 }
  0x25   : > { %p4791_p0 = pnand %p4790_p12, %p4784_p1 }
  0x27   : > { %4794 = shalt.err (!%p4791_p0)
}
  0x28   : > { %s4960_s14 = smov 64   ;;  %s4961_s20 = smov 4  }
  0x29   : > { %4474 = dma.hbm_to_vmem [thread:$0]  (!%p5047_p11), %s7619_s1, 1024, %s5040_s25, [#allocation6], %s4960_s14, %s4960_s14, %s4961_s20  }
  0x2a   : > { %s4795_s6 = scalar_lea.hbm %s7620_s2, 2304 }
  0x2b   : > { %p4796_p1 = scmp.ne.s32.totalorder %s7620_s2, %s4795_s6  ;;  %p4802_p10 = scmp.lt.u32.totalorder %s4795_s6, %s7620_s2 }
  0x2d   : > { %p4798_p2 = pnand %p4796_p1, %p5063_p13 }
  0x2f   : > { %p4799_p6 = pneg %p4798_p2 }
  0x31   : > { %p4804_p3 = pnand %p4802_p10, %p4799_p6 }
  0x33   : > { %4807 = shalt.err (!%p4804_p3)
}
  0x34   : > { %s4808_s25 = scalar_lea.vmem %s5051_s28, 2304  ;;  %p4816_p12 = scmp.lt.s32.totalorder %s5051_s28, %s5051_s28 }
  0x35   : > { %p4809_p5 = scmp.ne.s32.totalorder %s5051_s28, %s4808_s25  ;;  %p4817_p0 = scmp.lt.s32.totalorder %s4808_s25, %s4808_s25 }
  0x37   : > { %p4811_p7 = pnand %p4809_p5, %p5063_p13  ;;  %p4818_p1 = por %p4817_p0, %p4816_p12 }
  0x39   : > { %p4812_p9 = pneg %p4811_p7 }
  0x3b   : > { %p4819_p2 = pnand %p4818_p1, %p4812_p9 }
  0x3d   : > { %4822 = shalt.err (!%p4819_p2)
}
  0x3e   : > { %4477 = dma.hbm_to_vmem [thread:$0]  (!%p5047_p11), %s7620_s2, 2304, %s5051_s28, [#allocation6], %s4960_s14, %s4960_s14, %s4961_s20  }
  0x3f   : > { %s4823_s29 = scalar_lea.hbm %s7621_s3, 256 }
  0x40   : > { %p4824_p6 = scmp.ne.s32.totalorder %s7621_s3, %s4823_s29  ;;  %p4830_p5 = scmp.lt.u32.totalorder %s4823_s29, %s7621_s3 }
  0x42   : > { %p4826_p10 = pnand %p4824_p6, %p5063_p13 }
  0x44   : > { %p4827_p3 = pneg %p4826_p10 }
  0x46   : > { %p4832_p7 = pnand %p4830_p5, %p4827_p3 }
  0x48   : > { %4835 = shalt.err (!%p4832_p7)
}
  0x49   : > { %s4836_s9 = scalar_lea.vmem %s181_s30, 256  ;;  %p4844_p1 = scmp.lt.s32.totalorder %s181_s30, %s181_s30 }
  0x4a   : > { %p4837_p9 = scmp.ne.s32.totalorder %s181_s30, %s4836_s9  ;;  %p4845_p2 = scmp.lt.s32.totalorder %s4836_s9, %s4836_s9 }
  0x4c   : > { %p4839_p12 = pnand %p4837_p9, %p5063_p13  ;;  %p4846_p4 = por %p4845_p2, %p4844_p1 }
  0x4e   : > { %p4840_p0 = pneg %p4839_p12 }
  0x50   : > { %p4847_p8 = pnand %p4846_p4, %p4840_p0 }
  0x52   : > { %4850 = shalt.err (!%p4847_p8)
}
  0x53   : > { %4480 = dma.hbm_to_vmem [thread:$0]  (!%p5047_p11), %s7621_s3, 256, %s181_s30, [#allocation9], %s4960_s14, %s4960_s14, %s4961_s20  }
  0x54   : > { %s5136_s10 = sadd.s32 1, %s4955_s18   ;;  %s29_s25 = sadd.s32 1, %s4951_s17 }
  0x55   : > { %s26_s26 = ssub.s32 %s4955_s18, %s5136_s10  ;;  %p36_p8 = scmp.ne.s32.totalorder %s4951_s17, %s4947_s16 }
  0x56   : > { %p27_p4 = scmp.eq.s32.totalorder %s26_s26, 0  ;;  %p37_p13 = scmp.eq.s32.totalorder %s4955_s18, 0 }
  0x57   : > { %p4492_p6 = scmp.lt.s32.totalorder %s4955_s18, 2  ;;  %p7670_p3 = scmp.eq.s32.totalorder %s5017_s19, 1 }
  0x58   : > { %s5146_s12 = scalar_select %p27_p4, %s4951_s17, %s29_s25  }
  0x59   : > { %p38_p10 = por %p37_p13, %p36_p8  ;;  %p5150_p5 = por %p7670_p3, %p36_p8 }
  0x5a   : > { %s194_s24 = sand.u32 1, %s4951_s17   ;;  %s4053_s27 = sshll.u32 %s4955_s18, 12 }
  0x5b   : > { %s3949_s30 = sshll.u32 %s194_s24, 8  ;;  %s5159_s29 = scalar_lea.hbm %s7618_s0, %s4053_s27 }
  0x5c   : > { %s198_s5 = scalar_lea.vmem [#allocation2], %s3949_s30  ;;  %p5161_p11 = pnand %p4492_p6, %p38_p10 }
  0x5d   : > { %s205_s6 = sshll.u32 %s198_s5, 4  ;;  %s5167_s8 = scalar_lea.sflag [#allocation3], %s194_s24  ;;  %s5165_s6 = int_to_ptr.vmem [resolvable:$true] %s205_s6 }
  0x5e   : > { %s4851_s9 = scalar_lea.hbm %s5159_s29, 4096  ;;  %p4853_p9 = pneg %p5161_p11 }
  0x5f   : > { %p4852_p7 = scmp.ne.s32.totalorder %s5159_s29, %s4851_s9  ;;  %s4856_s26 = scalar_lea.hbm %s7618_s0, 8192 }
  0x60   : > { %p4857_p1 = scmp.lt.u32.totalorder %s5159_s29, %s7618_s0  ;;  %p4858_p2 = scmp.lt.u32.totalorder %s4856_s26, %s4851_s9 }
  0x61   : > { %p4854_p12 = pnand %p4853_p9, %p4852_p7  ;;  %p4860_p8 = scmp.lt.u32.totalorder %s4851_s9, %s5159_s29 }
  0x62   : > { %p4859_p4 = por %p4858_p2, %p4857_p1 }
  0x63   : > { %p4855_p0 = pneg %p4854_p12 }
  0x64   : > { %p4861_p13 = por %p4860_p8, %p4859_p4 }
  0x66   : > { %p4862_p6 = pnand %p4861_p13, %p4855_p0 }
  0x68   : > { %4865 = shalt.err (!%p4862_p6)
}
  0x69   : > { %s4866_s24 = scalar_lea.vmem %s5165_s6, 4096  ;;  %s4962_s30 = smov [#allocation2]  }
  0x6a   : > { %p4867_p10 = scmp.ne.s32.totalorder %s5165_s6, %s4866_s24  ;;  %s4871_s14 = sshll.u32 %s4962_s30, 4  ;;  %s4872_s14 = int_to_ptr.vmem [resolvable:$false] %s4871_s14 }
  0x6b   : > { %s4873_s20 = scalar_lea.vmem %s4872_s14, 8192  ;;  %p4874_p12 = scmp.lt.s32.totalorder %s5165_s6, %s4872_s14 }
  0x6c   : > { %p4869_p3 = pnand %p4867_p10, %p4853_p9  ;;  %p4875_p1 = scmp.lt.s32.totalorder %s4873_s20, %s4866_s24 }
  0x6e   : > { %p4870_p7 = pneg %p4869_p3  ;;  %p4876_p2 = por %p4875_p1, %p4874_p12 }
  0x70   : > { %p4877_p4 = pnand %p4876_p2, %p4870_p7 }
  0x72   : > { %4880 = shalt.err (!%p4877_p4)
}
  0x73   : > { %s4963_s5 = smov 128   ;;  %s4964_s9 = smov 8  }
  0x74   : > { %4484 = dma.hbm_to_vmem [thread:$0]  (!%p5161_p11), %s5159_s29, 4096, %s5165_s6, %s5167_s8, %s4963_s5, %s4963_s5, %s4964_s9  }
  0x75   : > { %p7673_p9 = scmp.ne.s32.totalorder %s7667_s23, 0 }
  0x77   : > { %217 = sbr.rel (%p7673_p9) target bundleno = 1445 (0x5a5), region = 36 }
  0x7e   : > { %s5198_s28 = sand.u32 1, %s4947_s16   ;;  %p7674_p0 = scmp.ne.s32.totalorder %s7665_s21, 0 }
  0x7f   : > { %s3953_s11 = sshll.u32 %s5198_s28, 8  ;;  %s220_s26 = scalar_lea.sflag [#allocation3], %s5198_s28 }
  0x80   : > { %s5204_s25 = scalar_lea.vmem [#allocation2], %s3953_s11 }
  0x81   : > { %4926 = dma.done.wait (%p7674_p0), %s220_s26, 4096  }
  0x82   : > { %4928 = vsyncadd (%p7674_p0), %s220_s26, 4294963200  ;;  %p7675_p11 = scmp.eq.s32.totalorder %s5017_s19, 0 }
  0x84   : > { %4930 = dma.done.wait (%p7675_p11), [#allocation6], 3328   ;;  %p7676_p8 = pmov %p7675_p11 }
  0x86   : > { %4932 = vsyncadd (%p7676_p8), [#allocation6], 4294963968  ;;  %p7677_p13 = pmov %p7676_p8 }
  0x87   : > { %p7678_p6 = pmov %p7676_p8 }
  0x88   : > { %4934 = dma.done.wait (%p7677_p13), [#allocation9], 256  }
  0x89   : > { %4936 = vsyncadd (%p7678_p6), [#allocation9], 4294967040  ;;  %v4701_v0 = vld [vmem:[#allocation5] sm:$0xff]   ;;  %v4702_v1 = vld [vmem:[#allocation5 + $0x8] sm:$0xff]   ;;  %vm7650_vm0 = vcmask 261120   ;;  %s4965_s21 = smov 32  }
  0x8a   : > { %4163 = vmatprep.subr.bf16.mxu0 %v4701_v0  ;;  %v4703_v2 = vld [vmem:[#allocation5 + $0x10] sm:$0xff]   ;;  %v4704_v3 = vld [vmem:[#allocation5 + $0x18] sm:$0xff]   ;;  %v261_v4 = vld [vmem:[%s5204_s25] sm:$0xff]  ;;  %s4966_s23 = smov 64   ;;  %s7409_s29 = scalar_lea.vmem [#allocation10], %s3953_s11 }
  0x8b   : > { %4164 = vmatpush3.bf16.msra.mxu0 %v4701_v0  ;;  %v262_v5 = vld [vmem:[%s5204_s25 + $0x8] sm:$0xff]  ;;  %v4705_v7 = vld [vmem:[#allocation5 + $0x20] sm:$0xff]   ;;  %v4707_v9 = vld [vmem:[#allocation5 + $0x30] sm:$0xff]   ;;  %s4054_s6 = sshll.u32 %s5017_s19, 12  ;;  %s3841_s7 = sshll.u32 %s7409_s29, 4  ;;  %s7558_s7 = int_to_ptr.vmem [resolvable:$true] %s3841_s7 }
  0x8c   : > { %4165 = vmatprep.subr.bf16.mxu0 %v4702_v1  ;;  %v293_v6 = vpack.c.bf16 %v262_v5, %v261_v4  ;;  %v4706_v8 = vld [vmem:[#allocation5 + $0x28] sm:$0xff]   ;;  %v4708_v10 = vld [vmem:[#allocation5 + $0x38] sm:$0xff]   ;;  %v263_v11 = vld [vmem:[%s5204_s25 + $0x10] sm:$0xff]  ;;  %s7556_s27 = scalar_lea.hbm %s7622_s4, %s4054_s6  ;;  %s3828_s24 = scalar_lea.sflag [#allocation4], %s5198_s28 }
  0x8d   : > { %v264_v12 = vld [vmem:[%s5204_s25 + $0x18] sm:$0xff]  ;;  %v265_v13 = vld [vmem:[%s5204_s25 + $0x20] sm:$0xff]  ;;  %v266_v14 = vld [vmem:[%s5204_s25 + $0x28] sm:$0xff]  ;;  %s4881_s30 = scalar_lea.vmem %s7558_s7, 4096  ;;  %s4968_s14 = smov [#allocation10]  }
  0x8e   : > { %4179 = vmatprep.mubr.bf16.mxu0 %v293_v6  ;;  %v294_v15 = vpack.c.bf16 %v264_v12, %v263_v11  ;;  %v295_v16 = vpack.c.bf16 %v266_v14, %v265_v13  ;;  %v267_v17 = vld [vmem:[%s5204_s25 + $0x30] sm:$0xff]  ;;  %v268_v18 = vld [vmem:[%s5204_s25 + $0x38] sm:$0xff]  ;;  %v269_v19 = vld [vmem:[%s5204_s25 + $0x40] sm:$0xff]  ;;  %p4882_p10 = scmp.ne.s32.totalorder %s7558_s7, %s4881_s30  ;;  %s4885_s20 = sshll.u32 %s4968_s14, 4  ;;  %s4886_s20 = int_to_ptr.vmem [resolvable:$false] %s4885_s20 }
  0x8f   : > { %4166 = vmatpush3.bf16.msra.mxu0 %v4702_v1  ;;  %v270_v20 = vld [vmem:[%s5204_s25 + $0x48] sm:$0xff]  ;;  %v296_v21 = vpack.c.bf16 %v268_v18, %v267_v17  ;;  %v271_v23 = vld [vmem:[%s5204_s25 + $0x50] sm:$0xff]  ;;  %v272_v24 = vld [vmem:[%s5204_s25 + $0x58] sm:$0xff]  ;;  %s4887_s5 = scalar_lea.vmem %s4886_s20, 8192  ;;  %p4888_p12 = scmp.lt.s32.totalorder %s7558_s7, %s4886_s20 }
  0x90   : > { %4167 = vmatprep.subr.bf16.mxu0 %v4703_v2  ;;  %v297_v22 = vpack.c.bf16 %v270_v20, %v269_v19  ;;  %v273_v25 = vld [vmem:[%s5204_s25 + $0x60] sm:$0xff]  ;;  %v274_v26 = vld [vmem:[%s5204_s25 + $0x68] sm:$0xff]  ;;  %v298_v27 = vpack.c.bf16 %v272_v24, %v271_v23  ;;  %v275_v29 = vld [vmem:[%s5204_s25 + $0x70] sm:$0xff]  ;;  %p4883_p3 = pnand %p4882_p10, %p5150_p5  ;;  %p4889_p1 = scmp.lt.s32.totalorder %s4887_s5, %s4881_s30 }
  0x91   : > { %v299_v28 = vpack.c.bf16 %v274_v26, %v273_v25  ;;  %v276_v30 = vld [vmem:[%s5204_s25 + $0x78] sm:$0xff]  ;;  %v277_v31 = vld [vmem:[%s5204_s25 + $0x80] sm:$0xff]  ;;  %v278_v32 = vld [vmem:[%s5204_s25 + $0x88] sm:$0xff] }
  0x92   : > { %v300_v33 = vpack.c.bf16 %v276_v30, %v275_v29  ;;  %v301_v34 = vpack.c.bf16 %v278_v32, %v277_v31  ;;  %v279_v35 = vld [vmem:[%s5204_s25 + $0x90] sm:$0xff]  ;;  %v280_v36 = vld [vmem:[%s5204_s25 + $0x98] sm:$0xff]  ;;  %v281_v37 = vld [vmem:[%s5204_s25 + $0xa0] sm:$0xff]  ;;  %p4884_p7 = pneg %p4883_p3  ;;  %p4890_p2 = por %p4889_p1, %p4888_p12 }
  0x93   : > { %4168 = vmatpush3.bf16.msra.mxu0 %v4703_v2  ;;  %v282_v38 = vld [vmem:[%s5204_s25 + $0xa8] sm:$0xff]  ;;  %v302_v39 = vpack.c.bf16 %v280_v36, %v279_v35  ;;  %v283_v41 = vld [vmem:[%s5204_s25 + $0xb0] sm:$0xff]  ;;  %v284_v42 = vld [vmem:[%s5204_s25 + $0xb8] sm:$0xff] }
  0x94   : > { %4169 = vmatprep.subr.bf16.mxu0 %v4704_v3  ;;  %v303_v40 = vpack.c.bf16 %v282_v38, %v281_v37  ;;  %v285_v43 = vld [vmem:[%s5204_s25 + $0xc0] sm:$0xff]  ;;  %v286_v44 = vld [vmem:[%s5204_s25 + $0xc8] sm:$0xff]  ;;  %v304_v45 = vpack.c.bf16 %v284_v42, %v283_v41  ;;  %v287_v47 = vld [vmem:[%s5204_s25 + $0xd0] sm:$0xff]  ;;  %p4891_p4 = pnand %p4890_p2, %p4884_p7 }
  0x95   : > { %v305_v46 = vpack.c.bf16 %v286_v44, %v285_v43  ;;  %v288_v48 = vld [vmem:[%s5204_s25 + $0xd8] sm:$0xff]  ;;  %v289_v49 = vld [vmem:[%s5204_s25 + $0xe0] sm:$0xff]  ;;  %v290_v50 = vld [vmem:[%s5204_s25 + $0xe8] sm:$0xff] }
  0x96   : > { %v306_v51 = vpack.c.bf16 %v288_v48, %v287_v47  ;;  %v307_v52 = vpack.c.bf16 %v290_v50, %v289_v49  ;;  %v291_v53 = vld [vmem:[%s5204_s25 + $0xf0] sm:$0xff]  ;;  %v292_v54 = vld [vmem:[%s5204_s25 + $0xf8] sm:$0xff] }
  0x97   : > { %4170 = vmatpush3.bf16.msra.mxu0 %v4704_v3  ;;  %v308_v55 = vpack.c.bf16 %v292_v54, %v291_v53 }
  0x98   : > { %4171 = vmatprep.subr.bf16.mxu0 %v4705_v7 }
  0x9b   : > { %4172 = vmatpush3.bf16.msra.mxu0 %v4705_v7 }
  0x9c   : > { %4173 = vmatprep.subr.bf16.mxu0 %v4706_v8 }
  0x9f   : > { %4174 = vmatpush3.bf16.msra.mxu0 %v4706_v8 }
  0xa0   : > { %4175 = vmatprep.subr.bf16.mxu0 %v4707_v9 }
  0xa3   : > { %4176 = vmatpush3.bf16.msra.mxu0 %v4707_v9 }
  0xa4   : > { %4177 = vmatprep.subr.bf16.mxu0 %v4708_v10 }
  0xa7   : > { %4178 = vmatpush3.bf16.msra.mxu0 %v4708_v10 }
  0xaa   : > { %4180 = vmatmul.mubr.bf16.vlgmr.msra.gmra.mrb[0].mxu0 %v294_v15 }
  0xab   : > { %4183 = vmatprep.mubr.bf16.mxu0 %v295_v16 }
  0xb2   : > { %4184 = vmatmul.mubr.bf16.gmra.mrb[4].mxu0 %v296_v21 }
  0xb3   : > { %4187 = vmatprep.mubr.bf16.mxu0 %v297_v22 }
  0xba   : > { %4188 = vmatmul.mubr.bf16.gmra.mrb[8].mxu0 %v298_v27 }
  0xbb   : > { %4191 = vmatprep.mubr.bf16.mxu0 %v299_v28 }
  0xc2   : > { %4192 = vmatmul.mubr.bf16.gmra.mrb[12].mxu0 %v300_v33 }
  0xc3   : > { %4195 = vmatprep.mubr.bf16.mxu0 %v301_v34 }
  0xca   : > { %4196 = vmatmul.mubr.bf16.gmra.mrb[16].mxu0 %v302_v39 }
  0xcb   : > { %4199 = vmatprep.mubr.bf16.mxu0 %v303_v40 }
  0xd2   : > { %4200 = vmatmul.mubr.bf16.gmra.mrb[20].mxu0 %v304_v45 }
  0xd3   : > { %4203 = vmatprep.mubr.bf16.mxu0 %v305_v46 }
  0xda   : > { %4204 = vmatmul.mubr.bf16.gmra.mrb[24].mxu0 %v306_v51 }
  0xdb   : > { %4207 = vmatprep.mubr.bf16.mxu0 %v307_v52 }
  0xe2   : > { %4208 = vmatmul.mubr.bf16.gmra.mrb[28].mxu0 %v308_v55 }
 0x17d   : > { %v5250_v56 = vpop.f32.mrb[0].mxu0 }
 0x17e   : > { %v5252_v57 = vpop.f32.mrb[1].mxu0  ;;  %v608_v61 = vmul.f32 %v5250_v56, %v5250_v56  ;;  %v538_v2 = vsel %vm7650_vm0, %v5250_v56, 0.0 }
 0x17f   : > { %v606_v58 = vmul.f32 %v5252_v57, %v5252_v57  ;;  %v5256_v59 = vpop.f32.mrb[2].mxu0  ;;  %v535_v62 = vsel %vm7650_vm0, %v5252_v57, 0.0 }
 0x180   : > { %v5258_v60 = vpop.f32.mrb[3].mxu0  ;;  %v609_v4 = vmul.f32 %v5256_v59, %v5256_v59  ;;  %v641_v8 = vsel %vm7650_vm0, %v608_v61, 0.0  ;;  %v540_v9 = vsel %vm7650_vm0, %v5256_v59, 0.0 }
 0x181   : > { %v536_v63 = vsel %vm7650_vm0, %v5258_v60, 0.0  ;;  %v607_v0 = vmul.f32 %v5258_v60, %v5258_v60  ;;  %v638_v3 = vsel %vm7650_vm0, %v606_v58, 0.0 }
 0x182   : > { %v537_v1 = vadd.f32 %v536_v63, %v535_v62  ;;  %v643_v14 = vsel %vm7650_vm0, %v609_v4, 0.0 }
 0x183   : > { %v639_v5 = vsel %vm7650_vm0, %v607_v0, 0.0 }
 0x184   : > { %v539_v6 = vadd.f32 %v538_v2, %v537_v1  ;;  %v640_v7 = vadd.f32 %v639_v5, %v638_v3 }
 0x185   : > { %v5277_v10 = vpop.f32.mrb[4].mxu0 }
 0x186   : > { %v642_v11 = vadd.f32 %v641_v8, %v640_v7  ;;  %v5279_v12 = vpop.f32.mrb[5].mxu0  ;;  %v541_v13 = vadd.f32 %v540_v9, %v539_v6  ;;  %v612_v21 = vmul.f32 %v5277_v10, %v5277_v10  ;;  %v546_v27 = vsel %vm7650_vm0, %v5277_v10, 0.0 }
 0x187   : > { %v542_v15 = vsel %vm7650_vm0, %v5279_v12, 0.0  ;;  %v610_v16 = vmul.f32 %v5279_v12, %v5279_v12  ;;  %v5286_v17 = vpop.f32.mrb[6].mxu0 }
 0x188   : > { %v543_v18 = vadd.f32 %v542_v15, %v541_v13  ;;  %v644_v19 = vadd.f32 %v643_v14, %v642_v11  ;;  %v5288_v20 = vpop.f32.mrb[7].mxu0  ;;  %v613_v28 = vmul.f32 %v5286_v17, %v5286_v17  ;;  %v649_v32 = vsel %vm7650_vm0, %v612_v21, 0.0 }
 0x189   : > { %v645_v22 = vsel %vm7650_vm0, %v610_v16, 0.0  ;;  %v544_v23 = vsel %vm7650_vm0, %v5288_v20, 0.0  ;;  %v611_v24 = vmul.f32 %v5288_v20, %v5288_v20  ;;  %v548_v33 = vsel %vm7650_vm0, %v5286_v17, 0.0 }
 0x18a   : > { %v646_v25 = vadd.f32 %v645_v22, %v644_v19  ;;  %v545_v26 = vadd.f32 %v544_v23, %v543_v18  ;;  %v651_v38 = vsel %vm7650_vm0, %v613_v28, 0.0 }
 0x18b   : > { %v647_v29 = vsel %vm7650_vm0, %v611_v24, 0.0 }
 0x18c   : > { %v547_v30 = vadd.f32 %v546_v27, %v545_v26  ;;  %v648_v31 = vadd.f32 %v647_v29, %v646_v25 }
 0x18d   : > { %v5305_v34 = vpop.f32.mrb[8].mxu0 }
 0x18e   : > { %v650_v35 = vadd.f32 %v649_v32, %v648_v31  ;;  %v5307_v36 = vpop.f32.mrb[9].mxu0  ;;  %v549_v37 = vadd.f32 %v548_v33, %v547_v30  ;;  %v616_v45 = vmul.f32 %v5305_v34, %v5305_v34  ;;  %v554_v51 = vsel %vm7650_vm0, %v5305_v34, 0.0 }
 0x18f   : > { %v550_v39 = vsel %vm7650_vm0, %v5307_v36, 0.0  ;;  %v614_v40 = vmul.f32 %v5307_v36, %v5307_v36  ;;  %v5314_v41 = vpop.f32.mrb[10].mxu0 }
 0x190   : > { %v551_v42 = vadd.f32 %v550_v39, %v549_v37  ;;  %v652_v43 = vadd.f32 %v651_v38, %v650_v35  ;;  %v5316_v44 = vpop.f32.mrb[11].mxu0  ;;  %v617_v52 = vmul.f32 %v5314_v41, %v5314_v41  ;;  %v657_v58 = vsel %vm7650_vm0, %v616_v45, 0.0 }
 0x191   : > { %v653_v46 = vsel %vm7650_vm0, %v614_v40, 0.0  ;;  %v552_v47 = vsel %vm7650_vm0, %v5316_v44, 0.0  ;;  %v615_v48 = vmul.f32 %v5316_v44, %v5316_v44  ;;  %v556_v61 = vsel %vm7650_vm0, %v5314_v41, 0.0 }
 0x192   : > { %v654_v49 = vadd.f32 %v653_v46, %v652_v43  ;;  %v553_v50 = vadd.f32 %v552_v47, %v551_v42  ;;  %v659_v2 = vsel %vm7650_vm0, %v617_v52, 0.0 }
 0x193   : > { %v655_v53 = vsel %vm7650_vm0, %v615_v48, 0.0 }
 0x194   : > { %v555_v54 = vadd.f32 %v554_v51, %v553_v50  ;;  %v656_v55 = vadd.f32 %v655_v53, %v654_v49 }
 0x195   : > { %v5333_v62 = vpop.f32.mrb[12].mxu0 }
 0x196   : > { %v658_v63 = vadd.f32 %v657_v58, %v656_v55  ;;  %v5335_v0 = vpop.f32.mrb[13].mxu0  ;;  %v557_v1 = vadd.f32 %v556_v61, %v555_v54  ;;  %v620_v9 = vmul.f32 %v5333_v62, %v5333_v62  ;;  %v562_v18 = vsel %vm7650_vm0, %v5333_v62, 0.0 }
 0x197   : > { %v558_v3 = vsel %vm7650_vm0, %v5335_v0, 0.0  ;;  %v618_v4 = vmul.f32 %v5335_v0, %v5335_v0  ;;  %v5342_v5 = vpop.f32.mrb[14].mxu0 }
 0x198   : > { %v559_v6 = vadd.f32 %v558_v3, %v557_v1  ;;  %v660_v7 = vadd.f32 %v659_v2, %v658_v63  ;;  %v5344_v8 = vpop.f32.mrb[15].mxu0  ;;  %v621_v19 = vmul.f32 %v5342_v5, %v5342_v5  ;;  %v665_v24 = vsel %vm7650_vm0, %v620_v9, 0.0 }
 0x199   : > { %v661_v11 = vsel %vm7650_vm0, %v618_v4, 0.0  ;;  %v560_v13 = vsel %vm7650_vm0, %v5344_v8, 0.0  ;;  %v619_v14 = vmul.f32 %v5344_v8, %v5344_v8  ;;  %v564_v25 = vsel %vm7650_vm0, %v5342_v5, 0.0 }
 0x19a   : > { %v662_v15 = vadd.f32 %v661_v11, %v660_v7  ;;  %v561_v16 = vadd.f32 %v560_v13, %v559_v6  ;;  %v667_v30 = vsel %vm7650_vm0, %v621_v19, 0.0 }
 0x19b   : > { %v663_v21 = vsel %vm7650_vm0, %v619_v14, 0.0 }
 0x19c   : > { %v563_v22 = vadd.f32 %v562_v18, %v561_v16  ;;  %v664_v23 = vadd.f32 %v663_v21, %v662_v15 }
 0x19d   : > { %v5361_v26 = vpop.f32.mrb[16].mxu0 }
 0x19e   : > { %v666_v27 = vadd.f32 %v665_v24, %v664_v23  ;;  %v5363_v28 = vpop.f32.mrb[17].mxu0  ;;  %v565_v29 = vadd.f32 %v564_v25, %v563_v22  ;;  %v624_v39 = vmul.f32 %v5361_v26, %v5361_v26  ;;  %v570_v47 = vsel %vm7650_vm0, %v5361_v26, 0.0 }
 0x19f   : > { %v566_v31 = vsel %vm7650_vm0, %v5363_v28, 0.0  ;;  %v622_v32 = vmul.f32 %v5363_v28, %v5363_v28  ;;  %v5370_v33 = vpop.f32.mrb[18].mxu0 }
 0x1a0   : > { %v567_v35 = vadd.f32 %v566_v31, %v565_v29  ;;  %v668_v37 = vadd.f32 %v667_v30, %v666_v27  ;;  %v5372_v38 = vpop.f32.mrb[19].mxu0  ;;  %v625_v48 = vmul.f32 %v5370_v33, %v5370_v33  ;;  %v673_v52 = vsel %vm7650_vm0, %v624_v39, 0.0 }
 0x1a1   : > { %v669_v40 = vsel %vm7650_vm0, %v622_v32, 0.0  ;;  %v568_v42 = vsel %vm7650_vm0, %v5372_v38, 0.0  ;;  %v623_v43 = vmul.f32 %v5372_v38, %v5372_v38  ;;  %v572_v53 = vsel %vm7650_vm0, %v5370_v33, 0.0 }
 0x1a2   : > { %v670_v45 = vadd.f32 %v669_v40, %v668_v37  ;;  %v569_v46 = vadd.f32 %v568_v42, %v567_v35  ;;  %v675_v63 = vsel %vm7650_vm0, %v625_v48, 0.0 }
 0x1a3   : > { %v671_v49 = vsel %vm7650_vm0, %v623_v43, 0.0 }
 0x1a4   : > { %v571_v50 = vadd.f32 %v570_v47, %v569_v46  ;;  %v672_v51 = vadd.f32 %v671_v49, %v670_v45 }
 0x1a5   : > { %v5389_v54 = vpop.f32.mrb[20].mxu0 }
 0x1a6   : > { %v674_v55 = vadd.f32 %v673_v52, %v672_v51  ;;  %v5391_v58 = vpop.f32.mrb[21].mxu0  ;;  %v573_v61 = vadd.f32 %v572_v53, %v571_v50  ;;  %v628_v9 = vmul.f32 %v5389_v54, %v5389_v54  ;;  %v578_v18 = vsel %vm7650_vm0, %v5389_v54, 0.0 }
 0x1a7   : > { %v574_v1 = vsel %vm7650_vm0, %v5391_v58, 0.0  ;;  %v626_v2 = vmul.f32 %v5391_v58, %v5391_v58  ;;  %v5398_v3 = vpop.f32.mrb[22].mxu0 }
 0x1a8   : > { %v575_v4 = vadd.f32 %v574_v1, %v573_v61  ;;  %v676_v6 = vadd.f32 %v675_v63, %v674_v55  ;;  %v5400_v7 = vpop.f32.mrb[23].mxu0  ;;  %v629_v19 = vmul.f32 %v5398_v3, %v5398_v3  ;;  %v681_v24 = vsel %vm7650_vm0, %v628_v9, 0.0 }
 0x1a9   : > { %v677_v11 = vsel %vm7650_vm0, %v626_v2, 0.0  ;;  %v576_v13 = vsel %vm7650_vm0, %v5400_v7, 0.0  ;;  %v627_v14 = vmul.f32 %v5400_v7, %v5400_v7  ;;  %v580_v25 = vsel %vm7650_vm0, %v5398_v3, 0.0 }
 0x1aa   : > { %v678_v15 = vadd.f32 %v677_v11, %v676_v6  ;;  %v577_v16 = vadd.f32 %v576_v13, %v575_v4  ;;  %v683_v32 = vsel %vm7650_vm0, %v629_v19, 0.0 }
 0x1ab   : > { %v679_v21 = vsel %vm7650_vm0, %v627_v14, 0.0 }
 0x1ac   : > { %v579_v22 = vadd.f32 %v578_v18, %v577_v16  ;;  %v680_v23 = vadd.f32 %v679_v21, %v678_v15  ;;  %v4709_v16 = vld [vmem:[#allocation7 + $0x30] sm:$0xff]   ;;  %v4710_v18 = vld [vmem:[#allocation7 + $0x38] sm:$0xff]  }
 0x1ad   : > { %v5417_v27 = vpop.f32.mrb[24].mxu0  ;;  %4379 = vmatprep.subr.bf16.mxu1 %v4709_v16  ;;  %4211 = vmatprep.subr.bf16.mxu0 %v4709_v16 }
 0x1ae   : > { %v682_v29 = vadd.f32 %v681_v24, %v680_v23  ;;  %v5419_v30 = vpop.f32.mrb[25].mxu0  ;;  %v581_v31 = vadd.f32 %v580_v25, %v579_v22  ;;  %v632_v45 = vmul.f32 %v5417_v27, %v5417_v27  ;;  %v586_v51 = vsel %vm7650_vm0, %v5417_v27, 0.0  ;;  %4385 = vmatpush3.bf16.msra.mxu1 %v4709_v16  ;;  %4212 = vmatpush3.bf16.msra.mxu0 %v4709_v16 }
 0x1af   : > { %v582_v35 = vsel %vm7650_vm0, %v5419_v30, 0.0  ;;  %v630_v37 = vmul.f32 %v5419_v30, %v5419_v30  ;;  %v5426_v39 = vpop.f32.mrb[26].mxu0  ;;  %v808_v23 = vlaneseq  ;;  %4380 = vmatprep.subr.bf16.mxu1 %v4710_v18  ;;  %4213 = vmatprep.subr.bf16.mxu0 %v4710_v18 }
 0x1b0   : > { %v583_v40 = vadd.f32 %v582_v35, %v581_v31  ;;  %v684_v42 = vadd.f32 %v683_v32, %v682_v29  ;;  %v5428_v43 = vpop.f32.mrb[27].mxu0  ;;  %v633_v52 = vmul.f32 %v5426_v39, %v5426_v39  ;;  %v689_v63 = vsel %vm7650_vm0, %v632_v45, 0.0  ;;  %v4711_v45 = vld [vmem:[#allocation7 + $0x40] sm:$0xff]  }
 0x1b1   : > { %v685_v46 = vsel %vm7650_vm0, %v630_v37, 0.0  ;;  %v584_v47 = vsel %vm7650_vm0, %v5428_v43, 0.0  ;;  %v631_v48 = vmul.f32 %v5428_v43, %v5428_v43  ;;  %v588_v1 = vsel %vm7650_vm0, %v5426_v39, 0.0 }
 0x1b2   : > { %v686_v49 = vadd.f32 %v685_v46, %v684_v42  ;;  %v585_v50 = vadd.f32 %v584_v47, %v583_v40  ;;  %v691_v11 = vsel %vm7650_vm0, %v633_v52, 0.0  ;;  %4386 = vmatpush3.bf16.msra.mxu1 %v4710_v18  ;;  %4214 = vmatpush3.bf16.msra.mxu0 %v4710_v18 }
 0x1b3   : > { %v687_v53 = vsel %vm7650_vm0, %v631_v48, 0.0  ;;  %4381 = vmatprep.subr.bf16.mxu1 %v4711_v45  ;;  %4215 = vmatprep.subr.bf16.mxu0 %v4711_v45 }
 0x1b4   : > { %v587_v55 = vadd.f32 %v586_v51, %v585_v50  ;;  %v688_v61 = vadd.f32 %v687_v53, %v686_v49  ;;  %v5473_v50 = vshrl.u32 %v808_v23, 7 }
 0x1b5   : > { %v5445_v2 = vpop.f32.mrb[28].mxu0 }
 0x1b6   : > { %v690_v4 = vadd.f32 %v689_v63, %v688_v61  ;;  %v5447_v6 = vpop.f32.mrb[29].mxu0  ;;  %v589_v9 = vadd.f32 %v588_v1, %v587_v55  ;;  %v636_v24 = vmul.f32 %v5445_v2, %v5445_v2  ;;  %v594_v37 = vsel %vm7650_vm0, %v5445_v2, 0.0  ;;  %4387 = vmatpush3.bf16.msra.mxu1 %v4711_v45  ;;  %4216 = vmatpush3.bf16.msra.mxu0 %v4711_v45 }
 0x1b7   : > { %v590_v13 = vsel %vm7650_vm0, %v5447_v6, 0.0  ;;  %v634_v14 = vmul.f32 %v5447_v6, %v5447_v6  ;;  %v5454_v15 = vpop.f32.mrb[30].mxu0  ;;  %v5477_v63 = vadd.s32 104, %v5473_v50  ;;  %v5484_v16 = vadd.s32 136, %v5473_v50 }
 0x1b8   : > { %v591_v19 = vadd.f32 %v590_v13, %v589_v9  ;;  %v692_v21 = vadd.f32 %v691_v11, %v690_v4  ;;  %v5456_v22 = vpop.f32.mrb[31].mxu0  ;;  %v637_v40 = vmul.f32 %v5454_v15, %v5454_v15  ;;  %v697_v48 = vsel %vm7650_vm0, %v636_v24, 0.0 }
 0x1b9   : > { %v693_v25 = vsel %vm7650_vm0, %v634_v14, 0.0  ;;  %v592_v29 = vsel %vm7650_vm0, %v5456_v22, 0.0  ;;  %v635_v31 = vmul.f32 %v5456_v22, %v5456_v22  ;;  %v596_v49 = vsel %vm7650_vm0, %v5454_v15, 0.0 }
 0x1ba   : > { %v694_v32 = vadd.f32 %v693_v25, %v692_v21  ;;  %v593_v35 = vadd.f32 %v592_v29, %v591_v19  ;;  %v699_v53 = vsel %vm7650_vm0, %v637_v40, 0.0  ;;  %v5480_v13 = vadd.s32 120, %v5473_v50 }
 0x1bb   : > { %v695_v42 = vsel %vm7650_vm0, %v635_v31, 0.0  ;;  %v5487_v18 = vadd.s32 152, %v5473_v50  ;;  %v5490_v19 = vadd.s32 168, %v5473_v50  ;;  %v5493_v24 = vadd.s32 184, %v5473_v50 }
 0x1bc   : > { %v595_v46 = vadd.f32 %v594_v37, %v593_v35  ;;  %v696_v47 = vadd.f32 %v695_v42, %v694_v32  ;;  %v5496_v25 = vadd.s32 200, %v5473_v50  ;;  %v5499_v29 = vadd.s32 216, %v5473_v50 }
 0x1bd   : > { %v5502_v31 = vadd.s32 232, %v5473_v50  ;;  %v5505_v32 = vadd.s32 248, %v5473_v50  ;;  %v5508_v35 = vadd.s32 8, %v5473_v50  ;;  %v5512_v45 = vadd.s32 24, %v5473_v50 }
 0x1be   : > { %v597_v51 = vadd.f32 %v596_v49, %v595_v46  ;;  %v698_v52 = vadd.f32 %v697_v48, %v696_v47  ;;  %7679 = vst [vmem:[#allocation15_spill] sm:$0xff] %v5499_v29  ;;  %v5518_v49 = vadd.s32 40, %v5473_v50  ;;  %v5621_v42 = vadd.s32 176, %v5473_v50 }
 0x1bf   : > { %7680 = vst [vmem:[#allocation16_spill] sm:$0xff] %v5502_v31  ;;  %7681 = vst [vmem:[#allocation17_spill] sm:$0xff] %v5505_v32  ;;  %v5624_v14 = vadd.s32 192, %v5473_v50  ;;  %v5627_v48 = vadd.s32 208, %v5473_v50  ;;  %v5665_v31 = vadd.s32 80, %v5473_v50  ;;  %vm1482_vm1 = vcmp.lt.s32.totalorder %v5473_v50, 7 }
 0x1c0   : > { %v598_v55 = vrot.slane %v597_v51, 4  ;;  %v700_v61 = vadd.f32 %v699_v53, %v698_v52  ;;  %7682 = vst [vmem:[#allocation18_spill] sm:$0xff] %v5508_v35  ;;  %7683 = vst [vmem:[#allocation19_spill] sm:$0xff] %v5512_v45  ;;  %v5642_v45 = vadd.s32 32, %v5473_v50  ;;  %v5645_v35 = vadd.s32 48, %v5473_v50 }
 0x1c1   : > { %7684 = vst [vmem:[#allocation20_spill] sm:$0xff] %v5518_v49  ;;  %v5639_v49 = vadd.s32 16, %v5473_v50  ;;  %7694 = vst [vmem:[#allocation30_spill] sm:$0xff] %v5665_v31 }
 0x1c2   : > { %v599_v1 = vadd.f32 %v598_v55, %v597_v51  ;;  %v701_v4 = vrot.slane %v700_v61, 4  ;;  %v5534_v55 = vadd.s32 72, %v5473_v50  ;;  %7691 = vst [vmem:[#allocation27_spill] sm:$0xff] %v5642_v45  ;;  %7692 = vst [vmem:[#allocation28_spill] sm:$0xff] %v5645_v35 }
 0x1c3   : > { %7690 = vst [vmem:[#allocation26_spill] sm:$0xff] %v5639_v49 }
 0x1c4   : > { %v600_v9 = vrot.slane %v599_v1, 2  ;;  %v702_v11 = vadd.f32 %v701_v4, %v700_v61  ;;  %7686 = vst [vmem:[#allocation22_spill] sm:$0xff] %v5534_v55  ;;  %v5537_v61 = vadd.s32 88, %v5473_v50  ;;  %v5540_v4 = vadd.s32 96, %v5473_v50 }
 0x1c6   : > { %v601_v21 = vadd.f32 %v600_v9, %v599_v1  ;;  %v703_v23 = vrot.slane %v702_v11, 2  ;;  %7687 = vst [vmem:[#allocation23_spill] sm:$0xff] %v5537_v61  ;;  %v5609_v1 = vadd.s32 112, %v5473_v50 }
 0x1c8   : > { %v602_v37 = vrot.slane %v601_v21, 1  ;;  %v704_v40 = vadd.f32 %v703_v23, %v702_v11 }
 0x1ca   : > { %v603_v51 = vadd.f32 %v602_v37, %v601_v21  ;;  %v705_v52 = vrot.slane %v704_v40, 1  ;;  %v5530_v21 = vadd.s32 56, %v5473_v50  ;;  %v5635_v37 = vadd.s32 240, %v5473_v50 }
 0x1cc   : > { %v5526_v11 = vmul.f32 0.00390625, %v603_v51  ;;  %v706_v23 = vadd.f32 %v705_v52, %v704_v40  ;;  %7685 = vst [vmem:[#allocation21_spill] sm:$0xff] %v5530_v21  ;;  %7689 = vst [vmem:[#allocation25_spill] sm:$0xff] %v5635_v37  ;;  %v4712_v51 = vld [vmem:[#allocation7 + $0x48] sm:$0xff]   ;;  %v5659_v21 = vadd.s32 64, %v5473_v50 }
 0x1cd   : > { %4382 = vmatprep.subr.bf16.mxu1 %v4712_v51  ;;  %4217 = vmatprep.subr.bf16.mxu0 %v4712_v51 }
 0x1ce   : > { %v707_v9 = vmul.f32 0.00390625, %v706_v23  ;;  %v708_v40 = vmul.f32 %v5526_v11, %v5526_v11  ;;  %v722_v47 = vsub.f32 %v5335_v0, %v5526_v11  ;;  %v723_v46 = vsub.f32 %v5344_v8, %v5526_v11  ;;  %4388 = vmatpush3.bf16.msra.mxu1 %v4712_v51  ;;  %4218 = vmatpush3.bf16.msra.mxu0 %v4712_v51 }
 0x1cf   : > { %v5615_v0 = vadd.s32 144, %v5473_v50  ;;  %v5618_v8 = vadd.s32 160, %v5473_v50  ;;  %v5632_v23 = vadd.s32 224, %v5473_v50  ;;  %7693 = vst [vmem:[#allocation29_spill] sm:$0xff] %v5659_v21  ;;  %v7695_v29 = vsub.f32 %v5456_v22, %v5526_v11 }
 0x1d0   : > { %v709_v53 = vsub.f32 %v707_v9, %v708_v40  ;;  %v7696_v51 = vsub.f32 %v5252_v57, %v5526_v11  ;;  %v7697_v52 = vsub.f32 %v5258_v60, %v5526_v11  ;;  %v7698_v32 = vsub.f32 %v5250_v56, %v5526_v11 }
 0x1d1   : > { %7688 = vst [vmem:[#allocation24_spill] sm:$0xff] %v5632_v23  ;;  %v7699_v35 = vsub.f32 %v5256_v59, %v5526_v11  ;;  %v7700_v22 = vsub.f32 %v5279_v12, %v5526_v11  ;;  %v7701_v60 = vsub.f32 %v5288_v20, %v5526_v11  ;;  %v7702_v56 = vsub.f32 %v5277_v10, %v5526_v11 }
 0x1d2   : > { %v742_v40 = vadd.f32 1e-05, %v709_v53  ;;  %v7703_v59 = vsub.f32 %v5286_v17, %v5526_v11  ;;  %v7704_v12 = vsub.f32 %v5307_v36, %v5526_v11  ;;  %v7706_v17 = vsub.f32 %v5305_v34, %v5526_v11 }
 0x1d3   : > { %v7707_v36 = vsub.f32 %v5314_v41, %v5526_v11  ;;  %v7734_v10 = vand.u32 15, %v5484_v16 }
 0x1d4   : > { %4729 = vrsqrt.f32 %v742_v40  ;;  %v5612_v40 = vadd.s32 128, %v5473_v50 }
 0x1d5   : > { %vm5856_vm4 = vcmp.eq.s32.totalorder %v7734_v10, 15 }
 0x1de   : > { %v4730_v55 = vpop.eup %4729 }
 0x1df   : > { %v773_v9 = vmul.f32 %v4730_v55, %v7695_v29  ;;  %v756_v37 = vmul.f32 %v4730_v55, %v722_v47  ;;  %v757_v53 = vmul.f32 %v4730_v55, %v723_v46  ;;  %v744_v23 = vmul.f32 %v4730_v55, %v7696_v51 }
 0x1e0   : > { %v745_v49 = vmul.f32 %v4730_v55, %v7697_v52  ;;  %v746_v61 = vmul.f32 %v4730_v55, %v7698_v32  ;;  %v747_v45 = vmul.f32 %v4730_v55, %v7699_v35  ;;  %v748_v29 = vmul.f32 %v4730_v55, %v7700_v22 }
 0x1e1   : > { %v5685_v46 = vmax.f32 %v773_v9, 0.0  ;;  %v5687_v57 = vmax.f32 %v756_v37, 0.0  ;;  %v5689_v47 = vmax.f32 %v757_v53, 0.0  ;;  %v749_v52 = vmul.f32 %v4730_v55, %v7701_v60 }
 0x1e2   : > { %v750_v32 = vmul.f32 %v4730_v55, %v7702_v56  ;;  %v751_v35 = vmul.f32 %v4730_v55, %v7703_v59  ;;  %v752_v9 = vmul.f32 %v4730_v55, %v7704_v12  ;;  %v7705_v37 = vsub.f32 %v5316_v44, %v5526_v11 }
 0x1e3   : > { %v4541_v20 = vpack.i.bf16 %v5689_v47, %v5687_v57  ;;  %v754_v60 = vmul.f32 %v4730_v55, %v7706_v17  ;;  %v755_v56 = vmul.f32 %v4730_v55, %v7707_v36  ;;  %v7708_v44 = vsub.f32 %v5333_v62, %v5526_v11 }
 0x1e4   : > { %v753_v53 = vmul.f32 %v4730_v55, %v7705_v37  ;;  %v7709_v12 = vsub.f32 %v5342_v5, %v5526_v11  ;;  %v7710_v51 = vsub.f32 %v5363_v28, %v5526_v11  ;;  %v7711_v17 = vsub.f32 %v5372_v38, %v5526_v11 }
 0x1e5   : > { %v758_v59 = vmul.f32 %v4730_v55, %v7708_v44  ;;  %4542 = vrot.lane.b32.xlu0 %v4541_v20, %s4965_s21  ;;  %v7712_v36 = vsub.f32 %v5361_v26, %v5526_v11  ;;  %v7713_v44 = vsub.f32 %v5370_v33, %v5526_v11  ;;  %v7715_v28 = vsub.f32 %v5400_v7, %v5526_v11 }
 0x1e6   : > { %v759_v37 = vmul.f32 %v4730_v55, %v7709_v12  ;;  %v760_v34 = vmul.f32 %v4730_v55, %v7710_v51  ;;  %v761_v41 = vmul.f32 %v4730_v55, %v7711_v17  ;;  %v7714_v12 = vsub.f32 %v5391_v58, %v5526_v11 }
 0x1e7   : > { %v762_v62 = vmul.f32 %v4730_v55, %v7712_v36  ;;  %v763_v5 = vmul.f32 %v4730_v55, %v7713_v44  ;;  %v765_v51 = vmul.f32 %v4730_v55, %v7715_v28  ;;  %v7716_v38 = vsub.f32 %v5389_v54, %v5526_v11 }
 0x1e8   : > { %v764_v20 = vmul.f32 %v4730_v55, %v7714_v12  ;;  %v7717_v26 = vsub.f32 %v5398_v3, %v5526_v11  ;;  %v7718_v33 = vsub.f32 %v5419_v30, %v5526_v11  ;;  %v7719_v58 = vsub.f32 %v5428_v43, %v5526_v11 }
 0x1e9   : > { %v766_v17 = vmul.f32 %v4730_v55, %v7716_v38  ;;  %v7720_v7 = vsub.f32 %v5417_v27, %v5526_v11  ;;  %v7721_v54 = vsub.f32 %v5426_v39, %v5526_v11  ;;  %v7722_v3 = vsub.f32 %v5447_v6, %v5526_v11  ;;  %v7750_v27 = vld [vmem:[#allocation15_spill] sm:$0xff] }
 0x1ea   : > { %v767_v36 = vmul.f32 %v4730_v55, %v7717_v26  ;;  %v768_v44 = vmul.f32 %v4730_v55, %v7718_v33  ;;  %v769_v12 = vmul.f32 %v4730_v55, %v7719_v58  ;;  %v7723_v30 = vsub.f32 %v5445_v2, %v5526_v11 }
 0x1eb   : > { %v770_v28 = vmul.f32 %v4730_v55, %v7720_v7  ;;  %v771_v38 = vmul.f32 %v4730_v55, %v7721_v54  ;;  %v772_v26 = vmul.f32 %v4730_v55, %v7722_v3  ;;  %v7724_v43 = vsub.f32 %v5454_v15, %v5526_v11  ;;  %v4713_v3 = vld [vmem:[#allocation7 + $0x50] sm:$0xff]  }
 0x1ec   : > { %v774_v33 = vmul.f32 %v4730_v55, %v7723_v30  ;;  %v5769_v22 = vmax.f32 %v758_v59, 0.0  ;;  %v5774_v7 = vmax.f32 %v759_v37, 0.0  ;;  %v5776_v6 = vmax.f32 %v744_v23, 0.0  ;;  %4383 = vmatprep.subr.bf16.mxu1 %v4713_v3  ;;  %4219 = vmatprep.subr.bf16.mxu0 %v4713_v3 }
 0x1ed   : > { %v775_v58 = vmul.f32 %v4730_v55, %v7724_v43  ;;  %v7725_v54 = vand.u32 15, %v5477_v63  ;;  %v5784_v15 = vmax.f32 %v745_v49, 0.0  ;;  %v5786_v55 = vmax.f32 %v746_v61, 0.0  ;;  %4389 = vmatpush3.bf16.msra.mxu1 %v4713_v3  ;;  %4220 = vmatpush3.bf16.msra.mxu0 %v4713_v3 }
 0x1ee   : > { %v5788_v11 = vmax.f32 %v747_v45, 0.0  ;;  %v5790_v59 = vmax.f32 %v748_v29, 0.0  ;;  %v4546_v37 = vpack.i.bf16 %v5774_v7, %v5769_v22  ;;  %v5794_v23 = vmax.f32 %v749_v52, 0.0 }
 0x1ef   : > { %vm5780_vm2 = vcmp.eq.s32.totalorder %v7725_v54, 15  ;;  %v5796_v30 = vmax.f32 %v750_v32, 0.0  ;;  %v5798_v63 = vmax.f32 %v751_v35, 0.0  ;;  %v5800_v43 = vmax.f32 %v752_v9, 0.0 }
 0x1f0   : > { %v5802_v49 = vmax.f32 %v753_v53, 0.0  ;;  %v5804_v61 = vmax.f32 %v754_v60, 0.0  ;;  %v5806_v45 = vmax.f32 %v755_v56, 0.0  ;;  %4547 = vrot.lane.b32.xlu0 %v4546_v37, %s4965_s21  ;;  %v5809_v29 = vmax.f32 %v760_v34, 0.0 }
 0x1f1   : > { %v5811_v52 = vmax.f32 %v761_v41, 0.0  ;;  %v5813_v32 = vmax.f32 %v762_v62, 0.0  ;;  %v5815_v35 = vmax.f32 %v763_v5, 0.0  ;;  %v5817_v9 = vmax.f32 %v764_v20, 0.0 }
 0x1f2   : > { %v5819_v53 = vmax.f32 %v765_v51, 0.0  ;;  %v5821_v60 = vmax.f32 %v766_v17, 0.0  ;;  %v5823_v56 = vmax.f32 %v767_v36, 0.0  ;;  %v5825_v54 = vmax.f32 %v768_v44, 0.0  ;;  %v5913_v36 = vld [vmem:[#allocation7] sm:$0xff]  }
 0x1f3   : > { %7728 = vst [vmem:[#allocation31_spill] sm:$0xff] %v5813_v32  ;;  %7729 = vst [vmem:[#allocation32_spill] sm:$0xff] %v5815_v35  ;;  %v5827_v34 = vmax.f32 %v769_v12, 0.0  ;;  %v5829_v41 = vmax.f32 %v770_v28, 0.0  ;;  %v5831_v62 = vmax.f32 %v771_v38, 0.0  ;;  %v5833_v5 = vmax.f32 %v772_v26, 0.0 }
 0x1f4   : > { %7730 = vst [vmem:[#allocation33_spill] sm:$0xff] %v5817_v9  ;;  %v5835_v37 = vmax.f32 %v774_v33, 0.0  ;;  %v5837_v20 = vmax.f32 %v775_v58, 0.0  ;;  %v7640_v51 = vrot.slane %v5687_v57, 1  ;;  %v1463_v44 = vrot.slane %v5689_v47, 1  ;;  %7749 = vst [vmem:[#allocation34_spill] sm:$0xff] %v5913_v36 }
 0x1f5   : > { %v1464_v12 = vrot.slane %v5769_v22, 1  ;;  %v7731_v28 = vand.u32 15, %v5480_v13  ;;  %v7737_v3 = vand.u32 15, %v5487_v18  ;;  %v7740_v33 = vand.u32 15, %v5490_v19 }
 0x1f6   : > { %v4551_v2 = vpack.i.bf16 %v5811_v52, %v5809_v29  ;;  %v4566_v19 = vpack.i.bf16 %v5815_v35, %v5813_v32  ;;  %v4576_v26 = vpack.i.bf16 %v5819_v53, %v5817_v9  ;;  %v7751_v18 = vand.u32 15, %v7750_v27 }
 0x1f7   : > { %vm5846_vm3 = vcmp.eq.s32.totalorder %v7731_v28, 15  ;;  %v1500_v13 = vsel %vm1482_vm1, %v1463_v44, %v1464_v12  ;;  %v1501_v28 = vsel %vm1482_vm1, %v7640_v51, %v1463_v44  ;;  %vm5870_vm5 = vcmp.eq.s32.totalorder %v7737_v3, 15  ;;  %v4714_v3 = vld [vmem:[#allocation7 + $0x58] sm:$0xff]  }
 0x1f8   : > { %v1592_v10 = vsel %vm5780_vm2, 0.0, %v1500_v13  ;;  %vm5888_vm6 = vcmp.eq.s32.totalorder %v7740_v33, 15  ;;  %4384 = vmatprep.subr.bf16.mxu1 %v4714_v3  ;;  %v7743_v13 = vand.u32 15, %v5493_v24  ;;  %4221 = vmatprep.subr.bf16.mxu0 %v4714_v3  ;;  %v1465_v24 = vrot.slane %v5774_v7, 1 }
 0x1f9   : > { %v4556_v44 = vpack.i.bf16 %v1592_v10, %v1501_v28  ;;  %v7746_v28 = vand.u32 15, %v5496_v25  ;;  %4390 = vmatpush3.bf16.msra.mxu1 %v4714_v3  ;;  %4222 = vmatpush3.bf16.msra.mxu0 %v4714_v3  ;;  %v1467_v25 = vrot.slane %v5811_v52, 1  ;;  %v1469_v10 = vrot.slane %v5815_v35, 1 }
 0x1fa   : > { %vm5903_vm7 = vcmp.eq.s32.totalorder %v7743_v13, 15  ;;  %v1466_v13 = vrot.slane %v5809_v29, 1  ;;  %4255 = vmatprep.subr.bf16.mxu1 %v5913_v36  ;;  %4552 = vrot.lane.b32.xlu0 %v4551_v2, %s4965_s21  ;;  %v1499_v3 = vsel %vm1482_vm1, %v1464_v12, %v1465_v24  ;;  %v1470_v51 = vrot.slane %v5817_v9, 1 }
 0x1fb   : > { %4557 = vrot.lane.b32.xlu1 %v4556_v44, %s4966_s23  ;;  %vm5909_vm8 = vcmp.eq.s32.totalorder %v7746_v28, 15  ;;  %v1468_v28 = vrot.slane %v5813_v32, 1  ;;  %vm5936_vm9 = vcmp.eq.s32.totalorder %v7751_v18, 15  ;;  %v1471_v12 = vrot.slane %v5819_v53, 1 }
 0x1fc   : > { %v1498_v33 = vsel %vm1482_vm1, %v1465_v24, %v1466_v13  ;;  %v1497_v31 = vsel %vm1482_vm1, %v1466_v13, %v1467_v25  ;;  %v7754_v24 = vld [vmem:[#allocation16_spill] sm:$0xff]  ;;  %v1494_v38 = vsel %vm1482_vm1, %v1469_v10, %v1470_v51  ;;  %v4586_v17 = vpack.i.bf16 %v5823_v56, %v5821_v60 }
 0x1fd   : > { %v1594_v36 = vsel %vm5846_vm3, 0.0, %v1498_v33  ;;  %v1496_v2 = vsel %vm1482_vm1, %v1467_v25, %v1468_v28  ;;  %v7755_v35 = vand.u32 15, %v7754_v24  ;;  %v1495_v33 = vsel %vm1482_vm1, %v1468_v28, %v1469_v10 }
 0x1fe   : > { %v4561_v27 = vpack.i.bf16 %v1594_v36, %v1499_v3  ;;  %v1596_v18 = vsel %vm5856_vm4, 0.0, %v1496_v2  ;;  %v1598_v13 = vsel %vm5870_vm5, 0.0, %v1494_v38  ;;  %v1472_v25 = vrot.slane %v5821_v60, 1 }
 0x1ff   : > { %vm5949_vm10 = vcmp.eq.s32.totalorder %v7755_v35, 15  ;;  %v4571_v21 = vpack.i.bf16 %v1596_v18, %v1497_v31  ;;  %v1493_v35 = vsel %vm1482_vm1, %v1470_v51, %v1471_v12  ;;  %v4581_v36 = vpack.i.bf16 %v1598_v13, %v1495_v33  ;;  %v7758_v31 = vld [vmem:[#allocation17_spill] sm:$0xff]  ;;  %v7762_v18 = vld [vmem:[#allocation18_spill] sm:$0xff] }
 0x200   : > { %4562 = vrot.lane.b32.xlu1 %v4561_v27, %s4966_s23  ;;  %v1473_v10 = vrot.slane %v5823_v56, 1  ;;  %v7759_v28 = vand.u32 15, %v7758_v31  ;;  %v1492_v51 = vsel %vm1482_vm1, %v1471_v12, %v1472_v25  ;;  %v1474_v2 = vrot.slane %v5825_v54, 1 }
 0x201   : > { %4572 = vrot.lane.b32.xlu0 %v4571_v21, %s4966_s23  ;;  %v1475_v24 = vrot.slane %v5827_v34, 1  ;;  %v1476_v27 = vrot.slane %v5829_v41, 1  ;;  %v7763_v38 = vand.u32 15, %v7762_v18  ;;  %v1600_v13 = vsel %vm5888_vm6, 0.0, %v1492_v51 }
 0x202   : > { %vm5972_vm11 = vcmp.eq.s32.totalorder %v7759_v28, 15  ;;  %v1491_v21 = vsel %vm1482_vm1, %v1472_v25, %v1473_v10  ;;  %v7766_v28 = vld [vmem:[#allocation19_spill] sm:$0xff]  ;;  %v1490_v39 = vsel %vm1482_vm1, %v1473_v10, %v1474_v2  ;;  %v1479_v12 = vrot.slane %v5685_v46, 1 }
 0x203   : > { %vm5984_vm12 = vcmp.eq.s32.totalorder %v7763_v38, 15  ;;  %v7767_v3 = vand.u32 15, %v7766_v28  ;;  %v4591_v38 = vpack.i.bf16 %v1600_v13, %v1493_v35  ;;  %v1488_v51 = vsel %vm1482_vm1, %v1475_v24, %v1476_v27 }
 0x204   : > { %v1489_v25 = vsel %vm1482_vm1, %v1474_v2, %v1475_v24  ;;  %4567 = vrot.lane.b32.xlu1 %v4566_v19, %s4965_s21  ;;  %v1602_v31 = vsel %vm5903_vm7, 0.0, %v1490_v39  ;;  %v1477_v28 = vrot.slane %v5831_v62, 1  ;;  %v1478_v35 = vrot.slane %v5833_v5, 1  ;;  %v7770_v19 = vld [vmem:[#allocation20_spill] sm:$0xff] }
 0x205   : > { %vm5998_vm13 = vcmp.eq.s32.totalorder %v7767_v3, 15  ;;  %v1604_v3 = vsel %vm5909_vm8, 0.0, %v1488_v51  ;;  %4577 = vrot.lane.b32.xlu0 %v4576_v26, %s4965_s21  ;;  %v4601_v10 = vpack.i.bf16 %v1602_v31, %v1491_v21  ;;  %v1480_v2 = vrot.slane %v5835_v37, 1  ;;  %v7774_v31 = vld [vmem:[#allocation21_spill] sm:$0xff] }
 0x206   : > { %v6016_v13 = vpack.i.bf16 %v1604_v3, %v1489_v25  ;;  %v7771_v24 = vand.u32 15, %v7770_v19  ;;  %v1486_v58 = vsel %vm1482_vm1, %v1477_v28, %v1478_v35  ;;  %v1487_v39 = vsel %vm1482_vm1, %v1476_v27, %v1477_v28 }
 0x207   : > { %v7775_v51 = vand.u32 15, %v7774_v31  ;;  %v1606_v3 = vsel %vm5936_vm9, 0.0, %v1486_v58  ;;  %v1484_v19 = vsel %vm1482_vm1, %v1479_v12, %v1480_v2  ;;  %v1485_v27 = vsel %vm1482_vm1, %v1478_v35, %v1479_v12 }
 0x208   : > { %vm6022_vm14 = vcmp.eq.s32.totalorder %v7771_v24, 15  ;;  %v1450_v28 = vrot.slane %v5776_v6, 1  ;;  %vm7651_vm2 = vcmp.lt.s32.totalorder %v5473_v50, 1  ;;  %4582 = vrot.lane.b32.xlu1 %v4581_v36, %s4966_s23  ;;  %v6049_v24 = vpack.i.bf16 %v1606_v3, %v1487_v39 }
 0x209   : > { %vm6036_vm15 = vcmp.eq.s32.totalorder %v7775_v51, 15  ;;  %v1608_v31 = vsel %vm5949_vm10, 0.0, %v1484_v19  ;;  %v1481_v32 = vrot.slane %v5837_v20, 1  ;;  %v7778_v51 = vld [vmem:[#allocation22_spill] sm:$0xff]  ;;  %v7782_v35 = vand.u32 15, %v5540_v4  ;;  %4592 = vrot.lane.b32.xlu0 %v4591_v38, %s4966_s23 }
 0x20a   : > { %v7779_v21 = vand.u32 15, %v7778_v51  ;;  %v7783_v36 = vmov 0  ;;  %v6069_v9 = vpack.i.bf16 %v1608_v31, %v1485_v27  ;;  %v1451_v39 = vrot.slane %v5784_v15, 1 }
 0x20b   : > { %vm6064_vm4 = vcmp.eq.s32.totalorder %v7782_v35, 0  ;;  %v1452_v3 = vrot.slane %v5786_v55, 1  ;;  %v1453_v19 = vrot.slane %v5788_v11, 1  ;;  %v1483_v4 = vsel %vm1482_vm1, %v1480_v2, %v1481_v32 }
 0x20c   : > { %vm6058_vm3 = vcmp.eq.s32.totalorder %v7779_v21, 15  ;;  %v7784_v36 = vsel %vm6064_vm4, 4294967295, %v7783_v36  ;;  %v7785_v21 = vld [vmem:[#allocation23_spill] sm:$0xff]  ;;  %v1514_v38 = vsel %vm1482_vm1, %v1481_v32, %v1450_v28  ;;  %v1454_v27 = vrot.slane %v5790_v59, 1  ;;  %4587 = vrot.lane.b32.xlu1 %v4586_v17, %s4965_s21 }
 0x20d   : > { %v7786_v51 = vand.u32 15, %v7785_v21  ;;  %v7789_v35 = vand.u32 15, %v5609_v1  ;;  %v7790_v26 = vmov 0  ;;  %v1610_v21 = vsel %vm5972_vm11, 0.0, %v1514_v38 }
 0x20e   : > { %v1512_v2 = vsel %vm1482_vm1, %v1451_v39, %v1452_v3  ;;  %v1513_v32 = vsel %vm1482_vm1, %v1450_v28, %v1451_v39  ;;  %v7793_v31 = vand.u32 15, %v5612_v40  ;;  %v7794_v1 = vmov 0 }
 0x20f   : > { %vm6076_vm5 = vcmp.eq.s32.totalorder %v7786_v51, 15  ;;  %vm6089_vm6 = vcmp.eq.s32.totalorder %v7789_v35, 0  ;;  %v1511_v51 = vsel %vm1482_vm1, %v1452_v3, %v1453_v19  ;;  %v6111_v16 = vpack.i.bf16 %v1610_v21, %v1483_v4 }
 0x210   : > { %v7791_v26 = vsel %vm6089_vm6, 4294967295, %v7790_v26  ;;  %vm6103_vm7 = vcmp.eq.s32.totalorder %v7793_v31, 0  ;;  %v1580_v38 = vsel %vm5984_vm12, 0.0, %v1512_v2  ;;  %v1510_v28 = vsel %vm1482_vm1, %v1453_v19, %v1454_v27  ;;  %4602 = vrot.lane.b32.xlu1 %v4601_v10, %s4966_s23 }
 0x211   : > { %7792 = vst [vmem:[#allocation15_spill] sm:$0xff] %v7791_v26  ;;  %v7795_v1 = vsel %vm6103_vm7, 4294967295, %v7794_v1  ;;  %v7797_v39 = vpack.i.bf16 %v5827_v34, %v5825_v54  ;;  %v6123_v3 = vpack.i.bf16 %v1580_v38, %v1513_v32  ;;  %v1582_v17 = vsel %vm5998_vm13, 0.0, %v1510_v28 }
 0x212   : > { %7796 = vst [vmem:[#allocation16_spill] sm:$0xff] %v7795_v1  ;;  %v1455_v4 = vrot.slane %v5794_v23, 1  ;;  %v1456_v33 = vrot.slane %v5796_v30, 1  ;;  %v7798_v31 = vand.u32 15, %v5615_v0  ;;  %v7801_v35 = vand.u32 15, %v5618_v8  ;;  %v7875_v1 = vld [vmem:[#allocation33_spill] sm:$0xff] }
 0x213   : > { %4597 = vrot.lane.b32.xlu0 %v7797_v39, %s4965_s21  ;;  %v6141_v2 = vpack.i.bf16 %v1582_v17, %v1511_v51  ;;  %v1457_v18 = vrot.slane %v5798_v63, 1  ;;  %v1458_v32 = vrot.slane %v5800_v43, 1  ;;  %v7804_v0 = vand.u32 15, %v5621_v42  ;;  %v7813_v39 = vld [vmem:[#allocation24_spill] sm:$0xff] }
 0x214   : > { %vm6131_vm8 = vcmp.eq.s32.totalorder %v7798_v31, 0  ;;  %vm6137_vm9 = vcmp.eq.s32.totalorder %v7801_v35, 0  ;;  %v1508_v8 = vsel %vm1482_vm1, %v1455_v4, %v1456_v33  ;;  %v1509_v51 = vsel %vm1482_vm1, %v1454_v27, %v1455_v4 }
 0x215   : > { %vm6149_vm10 = vcmp.eq.s32.totalorder %v7804_v0, 0  ;;  %v1459_v17 = vrot.slane %v5802_v49, 1  ;;  %v7807_v31 = vand.u32 15, %v5624_v14  ;;  %v7810_v42 = vand.u32 15, %v5627_v48 }
 0x216   : > { %v1584_v27 = vsel %vm6022_vm14, 0.0, %v1508_v8  ;;  %v1506_v4 = vsel %vm1482_vm1, %v1457_v18, %v1458_v32  ;;  %v1507_v14 = vsel %vm1482_vm1, %v1456_v33, %v1457_v18  ;;  %v7814_v38 = vand.u32 15, %v7813_v39  ;;  %v7817_v18 = vld [vmem:[#allocation25_spill] sm:$0xff] }
 0x217   : > { %vm6162_vm11 = vcmp.eq.s32.totalorder %v7807_v31, 0  ;;  %vm6168_vm12 = vcmp.eq.s32.totalorder %v7810_v42, 0  ;;  %v1460_v31 = vrot.slane %v5804_v61, 1  ;;  %4612 = vrot.lane.b32.xlu0 %v6016_v13, %s4966_s23  ;;  %v6188_v10 = vpack.i.bf16 %v1584_v27, %v1509_v51 }
 0x218   : > { %vm6182_vm13 = vcmp.eq.s32.totalorder %v7814_v38, 0  ;;  %v1586_v44 = vsel %vm6036_vm15, 0.0, %v1506_v4  ;;  %v1505_v8 = vsel %vm1482_vm1, %v1458_v32, %v1459_v17  ;;  %v1461_v33 = vrot.slane %v5806_v45, 1 }
 0x219   : > { %v7818_v42 = vand.u32 15, %v7817_v18  ;;  %v6201_v39 = vpack.i.bf16 %v1586_v44, %v1507_v14  ;;  %v1504_v13 = vsel %vm1482_vm1, %v1459_v17, %v1460_v31  ;;  %v7821_v51 = vrot.slane %v5689_v47, 7  ;;  %v7829_v44 = vld [vmem:[#allocation26_spill] sm:$0xff] }
 0x21a   : > { %v7822_v25 = vrot.slane %v5687_v57, 7  ;;  %v7825_v4 = vrot.slane %v5806_v45, 7  ;;  %v7826_v14 = vand.u32 15, %v5473_v50  ;;  %v7849_v58 = vmov 0 }
 0x21b   : > { %vm6197_vm14 = vcmp.eq.s32.totalorder %v7818_v42, 0  ;;  %v7830_v42 = vand.u32 15, %v7829_v44  ;;  %v7834_v44 = vld [vmem:[#allocation27_spill] sm:$0xff]  ;;  %v7874_v26 = vrot.slane %v5819_v53, 7 }
 0x21c   : > { %v6211_v32 = vsel %vm7651_vm2, %v7822_v25, %v7821_v51  ;;  %v7824_v27 = vmov %v7822_v25  ;;  %vm6223_vm15 = vcmp.eq.s32.totalorder %v7826_v14, 0  ;;  %v1588_v51 = vsel %vm6058_vm3, 0.0, %v1504_v13 }
 0x21d   : > { %7823 = vst [vmem:[#allocation17_spill] sm:$0xff] %v6211_v32  ;;  %v6219_v18 = vsel %vm7651_vm2, %v7825_v4, %v7824_v27  ;;  %vm6229_vm0 = vcmp.eq.s32.totalorder %v7830_v42, 0  ;;  %v7833_v25 = vrot.slane %v5687_v57, 1  ;;  %v1503_v4 = vsel %vm1482_vm1, %v1460_v31, %v1461_v33 }
 0x21e   : > { %v7835_v42 = vand.u32 15, %v7834_v44  ;;  %v7836_v32 = vmov 0  ;;  %v7838_v57 = vpack.i.bf16 %v5831_v62, %v5829_v41  ;;  %v6254_v12 = vpack.i.bf16 %v1588_v51, %v1505_v8  ;;  %v7847_v8 = vld [vmem:[#allocation28_spill] sm:$0xff] }
 0x21f   : > { %v1502_v27 = vsel %vm1482_vm1, %v1461_v33, %v7833_v25  ;;  %v7839_v33 = vrot.slane %v5774_v7, 7  ;;  %v7840_v13 = vrot.slane %v5769_v22, 7  ;;  %vm7841_vm1 = vcmp.lt.s32.totalorder %v5473_v50, 1 }
 0x220   : > { %vm6246_vm2 = vcmp.eq.s32.totalorder %v7835_v42, 0  ;;  %4607 = vrot.lane.b32.xlu1 %v7838_v57, %s4965_s21  ;;  %v1590_v31 = vsel %vm6076_vm5, 0.0, %v1502_v27  ;;  %v7844_v42 = vrot.slane %v5689_v47, 7  ;;  %vm7845_vm3 = vmmov %vm7841_vm1  ;;  %v7848_v51 = vand.u32 15, %v7847_v8  ;;  %v7863_v47 = vld [vmem:[#allocation30_spill] sm:$0xff] }
 0x221   : > { %v7837_v32 = vsel %vm6246_vm2, 4294967295, %v7836_v32  ;;  %v6264_v25 = vsel %vm7841_vm1, %v7840_v13, %v7839_v33  ;;  %v7843_v44 = vmov %v7840_v13  ;;  %v7851_v27 = vpack.i.bf16 %v5685_v46, %v5833_v5  ;;  %vm7854_vm5 = vmmov %vm7841_vm1 }
 0x222   : > { %7842 = vst [vmem:[#allocation18_spill] sm:$0xff] %v6264_v25  ;;  %v6272_v57 = vsel %vm7845_vm3, %v7844_v42, %v7843_v44  ;;  %vm6276_vm4 = vcmp.eq.s32.totalorder %v7848_v51, 0  ;;  %v4696_v33 = vpack.i.bf16 %v1590_v31, %v1503_v4  ;;  %v7852_v22 = vrot.slane %v5811_v52, 7  ;;  %v7859_v4 = vld [vmem:[#allocation29_spill] sm:$0xff]  ;;  %vm7877_vm7 = vmmov %vm7841_vm1 }
 0x223   : > { %7846 = vst [vmem:[#allocation19_spill] sm:$0xff] %v6272_v57  ;;  %v7850_v58 = vsel %vm6276_vm4, 4294967295, %v7849_v58  ;;  %4617 = vrot.lane.b32.xlu0 %v7851_v27, %s4965_s21  ;;  %v7853_v13 = vrot.slane %v5809_v29, 7  ;;  %v7857_v8 = vrot.slane %v5774_v7, 7  ;;  %v7860_v31 = vand.u32 15, %v7859_v4 }
 0x224   : > { %v7864_v14 = vand.u32 15, %v7863_v47  ;;  %v1287_v29 = vrot.slane %v5835_v37, 7  ;;  %v1288_v7 = vrot.slane %v5837_v20, 7  ;;  %v7873_v47 = vmov %v7852_v22  ;;  %4622 = vrot.lane.b32.xlu1 %v6049_v24, %s4966_s23 }
 0x225   : > { %v6293_v44 = vsel %vm7854_vm5, %v7853_v13, %v7852_v22  ;;  %v7856_v42 = vmov %v7853_v13  ;;  %vm6305_vm3 = vcmp.eq.s32.totalorder %v7860_v31, 0  ;;  %v7867_v13 = vld [vmem:[#allocation32_spill] sm:$0xff]  ;;  %vm7871_vm5 = vmmov %vm7841_vm1  ;;  %v7876_v22 = vrot.slane %v7875_v1, 7 }
 0x226   : > { %7855 = vst [vmem:[#allocation20_spill] sm:$0xff] %v6293_v44  ;;  %v6301_v51 = vsel %vm7841_vm1, %v7857_v8, %v7856_v42  ;;  %vm6311_vm6 = vcmp.eq.s32.totalorder %v7864_v14, 0  ;;  %v7868_v42 = vrot.slane %v7867_v13, 7  ;;  %v7869_v8 = vld [vmem:[#allocation31_spill] sm:$0xff]  ;;  %v7880_v52 = vrot.slane %v5823_v56, 7 }
 0x227   : > { %7858 = vst [vmem:[#allocation21_spill] sm:$0xff] %v6301_v51  ;;  %v7870_v4 = vrot.slane %v7869_v8, 7  ;;  %v6342_v51 = vsel %vm7877_vm7, %v7876_v22, %v7874_v26  ;;  %v7878_v25 = vmov %v7876_v22  ;;  %v7883_v22 = vmov %v7874_v26  ;;  %vm7884_vm7 = vmmov %vm7841_vm1  ;;  %4632 = vrot.lane.b32.xlu0 %v6069_v9, %s4966_s23 }
 0x228   : > { %v7886_v24 = vrot.slane %v5825_v54, 7  ;;  %v7929_v1 = vrot.slane %v5798_v63, 7  ;;  %v7932_v26 = vrot.slane %v5804_v61, 7  ;;  %v7937_v50 = vpack.i.bf16 %v5794_v23, %v5790_v59 }
 0x229   : > { %v6326_v31 = vsel %vm7871_vm5, %v7870_v4, %v7868_v42  ;;  %v7872_v14 = vmov %v7870_v4  ;;  %vm7879_vm5 = vmmov %vm7841_vm1  ;;  %v7881_v4 = vrot.slane %v5821_v60, 7  ;;  %vm7959_vm2 = vcmask 523264  }
 0x22a   : > { %v6334_v44 = vsel %vm7841_vm1, %v7873_v47, %v7872_v14  ;;  %v6350_v8 = vsel %vm7879_vm5, %v7868_v42, %v7878_v25  ;;  %v7885_v47 = vrot.slane %v5827_v34, 7  ;;  %vm7887_vm5 = vmmov %vm7841_vm1  ;;  %v7888_v53 = vmov %v7886_v24 }
 0x22b   : > { %v6358_v14 = vsel %vm7841_vm1, %v7881_v4, %v7880_v52  ;;  %v7882_v25 = vmov %v7881_v4  ;;  %v6395_v4 = vsel %vm7841_vm1, %v7880_v52, %v7888_v53  ;;  %v7895_v52 = vrot.slane %v5685_v46, 7 }
 0x22c   : > { %v6374_v13 = vsel %vm7884_vm7, %v7883_v22, %v7882_v25  ;;  %v6382_v42 = vsel %vm7887_vm5, %v7886_v24, %v7885_v47  ;;  %v7889_v25 = vrot.slane %v5831_v62, 7  ;;  %v7890_v22 = vrot.slane %v5829_v41, 7  ;;  %vm7891_vm7 = vmmov %vm7841_vm1 }
 0x22d   : > { %v7893_v24 = vrot.slane %v5827_v34, 7  ;;  %vm7894_vm5 = vmmov %vm7841_vm1  ;;  %v7901_v56 = vmov %v7895_v52  ;;  %v7915_v46 = vrot.slane %v5790_v59, 7 }
 0x22e   : > { %v6403_v47 = vsel %vm7891_vm7, %v7890_v22, %v7889_v25  ;;  %v7892_v9 = vmov %v7890_v22  ;;  %v7896_v25 = vrot.slane %v5833_v5, 7  ;;  %v7898_v22 = vrot.slane %v5831_v62, 7  ;;  %vm7899_vm7 = vmmov %vm7841_vm1 }
 0x22f   : > { %v6411_v54 = vsel %vm7894_vm5, %v7893_v24, %v7892_v9  ;;  %vm7900_vm5 = vmmov %vm7841_vm1  ;;  %v7902_v62 = vrot.slane %v5784_v15, 7  ;;  %v7903_v5 = vrot.slane %v5776_v6, 7  ;;  %v7923_v24 = vrot.slane %v5794_v23, 7 }
 0x230   : > { %v6425_v41 = vsel %vm7841_vm1, %v7896_v25, %v7895_v52  ;;  %v7897_v34 = vmov %v7896_v25  ;;  %v6440_v53 = vsel %vm7900_vm5, %v1287_v29, %v1288_v7  ;;  %v6446_v52 = vsel %vm7841_vm1, %v7901_v56, %v1287_v29  ;;  %vm7907_vm5 = vmmov %vm7841_vm1 }
 0x231   : > { %v6433_v9 = vsel %vm7899_vm7, %v7898_v22, %v7897_v34  ;;  %vm7904_vm7 = vmmov %vm7841_vm1  ;;  %v7905_v34 = vpack.i.bf16 %v5837_v20, %v5835_v37  ;;  %v7906_v29 = vmov %v7903_v5  ;;  %v7908_v22 = vrot.slane %v5788_v11, 7 }
 0x232   : > { %v6454_v25 = vsel %vm7904_vm7, %v7903_v5, %v7902_v62  ;;  %v6467_v56 = vsel %vm7907_vm5, %v1288_v7, %v7906_v29  ;;  %v7909_v62 = vrot.slane %v5786_v55, 7  ;;  %v7911_v20 = vrot.slane %v5784_v15, 7  ;;  %vm7912_vm7 = vmmov %vm7841_vm1 }
 0x233   : > { %4627 = vrot.lane.b32.xlu1 %v7905_v34, %s4965_s21  ;;  %v7913_v7 = vpack.i.bf16 %v5784_v15, %v5776_v6  ;;  %vm7916_vm5 = vmmov %vm7841_vm1  ;;  %v7918_v6 = vmov %v7908_v22  ;;  %v7920_v29 = vrot.slane %v5796_v30, 7  ;;  %v8003_v38 = vsel %vm6223_vm15, 0.0, %v6467_v56 }
 0x234   : > { %v6475_v5 = vsel %vm7841_vm1, %v7909_v62, %v7908_v22  ;;  %v7910_v37 = vmov %v7909_v62  ;;  %v7914_v62 = vrot.slane %v5794_v23, 7  ;;  %v7919_v22 = vrot.slane %v5798_v63, 7 }
 0x235   : > { %v6483_v34 = vsel %vm7912_vm7, %v7911_v20, %v7910_v37  ;;  %4642 = vrot.lane.b32.xlu0 %v7913_v7, %s4965_s21  ;;  %v7917_v20 = vmov %v7915_v46  ;;  %vm7921_vm7 = vmmov %vm7841_vm1  ;;  %v7926_v7 = vrot.slane %v5800_v43, 7 }
 0x236   : > { %v6501_v37 = vsel %vm7916_vm5, %v7915_v46, %v7914_v62  ;;  %v6509_v15 = vsel %vm7841_vm1, %v7918_v6, %v7917_v20  ;;  %v6520_v46 = vsel %vm7921_vm7, %v7920_v29, %v7919_v22  ;;  %v7922_v62 = vmov %v7920_v29  ;;  %vm7924_vm5 = vmmov %vm7841_vm1 }
 0x237   : > { %v6528_v20 = vsel %vm7924_vm5, %v7923_v24, %v7922_v62  ;;  %v7925_v6 = vrot.slane %v5802_v49, 7  ;;  %v7928_v22 = vmov %v7926_v7  ;;  %vm7930_vm7 = vmmov %vm7841_vm1  ;;  %v7931_v62 = vrot.slane %v5806_v45, 7  ;;  %4637 = vrot.lane.b32.xlu1 %v6111_v16, %s4966_s23 }
 0x238   : > { %v6547_v24 = vsel %vm7930_vm7, %v7929_v1, %v7928_v22  ;;  %vm7933_vm5 = vmmov %vm7841_vm1  ;;  %v7935_v29 = vrot.slane %v5802_v49, 7  ;;  %v7936_v22 = vpack.i.bf16 %v5788_v11, %v5786_v55  ;;  %v7938_v16 = vpack.i.bf16 %v5798_v63, %v5796_v30 }
 0x239   : > { %v6536_v60 = vsel %vm7841_vm1, %v7926_v7, %v7925_v6  ;;  %v6555_v7 = vsel %vm7933_vm5, %v7932_v26, %v7931_v62  ;;  %v7934_v6 = vmov %v7932_v26  ;;  %v1394_v1 = vsel %vm6305_vm3, 0.0, %v6547_v24 }
 0x23a   : > { %7927 = vst [vmem:[#allocation22_spill] sm:$0xff] %v6536_v60  ;;  %v6563_v60 = vsel %vm7841_vm1, %v7935_v29, %v7934_v6  ;;  %4647 = vrot.lane.b32.xlu0 %v7936_v22, %s4965_s21  ;;  %v7939_v55 = vpack.i.bf16 %v5802_v49, %v5800_v43  ;;  %v7940_v11 = vpack.i.bf16 %v5806_v45, %v5804_v61  ;;  %vm7661_vm7 = vcmask 523264   ;;  %v7944_v61 = vld [vmem:[#allocation17_spill] sm:$0xff] }
 0x23b   : > { %v1396_v26 = vsel %vm6311_vm6, 0.0, %v6563_v60  ;;  %4652 = vrot.lane.b32.xlu1 %v6123_v3, %s4966_s23  ;;  %vm7941_vm5 = vnez %v7784_v36  ;;  %vm7943_vm1 = vcmask 261120   ;;  %vm7662_vm3 = vcmask 785408  }
 0x23c   : > { %v7942_v43 = vsel %vm7941_vm5, 0.0, %v6219_v18  ;;  %vm7945_vm6 = vmmov %vm7943_vm1 }
 0x23d   : > { %vm7958_vm4 = vmmov %vm7943_vm1 }
 0x23e   : > { %4662 = vrot.lane.b32.xlu0 %v6141_v2, %s4966_s23 }
 0x23f   : > { %4657 = vrot.lane.b32.xlu1 %v7937_v50, %s4965_s21 }
 0x242   : > { %4667 = vrot.lane.b32.xlu0 %v7938_v16, %s4965_s21 }
 0x243   : > { %4672 = vrot.lane.b32.xlu1 %v6188_v10, %s4966_s23 }
 0x246   : > { %4682 = vrot.lane.b32.xlu0 %v6201_v39, %s4966_s23 }
 0x247   : > { %4677 = vrot.lane.b32.xlu1 %v7939_v55, %s4965_s21 }
 0x24a   : > { %4692 = vrot.lane.b32.xlu0 %v7940_v11, %s4965_s21  ;;  %v7946_v11 = vld [vmem:[#allocation18_spill] sm:$0xff] }
 0x24b   : > { %4687 = vrot.lane.b32.xlu1 %v6254_v12, %s4966_s23 }
 0x24f   : > { %4697 = vrot.lane.b32.xlu1 %v4696_v33, %s4966_s23 }
 0x257   : > { %v4543_v59 = vpop.permute.xlu0 %4542 }
 0x258   : > { %v4545_v23 = vunpack.i.h.bf16 %v4543_v59  ;;  %v4544_v30 = vunpack.i.l.bf16 %v4543_v59 }
 0x25a   : > { %v1879_v49 = vsel %vm7943_vm1, %v7942_v43, %v4544_v30  ;;  %v1880_v45 = vsel %vm7945_vm6, %v7944_v61, %v4545_v23  ;;  %vm7947_vm6 = vmmov %vm7943_vm1  ;;  %v7948_v23 = vld [vmem:[#allocation15_spill] sm:$0xff]  ;;  %v7952_v43 = vld [vmem:[#allocation20_spill] sm:$0xff] }
 0x25b   : > { %vm7949_vm5 = vnez %v7948_v23  ;;  %v7950_v30 = vld [vmem:[#allocation19_spill] sm:$0xff]  ;;  %v7954_v61 = vld [vmem:[#allocation16_spill] sm:$0xff] }
 0x25c   : > { %v4716_v23 = vld [vmem:[#allocation7 + $0x8] sm:$0xff]  }
 0x262   : > { %v4548_v63 = vpop.permute.xlu0 %4547 }
 0x263   : > { %v4550_v62 = vunpack.i.h.bf16 %v4548_v63  ;;  %v4549_v6 = vunpack.i.l.bf16 %v4548_v63 }
 0x265   : > { %v1882_v59 = vsel %vm7947_vm6, %v7946_v11, %v4550_v62  ;;  %vm7960_vm6 = vmmov %vm7959_vm2 }
 0x26c   : > { %v4553_v33 = vpop.permute.xlu0 %4552 }
 0x26d   : > { %v4558_v3 = vpop.permute.xlu1 %4557  ;;  %v4555_v36 = vunpack.i.h.bf16 %v4553_v33  ;;  %v4554_v18 = vunpack.i.l.bf16 %v4553_v33 }
 0x26e   : > { %v4560_v2 = vunpack.i.h.bf16 %v4558_v3  ;;  %v4559_v10 = vunpack.i.l.bf16 %v4558_v3  ;;  %v7951_v3 = vsel %vm7949_vm5, 0.0, %v7950_v30  ;;  %vm7961_vm5 = vmmov %vm7959_vm2 }
 0x270   : > { %v1912_v39 = vsel %vm7661_vm7, %v1879_v49, %v4559_v10  ;;  %v1913_v12 = vsel %vm7661_vm7, %v1880_v45, %v4560_v2  ;;  %v1881_v2 = vsel %vm7943_vm1, %v7951_v3, %v4549_v6  ;;  %vm7953_vm7 = vmmov %vm7943_vm1  ;;  %v7956_v45 = vld [vmem:[#allocation21_spill] sm:$0xff] }
 0x271   : > { %v6613_v29 = vpack.c.bf16 %v1913_v12, %v1912_v39  ;;  %v1884_v49 = vsel %vm7953_vm7, %v7952_v43, %v4555_v36  ;;  %vm7962_vm1 = vmmov %vm7959_vm2 }
 0x272   : > { %v4563_v22 = vpop.permute.xlu1 %4562  ;;  %vm7967_vm7 = vmmov %vm7958_vm4 }
 0x273   : > { %4235 = vmatprep.mubr.msk.bf16.mxu1 %vm7662_vm3, %v6613_v29  ;;  %v4565_v50 = vunpack.i.h.bf16 %v4563_v22  ;;  %v4564_v16 = vunpack.i.l.bf16 %v4563_v22  ;;  %v4573_v55 = vpop.permute.xlu0 %4572  ;;  %vm7955_vm3 = vnez %v7954_v61 }
 0x274   : > { %v4575_v10 = vunpack.i.h.bf16 %v4573_v55  ;;  %v4574_v63 = vunpack.i.l.bf16 %v4573_v55  ;;  %v7957_v39 = vsel %vm7955_vm3, 0.0, %v7956_v45  ;;  %vm7963_vm3 = vcmask 785408  }
 0x275   : > { %v1883_v12 = vsel %vm7958_vm4, %v7957_v39, %v4554_v18  ;;  %v1915_v33 = vsel %vm7959_vm2, %v1882_v59, %v4565_v50  ;;  %v1914_v62 = vsel %vm7960_vm6, %v1881_v2, %v4564_v16  ;;  %v7964_v18 = vld [vmem:[#allocation34_spill] sm:$0xff]  ;;  %vm7965_vm2 = vmmov %vm7963_vm3  ;;  %v4717_v2 = vld [vmem:[#allocation7 + $0x10] sm:$0xff]   ;;  %v7966_v45 = vsel %vm6131_vm8, 0.0, %v6334_v44 }
 0x276   : > { %v6633_v22 = vpack.c.bf16 %v1915_v33, %v1914_v62  ;;  %v1916_v11 = vsel %vm7961_vm5, %v1883_v12, %v4574_v63  ;;  %v1917_v6 = vsel %vm7962_vm1, %v1884_v49, %v4575_v10  ;;  %v4568_v55 = vpop.permute.xlu1 %4567  ;;  %vm7968_vm6 = vmmov %vm7958_vm4 }
 0x277   : > { %v6637_v30 = vpack.c.bf16 %v1917_v6, %v1916_v11  ;;  %v4578_v36 = vpop.permute.xlu0 %4577  ;;  %v4570_v3 = vunpack.i.h.bf16 %v4568_v55  ;;  %v4569_v43 = vunpack.i.l.bf16 %v4568_v55  ;;  %v7969_v11 = vsel %vm6137_vm9, 0.0, %v6350_v8  ;;  %vm7970_vm5 = vmmov %vm7958_vm4 }
 0x278   : > { %4236 = vmatmul.mubr.msk.bf16.vlgmr.msra.gmra.mrb[0].mxu1 %vm7963_vm3, %v6633_v22  ;;  %v4580_v50 = vunpack.i.h.bf16 %v4578_v36  ;;  %v4579_v16 = vunpack.i.l.bf16 %v4578_v36  ;;  %vm7971_vm3 = vmmov %vm7962_vm1  ;;  %vm7974_vm9 = vcmask 785408  }
 0x279   : > { %4256 = vmatpush3.bf16.msra.mxu1 %v7964_v18  ;;  %4239 = vmatprep.mubr.msk.bf16.mxu1 %vm7965_vm2, %v6637_v30  ;;  %v1886_v61 = vsel %vm7958_vm4, %v6326_v31, %v4570_v3  ;;  %v1885_v39 = vsel %vm7967_vm7, %v7966_v45, %v4569_v43  ;;  %vm7972_vm8 = vmmov %vm7962_vm1  ;;  %v7977_v45 = vsel %vm6149_vm10, 0.0, %v6374_v13 }
 0x27a   : > { %v4583_v59 = vpop.permute.xlu1 %4582  ;;  %4257 = vmatprep.subr.bf16.mxu1 %v4716_v23  ;;  %v1888_v62 = vsel %vm7968_vm6, %v6342_v51, %v4580_v50  ;;  %v1887_v6 = vsel %vm7970_vm5, %v7969_v11, %v4579_v16  ;;  %vm7973_vm2 = vmmov %vm7962_vm1  ;;  %v4718_v51 = vld [vmem:[#allocation7 + $0x18] sm:$0xff]  }
 0x27b   : > { %v4585_v10 = vunpack.i.h.bf16 %v4583_v59  ;;  %v4584_v63 = vunpack.i.l.bf16 %v4583_v59  ;;  %v4593_v49 = vpop.permute.xlu0 %4592  ;;  %vm7975_vm4 = vmmov %vm7974_vm9  ;;  %v4719_v59 = vld [vmem:[#allocation7 + $0x20] sm:$0xff]  }
 0x27c   : > { %v4595_v12 = vunpack.i.h.bf16 %v4593_v49  ;;  %v4594_v33 = vunpack.i.l.bf16 %v4593_v49  ;;  %vm7976_vm7 = vmmov %vm7970_vm5 }
 0x27d   : > { %v1918_v55 = vsel %vm7962_vm1, %v1885_v39, %v4584_v63  ;;  %v1919_v31 = vsel %vm7971_vm3, %v1886_v61, %v4585_v10  ;;  %4258 = vmatpush3.bf16.msra.mxu1 %v4716_v23  ;;  %vm7978_vm6 = vmmov %vm7970_vm5 }
 0x27e   : > { %v6660_v19 = vpack.c.bf16 %v1919_v31, %v1918_v55  ;;  %v1920_v44 = vsel %vm7972_vm8, %v1887_v6, %v4594_v33  ;;  %v1921_v36 = vsel %vm7973_vm2, %v1888_v62, %v4595_v12  ;;  %v4588_v3 = vpop.permute.xlu1 %4587  ;;  %4259 = vmatprep.subr.bf16.mxu1 %v4717_v2  ;;  %v7979_v62 = vsel %vm6162_vm11, 0.0, %v6395_v4  ;;  %vm7980_vm1 = vmmov %vm7970_vm5 }
 0x27f   : > { %v6664_v43 = vpack.c.bf16 %v1921_v36, %v1920_v44  ;;  %v4590_v8 = vunpack.i.h.bf16 %v4588_v3  ;;  %v4589_v18 = vunpack.i.l.bf16 %v4588_v3  ;;  %vm7981_vm3 = vmmov %vm7973_vm2 }
 0x280   : > { %4240 = vmatmul.mubr.msk.bf16.gmra.mrb[4].mxu1 %vm7974_vm9, %v6660_v19  ;;  %vm7982_vm8 = vmmov %vm7973_vm2 }
 0x281   : > { %4243 = vmatprep.mubr.msk.bf16.mxu1 %vm7975_vm4, %v6664_v43  ;;  %4260 = vmatpush3.bf16.msra.mxu1 %v4717_v2  ;;  %v1890_v61 = vsel %vm7976_vm7, %v6358_v14, %v4590_v8  ;;  %v1889_v39 = vsel %vm7978_vm6, %v7977_v45, %v4589_v18  ;;  %vm7983_vm10 = vmmov %vm7973_vm2  ;;  %v6696_v8 = vld [vmem:[#allocation7 + $0x60] sm:$0xff]   ;;  %v7990_v45 = vsel %vm6182_vm13, 0.0, %v6433_v9 }
 0x282   : > { %v4603_v23 = vpop.permute.xlu1 %4602  ;;  %4261 = vmatprep.subr.bf16.mxu1 %v4718_v51  ;;  %vm7984_vm11 = vmmov %vm7975_vm4 }
 0x283   : > { %v4605_v10 = vunpack.i.h.bf16 %v4603_v23  ;;  %v4604_v63 = vunpack.i.l.bf16 %v4603_v23  ;;  %vm7985_vm9 = vmmov %vm7975_vm4 }
 0x284   : > { %vm7986_vm4 = vmmov %vm7980_vm1 }
 0x285   : > { %v4598_v21 = vpop.permute.xlu0 %4597  ;;  %v1922_v6 = vsel %vm7981_vm3, %v1889_v39, %v4604_v63  ;;  %v1923_v14 = vsel %vm7982_vm8, %v1890_v61, %v4605_v10  ;;  %4262 = vmatpush3.bf16.msra.mxu1 %v4718_v51  ;;  %v7987_v10 = vsel %vm6168_vm12, 0.0, %v6411_v54  ;;  %vm7988_vm7 = vmmov %vm7980_vm1 }
 0x286   : > { %v4600_v50 = vunpack.i.h.bf16 %v4598_v21  ;;  %v4599_v16 = vunpack.i.l.bf16 %v4598_v21  ;;  %v6686_v28 = vpack.c.bf16 %v1923_v14, %v1922_v6  ;;  %4263 = vmatprep.subr.bf16.mxu1 %v4719_v59  ;;  %vm7989_vm6 = vmmov %vm7980_vm1 }
 0x287   : > { %vm7996_vm13 = vmmov %vm7985_vm9 }
 0x288   : > { %v1892_v2 = vsel %vm7970_vm5, %v6382_v42, %v4600_v50  ;;  %v1891_v11 = vsel %vm7980_vm1, %v7979_v62, %v4599_v16  ;;  %v4720_v42 = vld [vmem:[#allocation7 + $0x28] sm:$0xff]   ;;  %4244 = vmatmul.mubr.msk.bf16.gmra.mrb[8].mxu1 %vm7984_vm11, %v6686_v28  ;;  %vm7991_vm5 = vmmov %vm7980_vm1 }
 0x289   : > { %v4613_v49 = vpop.permute.xlu0 %4612  ;;  %4264 = vmatpush3.bf16.msra.mxu1 %v4719_v59  ;;  %vm7992_vm1 = vmmov %vm7973_vm2 }
 0x28a   : > { %v4615_v12 = vunpack.i.h.bf16 %v4613_v49  ;;  %v4614_v33 = vunpack.i.l.bf16 %v4613_v49  ;;  %4265 = vmatprep.subr.bf16.mxu1 %v4720_v42  ;;  %vm7993_vm3 = vmmov %vm7992_vm1 }
 0x28b   : > { %vm7994_vm12 = vmmov %vm7992_vm1 }
 0x28c   : > { %v1924_v13 = vsel %vm7983_vm10, %v1891_v11, %v4614_v33  ;;  %v1925_v55 = vsel %vm7973_vm2, %v1892_v2, %v4615_v12  ;;  %vm7995_vm8 = vmmov %vm7992_vm1 }
 0x28d   : > { %v6690_v44 = vpack.c.bf16 %v1925_v55, %v1924_v13  ;;  %4266 = vmatpush3.bf16.msra.mxu1 %v4720_v42  ;;  %vm7997_vm10 = vmmov %vm7985_vm9 }
 0x28e   : > { %4299 = vmatprep.subr.bf16.mxu1 %v6696_v8  ;;  %vm7998_vm2 = vmmov %vm7986_vm4 }
 0x28f   : > { %4247 = vmatprep.mubr.msk.bf16.mxu1 %vm7985_vm9, %v6690_v44  ;;  %vm8000_vm11 = vmmov %vm7998_vm2 }
 0x290   : > { %vm8001_vm9 = vmmov %vm7992_vm1 }
 0x291   : > { %vm8010_vm15 = vmmov %vm7993_vm3 }
 0x292   : > { %v4608_v31 = vpop.permute.xlu1 %4607 }
 0x293   : > { %v4610_v4 = vunpack.i.h.bf16 %v4608_v31  ;;  %v4609_v36 = vunpack.i.l.bf16 %v4608_v31  ;;  %v7999_v31 = vsel %vm6197_vm14, 0.0, %v6446_v52  ;;  %vm8004_vm14 = vmmov %vm7998_vm2 }
 0x295   : > { %v4618_v35 = vpop.permute.xlu0 %4617  ;;  %v1894_v23 = vsel %vm7986_vm4, %v6403_v47, %v4610_v4  ;;  %v1893_v63 = vsel %vm7988_vm7, %v7987_v10, %v4609_v36  ;;  %vm8002_vm4 = vmmov %vm7992_vm1 }
 0x296   : > { %v4620_v3 = vunpack.i.h.bf16 %v4618_v35  ;;  %v4619_v21 = vunpack.i.l.bf16 %v4618_v35  ;;  %v4623_v51 = vpop.permute.xlu1 %4622  ;;  %vm8005_vm7 = vmmov %vm7998_vm2 }
 0x297   : > { %v4625_v18 = vunpack.i.h.bf16 %v4623_v51  ;;  %v4624_v50 = vunpack.i.l.bf16 %v4623_v51 }
 0x298   : > { %v1896_v59 = vsel %vm7989_vm6, %v6425_v41, %v4620_v3  ;;  %v1895_v39 = vsel %vm7991_vm5, %v7990_v45, %v4619_v21  ;;  %vm8006_vm6 = vmmov %vm7997_vm10 }
 0x299   : > { %v4633_v16 = vpop.permute.xlu0 %4632  ;;  %v1926_v12 = vsel %vm7992_vm1, %v1893_v63, %v4624_v50  ;;  %v1927_v47 = vsel %vm7993_vm3, %v1894_v23, %v4625_v18  ;;  %vm8007_vm5 = vmmov %vm7998_vm2 }
 0x29a   : > { %v4635_v49 = vunpack.i.h.bf16 %v4633_v16  ;;  %v4634_v61 = vunpack.i.l.bf16 %v4633_v16  ;;  %v6714_v0 = vpack.c.bf16 %v1927_v47, %v1926_v12  ;;  %vm8009_vm1 = vmmov %vm7998_vm2 }
 0x29c   : > { %v1928_v54 = vsel %vm7994_vm12, %v1895_v39, %v4634_v61  ;;  %v1929_v33 = vsel %vm7995_vm8, %v1896_v59, %v4635_v49  ;;  %4248 = vmatmul.mubr.msk.bf16.gmra.mrb[12].mxu1 %vm7996_vm13, %v6714_v0  ;;  %v8008_v59 = vsel %vm6229_vm0, 0.0, %v6483_v34  ;;  %v4967_v39 = vmov 0.0|0.0   ;;  %vm8011_vm12 = vmmov %vm7993_vm3 }
 0x29d   : > { %v6719_v41 = vpack.c.bf16 %v1929_v33, %v1928_v54  ;;  %vm8012_vm8 = vmmov %vm7993_vm3 }
 0x29e   : > { %vm8013_vm0 = vmmov %vm8006_vm6 }
 0x29f   : > { %4251 = vmatprep.mubr.msk.bf16.mxu1 %vm7997_vm10, %v6719_v41  ;;  %vm8014_vm13 = vmmov %vm8013_vm0 }
 0x2a0   : > { %vm8015_vm10 = vmmov %vm8009_vm1 }
 0x2a5   : > { %v4628_v2 = vpop.permute.xlu1 %4627 }
 0x2a6   : > { %v4630_v9 = vunpack.i.h.bf16 %v4628_v2  ;;  %v4629_v62 = vunpack.i.l.bf16 %v4628_v2 }
 0x2a7   : > { %v4643_v48 = vpop.permute.xlu0 %4642 }
 0x2a8   : > { %v1898_v55 = vsel %vm7998_vm2, %v6440_v53, %v4630_v9  ;;  %v1897_v42 = vsel %vm8000_vm11, %v7999_v31, %v4629_v62  ;;  %v4645_v35 = vunpack.i.h.bf16 %v4643_v48  ;;  %v4644_v4 = vunpack.i.l.bf16 %v4643_v48  ;;  %v4722_v62 = vld [vmem:[#allocation7 + $0x68] sm:$0xff]   ;;  %vm8018_vm11 = vmmov %vm8009_vm1 }
 0x2a9   : > { %v4638_v11 = vpop.permute.xlu1 %4637  ;;  %vm8016_vm2 = vnez %v7837_v32 }
 0x2aa   : > { %v4640_v6 = vunpack.i.h.bf16 %v4638_v11  ;;  %v4639_v14 = vunpack.i.l.bf16 %v4638_v11  ;;  %v1867_v52 = vsel %vm8004_vm14, %v8003_v38, %v4644_v4  ;;  %v1868_v10 = vsel %vm8005_vm7, %v6454_v25, %v4645_v35  ;;  %vm8023_vm7 = vmmov %vm8009_vm1 }
 0x2ab   : > { %vm8021_vm14 = vnez %v7850_v58  ;;  %v4723_v58 = vld [vmem:[#allocation7 + $0x70] sm:$0xff]  }
 0x2ac   : > { %v4648_v13 = vpop.permute.xlu0 %4647  ;;  %v1931_v36 = vsel %vm8001_vm9, %v1898_v55, %v4640_v6  ;;  %v1930_v3 = vsel %vm8002_vm4, %v1897_v42, %v4639_v14  ;;  %v8017_v55 = vsel %vm8016_vm2, 0.0, %v6509_v15  ;;  %vm8019_vm9 = vmmov %vm8009_vm1 }
 0x2ad   : > { %v4650_v21 = vunpack.i.h.bf16 %v4648_v13  ;;  %v4649_v51 = vunpack.i.l.bf16 %v4648_v13  ;;  %v6734_v18 = vpack.c.bf16 %v1931_v36, %v1930_v3  ;;  %v4653_v50 = vpop.permute.xlu1 %4652  ;;  %vm8020_vm4 = vmmov %vm8013_vm0 }
 0x2ae   : > { %v4655_v16 = vunpack.i.h.bf16 %v4653_v50  ;;  %v4654_v23 = vunpack.i.l.bf16 %v4653_v50 }
 0x2af   : > { %4252 = vmatmul.mubr.msk.bf16.gmra.mrb[16].mxu1 %vm8006_vm6, %v6734_v18  ;;  %v1870_v61 = vsel %vm8007_vm5, %v6475_v5, %v4650_v21  ;;  %v1869_v17 = vsel %vm8009_vm1, %v8008_v59, %v4649_v51  ;;  %vm8024_vm6 = vmmov %vm7993_vm3 }
 0x2b0   : > { %v4663_v53 = vpop.permute.xlu0 %4662  ;;  %v1900_v56 = vsel %vm8010_vm15, %v1867_v52, %v4654_v23  ;;  %v1901_v45 = vsel %vm7993_vm3, %v1868_v10, %v4655_v16  ;;  %4267 = vmatprep.mubr.bf16.mxu1 %v4967_v39  ;;  %vm8025_vm5 = vmmov %vm7993_vm3  ;;  %v8030_v10 = vld [vmem:[#allocation22_spill] sm:$0xff] }
 0x2b1   : > { %v4665_v63 = vunpack.i.h.bf16 %v4663_v53  ;;  %v4664_v49 = vunpack.i.l.bf16 %v4663_v53  ;;  %v2189_v25 = vpack.c.bf16 %v1901_v45, %v1900_v56  ;;  %v4658_v54 = vpop.permute.xlu1 %4657  ;;  %vm8026_vm1 = vmmov %vm8013_vm0  ;;  %v4724_v53 = vld [vmem:[#allocation7 + $0x78] sm:$0xff]  }
 0x2b2   : > { %v4660_v40 = vunpack.i.h.bf16 %v4658_v54  ;;  %v4659_v34 = vunpack.i.l.bf16 %v4658_v54  ;;  %vm8027_vm15 = vmmov %vm7993_vm3 }
 0x2b3   : > { %v1902_v12 = vsel %vm8011_vm12, %v1869_v17, %v4664_v49  ;;  %v1903_v47 = vsel %vm8012_vm8, %v1870_v61, %v4665_v63  ;;  %4223 = vmatprep.mubr.msk.bf16.mxu0 %vm8013_vm0, %v2189_v25  ;;  %vm8028_vm12 = vmmov %vm8013_vm0 }
 0x2b4   : > { %v6757_v5 = vpack.c.bf16 %v1903_v47, %v1902_v12  ;;  %v4668_v33 = vpop.permute.xlu0 %4667  ;;  %v1872_v11 = vsel %vm8015_vm10, %v6501_v37, %v4660_v40  ;;  %v1871_v31 = vsel %vm8018_vm11, %v8017_v55, %v4659_v34  ;;  %v8022_v37 = vsel %vm8021_vm14, 0.0, %v6528_v20  ;;  %vm8029_vm8 = vmmov %vm8013_vm0  ;;  %v4725_v12 = vld [vmem:[#allocation7 + $0x80] sm:$0xff]   ;;  %v4726_v34 = vld [vmem:[#allocation7 + $0x88] sm:$0xff]  }
 0x2b5   : > { %v4670_v2 = vunpack.i.h.bf16 %v4668_v33  ;;  %v4669_v48 = vunpack.i.l.bf16 %v4668_v33  ;;  %v4673_v9 = vpop.permute.xlu1 %4672  ;;  %vm8031_vm0 = vmmov %vm8023_vm7 }
 0x2b6   : > { %4224 = vmatmul.mubr.msk.bf16.vlgmr.msra.gmra.mrb[32].mxu0 %vm8014_vm13, %v6757_v5  ;;  %v4675_v6 = vunpack.i.h.bf16 %v4673_v9  ;;  %v4674_v14 = vunpack.i.l.bf16 %v4673_v9  ;;  %vm8033_vm10 = vmmov %vm8031_vm0 }
 0x2b7   : > { %v1874_v42 = vsel %vm8019_vm9, %v6520_v46, %v4670_v2  ;;  %4268 = vmatmul.mubr.msk.bf16.vlgmr.msra.gmra.mrb[20].mxu1 %vm8020_vm4, %v2189_v25  ;;  %v1873_v36 = vsel %vm8023_vm7, %v8022_v37, %v4669_v48  ;;  %vm8034_vm2 = vmmov %vm8026_vm1 }
 0x2b8   : > { %v4683_v13 = vpop.permute.xlu0 %4682  ;;  %v1904_v3 = vsel %vm8024_vm6, %v1871_v31, %v4674_v14  ;;  %v1905_v32 = vsel %vm8025_vm5, %v1872_v11, %v4675_v6  ;;  %4300 = vmatpush3.bf16.msra.mxu1 %v6696_v8  ;;  %4271 = vmatprep.mubr.msk.bf16.mxu1 %vm8026_vm1, %v6757_v5  ;;  %vm8035_vm11 = vmmov %vm7993_vm3 }
 0x2b9   : > { %v4685_v35 = vunpack.i.h.bf16 %v4683_v13  ;;  %v4684_v4 = vunpack.i.l.bf16 %v4683_v13  ;;  %v2191_v15 = vpack.c.bf16 %v1905_v32, %v1904_v3  ;;  %v4678_v51 = vpop.permute.xlu1 %4677  ;;  %4301 = vmatprep.subr.bf16.mxu1 %v4722_v62  ;;  %vm8036_vm9 = vmmov %vm7993_vm3 }
 0x2ba   : > { %v4680_v50 = vunpack.i.h.bf16 %v4678_v51  ;;  %v4679_v16 = vunpack.i.l.bf16 %v4678_v51  ;;  %vm8037_vm4 = vmmov %vm8026_vm1 }
 0x2bb   : > { %v1906_v46 = vsel %vm8027_vm15, %v1873_v36, %v4684_v4  ;;  %v1907_v21 = vsel %vm7993_vm3, %v1874_v42, %v4685_v35  ;;  %4227 = vmatprep.mubr.msk.bf16.mxu0 %vm8028_vm12, %v2191_v15  ;;  %vm8038_vm14 = vmmov %vm8031_vm0 }
 0x2bc   : > { %v2192_v20 = vpack.c.bf16 %v1907_v21, %v1906_v46  ;;  %v4693_v23 = vpop.permute.xlu0 %4692  ;;  %4302 = vmatpush3.bf16.msra.mxu1 %v4722_v62  ;;  %v1876_v63 = vsel %vm8031_vm0, %v8030_v10, %v4680_v50  ;;  %v1875_v49 = vsel %vm8033_vm10, %v1394_v1, %v4679_v16  ;;  %vm8040_vm6 = vmmov %vm8031_vm0 }
 0x2bd   : > { %v4688_v8 = vpop.permute.xlu1 %4687  ;;  %4303 = vmatprep.subr.bf16.mxu1 %v4723_v58  ;;  %v4695_v61 = vunpack.i.h.bf16 %v4693_v23  ;;  %v4694_v59 = vunpack.i.l.bf16 %v4693_v23  ;;  %vm8041_vm5 = vmmov %vm8026_vm1 }
 0x2be   : > { %4228 = vmatmul.mubr.msk.bf16.gmra.mrb[36].mxu0 %vm8029_vm8, %v2192_v20  ;;  %v4690_v38 = vunpack.i.h.bf16 %v4688_v8  ;;  %v4689_v52 = vunpack.i.l.bf16 %v4688_v8  ;;  %vm8042_vm1 = vmmov %vm7993_vm3 }
 0x2bf   : > { %4272 = vmatmul.mubr.msk.bf16.gmra.mrb[24].mxu1 %vm8034_vm2, %v2191_v15  ;;  %v1878_v24 = vsel %vm8038_vm14, %v6555_v7, %v4695_v61  ;;  %v1877_v1 = vsel %vm8040_vm6, %v1396_v26, %v4694_v59  ;;  %vm8043_vm15 = vmmov %vm8042_vm1 }
 0x2c0   : > { %v1908_v17 = vsel %vm8035_vm11, %v1875_v49, %v4689_v52  ;;  %v1909_v56 = vsel %vm8036_vm9, %v1876_v63, %v4690_v38  ;;  %4275 = vmatprep.mubr.msk.bf16.mxu1 %vm8037_vm4, %v2192_v20  ;;  %4304 = vmatpush3.bf16.msra.mxu1 %v4723_v58  ;;  %vm8044_vm3 = vmmov %vm8034_vm2 }
 0x2c1   : > { %v2193_v45 = vpack.c.bf16 %v1909_v56, %v1908_v17  ;;  %v4698_v25 = vpop.permute.xlu1 %4697  ;;  %4305 = vmatprep.subr.bf16.mxu1 %v4724_v53  ;;  %vm8045_vm12 = vmmov %vm8034_vm2 }
 0x2c2   : > { %v4700_v27 = vunpack.i.h.bf16 %v4698_v25  ;;  %v4699_v47 = vunpack.i.l.bf16 %v4698_v25  ;;  %vm8046_vm8 = vmmov %vm8034_vm2 }
 0x2c3   : > { %4231 = vmatprep.mubr.msk.bf16.mxu0 %vm8041_vm5, %v2193_v45  ;;  %vm8047_vm0 = vmmov %vm8034_vm2 }
 0x2c4   : > { %v1911_v54 = vsel %vm8042_vm1, %v1878_v24, %v4700_v27  ;;  %v1910_v40 = vsel %vm8043_vm15, %v1877_v1, %v4699_v47  ;;  %4306 = vmatpush3.bf16.msra.mxu1 %v4724_v53  ;;  %vm8048_vm13 = vmmov %vm8047_vm0 }
 0x2c5   : > { %v2194_v33 = vpack.c.bf16 %v1911_v54, %v1910_v40  ;;  %4307 = vmatprep.subr.bf16.mxu1 %v4725_v12  ;;  %vm8049_vm10 = vmmov %vm8047_vm0 }
 0x2c6   : > { %vm8050_vm2 = vmmov %vm8047_vm0 }
 0x2c7   : > { %4232 = vmatmul.mubr.msk.bf16.gmra.mrb[40].mxu0 %vm8044_vm3, %v2194_v33  ;;  %4276 = vmatmul.mubr.msk.bf16.gmra.mrb[28].mxu1 %vm8045_vm12, %v2193_v45  ;;  %vm8051_vm11 = vmmov %vm8047_vm0 }
 0x2c8   : > { %4279 = vmatprep.mubr.msk.bf16.mxu1 %vm8046_vm8, %v2194_v33  ;;  %4308 = vmatpush3.bf16.msra.mxu1 %v4725_v12  ;;  %vm8052_vm9 = vmmov %vm8047_vm0 }
 0x2c9   : > { %4309 = vmatprep.subr.bf16.mxu1 %v4726_v34  ;;  %vm8053_vm4 = vmmov %vm8047_vm0 }
 0x2ca   : > { %vm8054_vm14 = vmmov %vm8047_vm0 }
 0x2cb   : > { %vm8055_vm7 = vmmov %vm8047_vm0 }
 0x2cc   : > { %4310 = vmatpush3.bf16.msra.mxu1 %v4726_v34  ;;  %vm8056_vm6 = vmmov %vm8047_vm0 }
 0x2cd   : > { %vm8057_vm5 = vmmov %vm8047_vm0 }
 0x2ce   : > { %vm8058_vm1 = vmmov %vm8047_vm0 }
 0x2cf   : > { %4280 = vmatmul.mubr.msk.bf16.gmra.mrb[0].mxu1 %vm8047_vm0, %v6613_v29  ;;  %vm8059_vm15 = vmmov %vm8047_vm0 }
 0x2d0   : > { %4283 = vmatprep.mubr.msk.bf16.mxu1 %vm8048_vm13, %v6633_v22  ;;  %vm8060_vm3 = vmmov %vm8047_vm0 }
 0x2d1   : > { %vm8061_vm12 = vmmov %vm8047_vm0 }
 0x2d2   : > { %vm8062_vm8 = vmmov %vm8047_vm0 }
 0x2d3   : > { %vm8063_vm13 = vmmov %vm8047_vm0 }
 0x2d7   : > { %4284 = vmatmul.mubr.msk.bf16.gmra.mrb[4].mxu1 %vm8049_vm10, %v6637_v30  ;;  %vm8064_vm10 = vmmov %vm8047_vm0 }
 0x2d8   : > { %4287 = vmatprep.mubr.msk.bf16.mxu1 %vm8050_vm2, %v6660_v19  ;;  %vm8065_vm2 = vmmov %vm8047_vm0 }
 0x2df   : > { %4288 = vmatmul.mubr.msk.bf16.gmra.mrb[8].mxu1 %vm8051_vm11, %v6664_v43  ;;  %vm8066_vm11 = vmmov %vm8047_vm0 }
 0x2e0   : > { %4291 = vmatprep.mubr.msk.bf16.mxu1 %vm8052_vm9, %v6686_v28  ;;  %vm8067_vm9 = vmmov %vm8047_vm0 }
 0x2e7   : > { %4292 = vmatmul.mubr.msk.bf16.gmra.mrb[12].mxu1 %vm8053_vm4, %v6690_v44  ;;  %vm8068_vm4 = vmmov %vm8047_vm0 }
 0x2e8   : > { %4295 = vmatprep.mubr.msk.bf16.mxu1 %vm8054_vm14, %v6714_v0  ;;  %vm8069_vm14 = vmmov %vm8047_vm0 }
 0x2ef   : > { %4296 = vmatmul.mubr.msk.bf16.gmra.mrb[16].mxu1 %vm8055_vm7, %v6719_v41  ;;  %vm8070_vm7 = vcmask 261120  }
 0x2f0   : > { %4311 = vmatprep.mubr.msk.bf16.mxu1 %vm8056_vm6, %v6757_v5  ;;  %v4728_v5 = vld [vmem:[#allocation8 + $0x8] sm:$0xff]   ;;  %vm8071_vm6 = vmmov %vm8070_vm7 }
 0x2f7   : > { %4312 = vmatmul.mubr.msk.bf16.vlgmr.msra.gmra.mrb[20].mxu1 %vm8057_vm5, %v2191_v15  ;;  %vm8072_vm5 = vmmov %vm8071_vm6 }
 0x2f8   : > { %4315 = vmatprep.mubr.msk.bf16.mxu1 %vm8058_vm1, %v2192_v20  ;;  %vm8073_vm1 = vmmov %vm8072_vm5 }
 0x2ff   : > { %4316 = vmatmul.mubr.msk.bf16.gmra.mrb[24].mxu1 %vm8059_vm15, %v2193_v45  ;;  %vm8074_vm15 = vmmov %vm8073_vm1 }
 0x300   : > { %4319 = vmatprep.mubr.msk.bf16.mxu1 %vm8060_vm3, %v2194_v33  ;;  %vm8075_vm3 = vmmov %vm8073_vm1 }
 0x307   : > { %4320 = vmatmul.mubr.msk.bf16.gmra.mrb[28].mxu1 %vm8061_vm12, %v6613_v29  ;;  %vm8076_vm12 = vmmov %vm8073_vm1 }
 0x308   : > { %4323 = vmatprep.mubr.msk.bf16.mxu1 %vm8062_vm8, %v6633_v22  ;;  %vm8077_vm8 = vmmov %vm8073_vm1 }
 0x30f   : > { %4324 = vmatmul.mubr.msk.bf16.gmra.mrb[0].mxu1 %vm8047_vm0, %v6637_v30  ;;  %vm8078_vm0 = vmmov %vm8073_vm1 }
 0x310   : > { %4327 = vmatprep.mubr.msk.bf16.mxu1 %vm8063_vm13, %v6660_v19  ;;  %vm8079_vm13 = vmmov %vm8078_vm0 }
 0x317   : > { %4328 = vmatmul.mubr.msk.bf16.gmra.mrb[4].mxu1 %vm8064_vm10, %v6664_v43  ;;  %vm8080_vm10 = vmmov %vm8078_vm0 }
 0x318   : > { %4331 = vmatprep.mubr.msk.bf16.mxu1 %vm8065_vm2, %v6686_v28  ;;  %vm8081_vm2 = vmmov %vm8078_vm0 }
 0x31f   : > { %4332 = vmatmul.mubr.msk.bf16.gmra.mrb[8].mxu1 %vm8066_vm11, %v6690_v44  ;;  %vm8082_vm11 = vmmov %vm8078_vm0 }
 0x320   : > { %4335 = vmatprep.mubr.msk.bf16.mxu1 %vm8067_vm9, %v6714_v0  ;;  %vm8083_vm9 = vmmov %vm8078_vm0 }
 0x327   : > { %4336 = vmatmul.mubr.msk.bf16.gmra.mrb[12].mxu1 %vm8068_vm4, %v6719_v41  ;;  %v4727_v41 = vld [vmem:[#allocation8] sm:$0xff]   ;;  %vm8084_vm4 = vmmov %vm8078_vm0 }
 0x328   : > { %4339 = vmatprep.mubr.msk.bf16.mxu1 %vm8069_vm14, %v6734_v18  ;;  %4343 = vmatprep.subr.bf16.mxu0 %v4727_v41  ;;  %vm8085_vm14 = vmmov %vm8078_vm0 }
 0x329   : > { %4344 = vmatpush3.bf16.msra.mxu0 %v4727_v41 }
 0x32a   : > { %4345 = vmatprep.subr.bf16.mxu0 %v4728_v5 }
 0x32d   : > { %4346 = vmatpush3.bf16.msra.mxu0 %v4728_v5 }
 0x32f   : > { %4340 = vmatmul.mubr.bf16.gmra.mrb[16].mxu1 %v4967_v39 }
 0x389   : > { %v4225_v57 = vpop.f32.mrb[32].mxu0 }
 0x38a   : > { %v2364_v60 = vpop.f32.mrb[33].mxu0 }
 0x38b   : > { %v4226_v7 = vpop.f32.mrb[34].mxu0 }
 0x38c   : > { %v2367_v26 = vpop.f32.mrb[35].mxu0 }
 0x391   : > { %v4229_v29 = vpop.f32.mrb[36].mxu0 }
 0x392   : > { %v2380_v22 = vpop.f32.mrb[37].mxu0 }
 0x393   : > { %v4230_v30 = vpop.f32.mrb[38].mxu0 }
 0x394   : > { %v2383_v19 = vpop.f32.mrb[39].mxu0 }
 0x39a   : > { %v4233_v43 = vpop.f32.mrb[40].mxu0 }
 0x39b   : > { %v2396_v28 = vpop.f32.mrb[41].mxu0 }
 0x39c   : > { %v6855_v44 = vpop.f32.mrb[42].mxu0 }
 0x39d   : > { %v6857_v0 = vpop.f32.mrb[43].mxu0 }
 0x3ca   : > { %v4313_v18 = vpop.f32.mrb[20].mxu1 }
 0x3cb   : > { %v6859_v39 = vadd.f32 %v4313_v18, %v4225_v57  ;;  %v2883_v2 = vpop.f32.mrb[21].mxu1 }
 0x3cc   : > { %v6861_v48 = vadd.f32 %v2883_v2, %v2364_v60  ;;  %v4314_v9 = vpop.f32.mrb[22].mxu1 }
 0x3cd   : > { %v6863_v62 = vadd.f32 %v4314_v9, %v4226_v7  ;;  %v2886_v11 = vpop.f32.mrb[23].mxu1  ;;  %v3114_v13 = vmul.f32 %v6859_v39, %v6859_v39  ;;  %v3045_v37 = vsel %vm8072_vm5, %v6859_v39, 0.0  ;;  %vm8088_vm5 = vmmov %vm8078_vm0 }
 0x3ce   : > { %v3112_v6 = vmul.f32 %v6861_v48, %v6861_v48  ;;  %v6867_v14 = vadd.f32 %v2886_v11, %v2367_v26  ;;  %v3042_v55 = vsel %vm8070_vm7, %v6861_v48, 0.0  ;;  %vm8086_vm7 = vmmov %vm8078_vm0 }
 0x3cf   : > { %v3115_v35 = vmul.f32 %v6863_v62, %v6863_v62  ;;  %v3147_v58 = vsel %vm8075_vm3, %v3114_v13, 0.0  ;;  %v3047_v20 = vsel %vm8076_vm12, %v6863_v62, 0.0  ;;  %vm8091_vm3 = vmmov %vm8078_vm0 }
 0x3d0   : > { %v3043_v31 = vsel %vm8071_vm6, %v6867_v14, 0.0  ;;  %v3113_v42 = vmul.f32 %v6867_v14, %v6867_v14  ;;  %v3144_v36 = vsel %vm8073_vm1, %v3112_v6, 0.0  ;;  %vm8087_vm6 = vmmov %vm8078_vm0 }
 0x3d1   : > { %v3044_v4 = vadd.f32 %v3043_v31, %v3042_v55  ;;  %v3149_v23 = vsel %vm8077_vm8, %v3115_v35, 0.0  ;;  %vm8089_vm1 = vmmov %vm8078_vm0 }
 0x3d2   : > { %v3145_v3 = vsel %vm8074_vm15, %v3113_v42, 0.0  ;;  %v4317_v32 = vpop.f32.mrb[24].mxu1  ;;  %vm8090_vm15 = vmmov %vm8078_vm0 }
 0x3d3   : > { %v3046_v15 = vadd.f32 %v3045_v37, %v3044_v4  ;;  %v3146_v46 = vadd.f32 %v3145_v3, %v3144_v36  ;;  %v6883_v21 = vadd.f32 %v4317_v32, %v4229_v29  ;;  %v2899_v51 = vpop.f32.mrb[25].mxu1  ;;  %vm8092_vm12 = vmmov %vm8078_vm0 }
 0x3d4   : > { %v6888_v50 = vadd.f32 %v2899_v51, %v2380_v22  ;;  %v4318_v16 = vpop.f32.mrb[26].mxu1  ;;  %vm8093_vm8 = vmmov %vm8078_vm0 }
 0x3d5   : > { %v3148_v8 = vadd.f32 %v3147_v58, %v3146_v46  ;;  %v3048_v53 = vadd.f32 %v3047_v20, %v3046_v15  ;;  %v2902_v38 = vpop.f32.mrb[27].mxu1  ;;  %v6895_v63 = vadd.f32 %v4318_v16, %v4230_v30  ;;  %v3118_v45 = vmul.f32 %v6883_v21, %v6883_v21 }
 0x3d6   : > { %v3049_v52 = vsel %vm8078_vm0, %v6888_v50, 0.0  ;;  %v3116_v10 = vmul.f32 %v6888_v50, %v6888_v50  ;;  %v6897_v49 = vadd.f32 %v2902_v38, %v2383_v19  ;;  %v3053_v47 = vsel %vm8081_vm2, %v6883_v21, 0.0  ;;  %vm8096_vm2 = vmmov %vm8078_vm0 }
 0x3d7   : > { %v3050_v61 = vadd.f32 %v3049_v52, %v3048_v53  ;;  %v3150_v59 = vadd.f32 %v3149_v23, %v3148_v8  ;;  %v3119_v1 = vmul.f32 %v6895_v63, %v6895_v63  ;;  %v3055_v57 = vsel %vm8083_vm9, %v6895_v63, 0.0  ;;  %vm8098_vm9 = vmmov %vm8078_vm0 }
 0x3d8   : > { %v3151_v17 = vsel %vm8079_vm13, %v3116_v10, 0.0  ;;  %v3051_v56 = vsel %vm8080_vm10, %v6897_v49, 0.0  ;;  %v3117_v27 = vmul.f32 %v6897_v49, %v6897_v49  ;;  %v3155_v29 = vsel %vm8084_vm4, %v3118_v45, 0.0  ;;  %vm8094_vm13 = vmmov %vm8078_vm0 }
 0x3d9   : > { %v3152_v25 = vadd.f32 %v3151_v17, %v3150_v59  ;;  %v3052_v12 = vadd.f32 %v3051_v56, %v3050_v61  ;;  %vm8095_vm10 = vmmov %vm8078_vm0 }
 0x3da   : > { %v4321_v24 = vpop.f32.mrb[28].mxu1  ;;  %v3153_v40 = vsel %vm8082_vm11, %v3117_v27, 0.0  ;;  %vm8097_vm11 = vmmov %vm8078_vm0 }
 0x3db   : > { %v3054_v54 = vadd.f32 %v3053_v47, %v3052_v12  ;;  %v6911_v33 = vadd.f32 %v4321_v24, %v4233_v43  ;;  %v2915_v34 = vpop.f32.mrb[29].mxu1  ;;  %v3154_v60 = vadd.f32 %v3153_v40, %v3152_v25  ;;  %vm8099_vm4 = vmmov %vm8078_vm0 }
 0x3dc   : > { %v6915_v7 = vadd.f32 %v2915_v34, %v2396_v28  ;;  %v4322_v26 = vpop.f32.mrb[30].mxu1  ;;  %v3157_v28 = vsel %vm8086_vm7, %v3119_v1, 0.0  ;;  %vm8101_vm7 = vmmov %vm8078_vm0 }
 0x3dd   : > { %v3056_v22 = vadd.f32 %v3055_v57, %v3054_v54  ;;  %v6919_v30 = vadd.f32 %v4322_v26, %v6855_v44  ;;  %v2918_v19 = vpop.f32.mrb[31].mxu1  ;;  %v3156_v41 = vadd.f32 %v3155_v29, %v3154_v60  ;;  %v3122_v13 = vmul.f32 %v6911_v33, %v6911_v33 }
 0x3de   : > { %v3057_v43 = vsel %vm8085_vm14, %v6915_v7, 0.0  ;;  %v3120_v5 = vmul.f32 %v6915_v7, %v6915_v7  ;;  %v6926_v18 = vadd.f32 %v2918_v19, %v6857_v0  ;;  %v3061_v0 = vsel %vm8089_vm1, %v6911_v33, 0.0  ;;  %vm8100_vm14 = vmmov %vm8078_vm0 }
 0x3df   : > { %v3058_v2 = vadd.f32 %v3057_v43, %v3056_v22  ;;  %v3158_v9 = vadd.f32 %v3157_v28, %v3156_v41  ;;  %v3123_v4 = vmul.f32 %v6919_v30, %v6919_v30  ;;  %v3063_v3 = vsel %vm8091_vm3, %v6919_v30, 0.0  ;;  %vm8104_vm1 = vmmov %vm8078_vm0 }
 0x3e0   : > { %v3159_v11 = vsel %vm8087_vm6, %v3120_v5, 0.0  ;;  %v3059_v44 = vsel %vm8088_vm5, %v6926_v18, 0.0  ;;  %v3121_v6 = vmul.f32 %v6926_v18, %v6926_v18  ;;  %v3163_v46 = vsel %vm8092_vm12, %v3122_v13, 0.0  ;;  %vm8102_vm6 = vmmov %vm8078_vm0 }
 0x3e1   : > { %v3060_v55 = vadd.f32 %v3059_v44, %v3058_v2  ;;  %v3160_v31 = vadd.f32 %v3159_v11, %v3158_v9  ;;  %v3165_v8 = vsel %vm8078_vm0, %v3123_v4, 0.0  ;;  %vm8103_vm5 = vmmov %vm8078_vm0 }
 0x3e2   : > { %v3161_v42 = vsel %vm8090_vm15, %v3121_v6, 0.0  ;;  %v6939_v35 = vpop.f32.mrb[0].mxu1  ;;  %vm8105_vm15 = vmmov %vm8078_vm0 }
 0x3e3   : > { %v3062_v37 = vadd.f32 %v3061_v0, %v3060_v55  ;;  %v6943_v36 = vpop.f32.mrb[1].mxu1  ;;  %v3162_v32 = vadd.f32 %v3161_v42, %v3160_v31  ;;  %v3126_v61 = vmul.f32 %v6939_v35, %v6939_v35  ;;  %v3069_v56 = vsel %vm8096_vm2, %v6939_v35, 0.0  ;;  %vm8106_vm3 = vmmov %vm8078_vm0 }
 0x3e4   : > { %v6947_v15 = vpop.f32.mrb[2].mxu1  ;;  %v3124_v58 = vmul.f32 %v6943_v36, %v6943_v36  ;;  %v3065_v23 = vsel %vm8093_vm8, %v6943_v36, 0.0  ;;  %vm8107_vm12 = vmmov %vm8078_vm0 }
 0x3e5   : > { %v3064_v51 = vadd.f32 %v3063_v3, %v3062_v37  ;;  %v6952_v20 = vpop.f32.mrb[3].mxu1  ;;  %v3164_v16 = vadd.f32 %v3163_v46, %v3162_v32  ;;  %v3127_v12 = vmul.f32 %v6947_v15, %v6947_v15  ;;  %v3071_v1 = vsel %vm8098_vm9, %v6947_v15, 0.0  ;;  %vm8108_vm8 = vmmov %vm8078_vm0 }
 0x3e6   : > { %v3125_v38 = vmul.f32 %v6952_v20, %v6952_v20  ;;  %v3067_v10 = vsel %vm8094_vm13, %v6952_v20, 0.0  ;;  %v3167_v59 = vsel %vm8095_vm10, %v3124_v58, 0.0  ;;  %v3171_v34 = vsel %vm8099_vm4, %v3126_v61, 0.0  ;;  %vm8109_vm13 = vmmov %vm8078_vm0 }
 0x3e7   : > { %v3066_v53 = vadd.f32 %v3065_v23, %v3064_v51  ;;  %v3166_v52 = vadd.f32 %v3165_v8, %v3164_v16  ;;  %v3173_v19 = vsel %vm8101_vm7, %v3127_v12, 0.0  ;;  %vm8110_vm10 = vmmov %vm8078_vm0 }
 0x3e8   : > { %v3169_v47 = vsel %vm8097_vm11, %v3125_v38, 0.0  ;;  %vm8111_vm2 = vmmov %vm8078_vm0 }
 0x3e9   : > { %v3068_v17 = vadd.f32 %v3067_v10, %v3066_v53  ;;  %v3168_v45 = vadd.f32 %v3167_v59, %v3166_v52  ;;  %vm8112_vm11 = vmmov %vm8078_vm0 }
 0x3ea   : > { %v6966_v25 = vpop.f32.mrb[4].mxu1  ;;  %vm8113_vm9 = vmmov %vm8078_vm0 }
 0x3eb   : > { %v3070_v27 = vadd.f32 %v3069_v56, %v3068_v17  ;;  %v6971_v24 = vpop.f32.mrb[5].mxu1  ;;  %v3170_v54 = vadd.f32 %v3169_v47, %v3168_v45  ;;  %v3130_v2 = vmul.f32 %v6966_v25, %v6966_v25  ;;  %v3077_v44 = vsel %vm8104_vm1, %v6966_v25, 0.0  ;;  %vm8114_vm4 = vmmov %vm8078_vm0 }
 0x3ec   : > { %v6975_v40 = vpop.f32.mrb[6].mxu1  ;;  %v3128_v60 = vmul.f32 %v6971_v24, %v6971_v24  ;;  %v3073_v22 = vsel %vm8100_vm14, %v6971_v24, 0.0  ;;  %vm8115_vm14 = vmmov %vm8078_vm0 }
 0x3ed   : > { %v3072_v57 = vadd.f32 %v3071_v1, %v3070_v27  ;;  %v6980_v26 = vpop.f32.mrb[7].mxu1  ;;  %v3172_v29 = vadd.f32 %v3171_v34, %v3170_v54  ;;  %v3131_v55 = vmul.f32 %v6975_v40, %v6975_v40  ;;  %v3079_v4 = vsel %vm8106_vm3, %v6975_v40, 0.0  ;;  %vm8116_vm7 = vmmov %vm8078_vm0 }
 0x3ee   : > { %v3129_v43 = vmul.f32 %v6980_v26, %v6980_v26  ;;  %v3075_v28 = vsel %vm8102_vm6, %v6980_v26, 0.0  ;;  %v3175_v9 = vsel %vm8103_vm5, %v3128_v60, 0.0  ;;  %v3179_v32 = vsel %vm8107_vm12, %v3130_v2, 0.0  ;;  %vm8117_vm6 = vmmov %vm8078_vm0 }
 0x3ef   : > { %v3074_v41 = vadd.f32 %v3073_v22, %v3072_v57  ;;  %v3174_v5 = vadd.f32 %v3173_v19, %v3172_v29  ;;  %v3181_v8 = vsel %vm8078_vm0, %v3131_v55, 0.0  ;;  %vm8118_vm5 = vmmov %vm8078_vm0 }
 0x3f0   : > { %v3177_v31 = vsel %vm8105_vm15, %v3129_v43, 0.0  ;;  %vm8119_vm1 = vmmov %vm8078_vm0 }
 0x3f1   : > { %v3076_v11 = vadd.f32 %v3075_v28, %v3074_v41  ;;  %v3176_v6 = vadd.f32 %v3175_v9, %v3174_v5  ;;  %vm8120_vm15 = vmmov %vm8078_vm0 }
 0x3f2   : > { %v6994_v13 = vpop.f32.mrb[8].mxu1  ;;  %vm8121_vm3 = vmmov %vm8078_vm0 }
 0x3f3   : > { %v3078_v0 = vadd.f32 %v3077_v44, %v3076_v11  ;;  %v6999_v42 = vpop.f32.mrb[9].mxu1  ;;  %v3178_v37 = vadd.f32 %v3177_v31, %v3176_v6  ;;  %v3134_v61 = vmul.f32 %v6994_v13, %v6994_v13  ;;  %v3085_v56 = vsel %vm8111_vm2, %v6994_v13, 0.0  ;;  %vm8122_vm12 = vmmov %vm8078_vm0 }
 0x3f4   : > { %v7003_v3 = vpop.f32.mrb[10].mxu1  ;;  %v3132_v51 = vmul.f32 %v6999_v42, %v6999_v42  ;;  %v3081_v23 = vsel %vm8108_vm8, %v6999_v42, 0.0  ;;  %vm8123_vm8 = vmmov %vm8078_vm0 }
 0x3f5   : > { %v3080_v46 = vadd.f32 %v3079_v4, %v3078_v0  ;;  %v7008_v58 = vpop.f32.mrb[11].mxu1  ;;  %v3180_v16 = vadd.f32 %v3179_v32, %v3178_v37  ;;  %v3135_v27 = vmul.f32 %v7003_v3, %v7003_v3  ;;  %v3087_v34 = vsel %vm8113_vm9, %v7003_v3, 0.0  ;;  %vm8126_vm2 = vmmov %vm8078_vm0 }
 0x3f6   : > { %v3133_v38 = vmul.f32 %v7008_v58, %v7008_v58  ;;  %v3083_v10 = vsel %vm8109_vm13, %v7008_v58, 0.0  ;;  %v3183_v59 = vsel %vm8110_vm10, %v3132_v51, 0.0  ;;  %v3187_v29 = vsel %vm8114_vm4, %v3134_v61, 0.0  ;;  %vm8124_vm13 = vmmov %vm8078_vm0 }
 0x3f7   : > { %v3082_v53 = vadd.f32 %v3081_v23, %v3080_v46  ;;  %v3182_v52 = vadd.f32 %v3181_v8, %v3180_v16  ;;  %v3189_v28 = vsel %vm8116_vm7, %v3135_v27, 0.0  ;;  %vm8125_vm10 = vmmov %vm8078_vm0 }
 0x3f8   : > { %v3185_v1 = vsel %vm8112_vm11, %v3133_v38, 0.0  ;;  %vm8127_vm11 = vmmov %vm8078_vm0 }
 0x3f9   : > { %v3084_v17 = vadd.f32 %v3083_v10, %v3082_v53  ;;  %v3184_v45 = vadd.f32 %v3183_v59, %v3182_v52  ;;  %vm8128_vm9 = vmmov %vm8078_vm0 }
 0x3fa   : > { %v7022_v12 = vpop.f32.mrb[12].mxu1  ;;  %vm8129_vm4 = vmmov %vm8078_vm0 }
 0x3fb   : > { %v3086_v47 = vadd.f32 %v3085_v56, %v3084_v17  ;;  %v7027_v54 = vpop.f32.mrb[13].mxu1  ;;  %v3186_v57 = vadd.f32 %v3185_v1, %v3184_v45  ;;  %v3138_v6 = vmul.f32 %v7022_v12, %v7022_v12  ;;  %v3093_v31 = vsel %vm8119_vm1, %v7022_v12, 0.0  ;;  %vm8131_vm7 = vmmov %vm8078_vm0 }
 0x3fc   : > { %v7031_v60 = vpop.f32.mrb[14].mxu1  ;;  %v3136_v19 = vmul.f32 %v7027_v54, %v7027_v54  ;;  %v3089_v5 = vsel %vm8115_vm14, %v7027_v54, 0.0  ;;  %vm8130_vm14 = vmmov %vm8078_vm0 }
 0x3fd   : > { %v3088_v22 = vadd.f32 %v3087_v34, %v3086_v47  ;;  %v7036_v41 = vpop.f32.mrb[15].mxu1  ;;  %v3188_v43 = vadd.f32 %v3187_v29, %v3186_v57  ;;  %v3139_v32 = vmul.f32 %v7031_v60, %v7031_v60  ;;  %v3095_v23 = vsel %vm8121_vm3, %v7031_v60, 0.0  ;;  %vm8134_vm1 = vmmov %vm8078_vm0 }
 0x3fe   : > { %v3137_v9 = vmul.f32 %v7036_v41, %v7036_v41  ;;  %v3091_v44 = vsel %vm8117_vm6, %v7036_v41, 0.0  ;;  %v3191_v55 = vsel %vm8118_vm5, %v3136_v19, 0.0  ;;  %v3195_v38 = vsel %vm8122_vm12, %v3138_v6, 0.0  ;;  %vm8132_vm6 = vmmov %vm8078_vm0 }
 0x3ff   : > { %v3090_v2 = vadd.f32 %v3089_v5, %v3088_v22  ;;  %v3190_v11 = vadd.f32 %v3189_v28, %v3188_v43  ;;  %v3197_v56 = vsel %vm8078_vm0, %v3139_v32, 0.0  ;;  %vm8133_vm5 = vmmov %vm8078_vm0 }
 0x400   : > { %v3193_v51 = vsel %vm8120_vm15, %v3137_v9, 0.0  ;;  %vm8135_vm15 = vmmov %vm8078_vm0 }
 0x401   : > { %v3092_v0 = vadd.f32 %v3091_v44, %v3090_v2  ;;  %v3192_v4 = vadd.f32 %v3191_v55, %v3190_v11  ;;  %vm8136_vm3 = vmmov %vm8078_vm0 }
 0x402   : > { %v7050_v37 = vpop.f32.mrb[16].mxu1  ;;  %vm8137_vm12 = vmmov %vm8078_vm0 }
 0x403   : > { %v3094_v46 = vadd.f32 %v3093_v31, %v3092_v0  ;;  %v7055_v16 = vpop.f32.mrb[17].mxu1  ;;  %v3194_v8 = vadd.f32 %v3193_v51, %v3192_v4  ;;  %v3142_v34 = vmul.f32 %v7050_v37, %v7050_v37  ;;  %v3101_v22 = vsel %vm8126_vm2, %v7050_v37, 0.0  ;;  %vm8141_vm2 = vmmov %vm8078_vm0 }
 0x404   : > { %v7059_v53 = vpop.f32.mrb[18].mxu1  ;;  %v3140_v10 = vmul.f32 %v7055_v16, %v7055_v16  ;;  %v3097_v17 = vsel %vm8123_vm8, %v7055_v16, 0.0  ;;  %vm8138_vm8 = vmmov %vm8078_vm0 }
 0x405   : > { %v3096_v52 = vadd.f32 %v3095_v23, %v3094_v46  ;;  %v7064_v61 = vpop.f32.mrb[19].mxu1  ;;  %v3196_v59 = vadd.f32 %v3195_v38, %v3194_v8  ;;  %v3143_v43 = vmul.f32 %v7059_v53, %v7059_v53  ;;  %v3103_v2 = vsel %vm8128_vm9, %v7059_v53, 0.0  ;;  %vm8143_vm9 = vmmov %vm8078_vm0 }
 0x406   : > { %v3141_v27 = vmul.f32 %v7064_v61, %v7064_v61  ;;  %v3099_v1 = vsel %vm8124_vm13, %v7064_v61, 0.0  ;;  %v3199_v57 = vsel %vm8125_vm10, %v3140_v10, 0.0  ;;  %v3203_v11 = vsel %vm8129_vm4, %v3142_v34, 0.0  ;;  %vm8139_vm13 = vmmov %vm8078_vm0 }
 0x407   : > { %v3098_v45 = vadd.f32 %v3097_v17, %v3096_v52  ;;  %v3198_v47 = vadd.f32 %v3197_v56, %v3196_v59  ;;  %v3205_v55 = vsel %vm8130_vm14, %v3143_v43, 0.0  ;;  %vm8140_vm10 = vmmov %vm8078_vm0 }
 0x408   : > { %v3201_v28 = vsel %vm8127_vm11, %v3141_v27, 0.0  ;;  %vm8142_vm11 = vmmov %vm8078_vm0 }
 0x409   : > { %v3100_v29 = vadd.f32 %v3099_v1, %v3098_v45  ;;  %v3200_v19 = vadd.f32 %v3199_v57, %v3198_v47  ;;  %vm8144_vm4 = vmmov %vm8078_vm0 }
 0x40a   : > { %vm8145_vm14 = vmmov %vm8078_vm0 }
 0x40b   : > { %v3102_v5 = vadd.f32 %v3101_v22, %v3100_v29  ;;  %v3202_v9 = vadd.f32 %v3201_v28, %v3200_v19 }
 0x40d   : > { %v3104_v44 = vadd.f32 %v3103_v2, %v3102_v5  ;;  %v3204_v6 = vadd.f32 %v3203_v11, %v3202_v9 }
 0x40f   : > { %v3105_v0 = vrot.slane %v3104_v44, 4  ;;  %v3206_v31 = vadd.f32 %v3205_v55, %v3204_v6 }
 0x411   : > { %v3106_v4 = vadd.f32 %v3105_v0, %v3104_v44  ;;  %v3207_v32 = vrot.slane %v3206_v31, 4 }
 0x413   : > { %v3107_v46 = vrot.slane %v3106_v4, 2  ;;  %v3208_v51 = vadd.f32 %v3207_v32, %v3206_v31 }
 0x415   : > { %v3108_v23 = vadd.f32 %v3107_v46, %v3106_v4  ;;  %v3209_v8 = vrot.slane %v3208_v51, 2 }
 0x417   : > { %v3109_v38 = vrot.slane %v3108_v23, 1  ;;  %v3210_v52 = vadd.f32 %v3209_v8, %v3208_v51 }
 0x419   : > { %v3110_v10 = vadd.f32 %v3109_v38, %v3108_v23  ;;  %v3211_v59 = vrot.slane %v3210_v52, 1 }
 0x41b   : > { %v7085_v17 = vmul.f32 0.00390625, %v3110_v10  ;;  %v3212_v56 = vadd.f32 %v3211_v59, %v3210_v52 }
 0x41d   : > { %v3214_v45 = vmul.f32 %v7085_v17, %v7085_v17  ;;  %v3244_v27 = vsub.f32 %v7055_v16, %v7085_v17  ;;  %v3245_v47 = vsub.f32 %v7064_v61, %v7085_v17  ;;  %v3213_v1 = vmul.f32 0.00390625, %v3212_v56 }
 0x41e   : > { %v3225_v57 = vsub.f32 %v6926_v18, %v7085_v17  ;;  %v3228_v29 = vsub.f32 %v6943_v36, %v7085_v17  ;;  %v3229_v22 = vsub.f32 %v6952_v20, %v7085_v17  ;;  %v3230_v19 = vsub.f32 %v6939_v35, %v7085_v17 }
 0x41f   : > { %v3215_v34 = vsub.f32 %v3213_v1, %v3214_v45  ;;  %v3231_v16 = vsub.f32 %v6947_v15, %v7085_v17  ;;  %v3232_v61 = vsub.f32 %v6971_v24, %v7085_v17  ;;  %v3233_v5 = vsub.f32 %v6980_v26, %v7085_v17 }
 0x420   : > { %v3234_v18 = vsub.f32 %v6966_v25, %v7085_v17  ;;  %v3235_v36 = vsub.f32 %v6975_v40, %v7085_v17  ;;  %v3236_v20 = vsub.f32 %v6999_v42, %v7085_v17  ;;  %v3237_v35 = vsub.f32 %v7008_v58, %v7085_v17 }
 0x421   : > { %v3248_v43 = vadd.f32 1e-05, %v3215_v34  ;;  %v3238_v15 = vsub.f32 %v6994_v13, %v7085_v17  ;;  %v3239_v24 = vsub.f32 %v7003_v3, %v7085_v17  ;;  %v3240_v26 = vsub.f32 %v7027_v54, %v7085_v17 }
 0x422   : > { %v3241_v25 = vsub.f32 %v7036_v41, %v7085_v17  ;;  %v3242_v40 = vsub.f32 %v7022_v12, %v7085_v17  ;;  %v3243_v42 = vsub.f32 %v7031_v60, %v7085_v17  ;;  %v3246_v58 = vsub.f32 %v7050_v37, %v7085_v17 }
 0x423   : > { %4731 = vrsqrt.f32 %v3248_v43  ;;  %v3247_v13 = vsub.f32 %v7059_v53, %v7085_v17  ;;  %v3216_v3 = vsub.f32 %v6861_v48, %v7085_v17  ;;  %v3217_v54 = vsub.f32 %v6867_v14, %v7085_v17 }
 0x424   : > { %v3218_v41 = vsub.f32 %v6859_v39, %v7085_v17  ;;  %v3219_v12 = vsub.f32 %v6863_v62, %v7085_v17  ;;  %v3220_v60 = vsub.f32 %v6888_v50, %v7085_v17  ;;  %v3221_v37 = vsub.f32 %v6897_v49, %v7085_v17 }
 0x425   : > { %v3222_v53 = vsub.f32 %v6883_v21, %v7085_v17  ;;  %v3223_v48 = vsub.f32 %v6895_v63, %v7085_v17  ;;  %v3224_v14 = vsub.f32 %v6915_v7, %v7085_v17  ;;  %v3226_v39 = vsub.f32 %v6911_v33, %v7085_v17 }
 0x426   : > { %v3227_v62 = vsub.f32 %v6919_v30, %v7085_v17 }
 0x42d   : > { %v4732_v28 = vpop.eup %4731 }
 0x42e   : > { %v3278_v50 = vmul.f32 %v4732_v28, %v3244_v27  ;;  %v3279_v2 = vmul.f32 %v4732_v28, %v3245_v47  ;;  %v7153_v9 = vmul.f32 %v4732_v28, %v3216_v3  ;;  %v7155_v49 = vmul.f32 %v4732_v28, %v3217_v54 }
 0x42f   : > { %v3252_v21 = vmul.f32 %v4732_v28, %v3218_v41  ;;  %v3253_v11 = vmul.f32 %v4732_v28, %v3219_v12  ;;  %v3254_v44 = vmul.f32 %v4732_v28, %v3220_v60  ;;  %v3255_v6 = vmul.f32 %v4732_v28, %v3221_v37 }
 0x430   : > { %v3310_v63 = vmax.f32 %v3278_v50, 0.0  ;;  %v3311_v55 = vmax.f32 %v3279_v2, 0.0  ;;  %v3256_v0 = vmul.f32 %v4732_v28, %v3222_v53  ;;  %v3257_v7 = vmul.f32 %v4732_v28, %v3223_v48 }
 0x431   : > { %v3258_v31 = vmul.f32 %v4732_v28, %v3224_v14  ;;  %v3259_v4 = vmul.f32 %v4732_v28, %v3225_v57  ;;  %v3260_v33 = vmul.f32 %v4732_v28, %v3226_v39  ;;  %v3261_v32 = vmul.f32 %v4732_v28, %v3227_v62 }
 0x432   : > { %v7157_v46 = vpack.c.bf16 %v3311_v55, %v3310_v63  ;;  %v3262_v30 = vmul.f32 %v4732_v28, %v3228_v29  ;;  %v3263_v51 = vmul.f32 %v4732_v28, %v3229_v22  ;;  %v3264_v23 = vmul.f32 %v4732_v28, %v3230_v19 }
 0x433   : > { %v3265_v8 = vmul.f32 %v4732_v28, %v3231_v16  ;;  %v3266_v38 = vmul.f32 %v4732_v28, %v3232_v61  ;;  %v3267_v52 = vmul.f32 %v4732_v28, %v3233_v5  ;;  %v3268_v10 = vmul.f32 %v4732_v28, %v3234_v18 }
 0x434   : > { %v3269_v59 = vmul.f32 %v4732_v28, %v3235_v36  ;;  %v3270_v17 = vmul.f32 %v4732_v28, %v3236_v20  ;;  %v3271_v56 = vmul.f32 %v4732_v28, %v3237_v35  ;;  %v3272_v45 = vmul.f32 %v4732_v28, %v3238_v15 }
 0x435   : > { %v3273_v27 = vmul.f32 %v4732_v28, %v3239_v24  ;;  %v3274_v47 = vmul.f32 %v4732_v28, %v3240_v26  ;;  %v3275_v1 = vmul.f32 %v4732_v28, %v3241_v25  ;;  %v3276_v34 = vmul.f32 %v4732_v28, %v3242_v40 }
 0x436   : > { %v3277_v57 = vmul.f32 %v4732_v28, %v3243_v42  ;;  %v3280_v43 = vmul.f32 %v4732_v28, %v3246_v58  ;;  %v3281_v3 = vmul.f32 %v4732_v28, %v3247_v13  ;;  %v3282_v54 = vmax.f32 %v7153_v9, 0.0 }
 0x437   : > { %v3283_v29 = vmax.f32 %v7155_v49, 0.0  ;;  %v3284_v22 = vmax.f32 %v3252_v21, 0.0  ;;  %v3285_v19 = vmax.f32 %v3253_v11, 0.0  ;;  %v3286_v16 = vmax.f32 %v3254_v44, 0.0 }
 0x438   : > { %v3287_v61 = vmax.f32 %v3255_v6, 0.0  ;;  %v3288_v5 = vmax.f32 %v3256_v0, 0.0  ;;  %v3289_v18 = vmax.f32 %v3257_v7, 0.0  ;;  %v3290_v36 = vmax.f32 %v3258_v31, 0.0 }
 0x439   : > { %v3291_v20 = vmax.f32 %v3259_v4, 0.0  ;;  %v3292_v35 = vmax.f32 %v3260_v33, 0.0  ;;  %v3293_v15 = vmax.f32 %v3261_v32, 0.0  ;;  %v3294_v24 = vmax.f32 %v3262_v30, 0.0 }
 0x43a   : > { %v3295_v26 = vmax.f32 %v3263_v51, 0.0  ;;  %v3296_v25 = vmax.f32 %v3264_v23, 0.0  ;;  %v3297_v40 = vmax.f32 %v3265_v8, 0.0  ;;  %v3298_v42 = vmax.f32 %v3266_v38, 0.0 }
 0x43b   : > { %v3299_v58 = vmax.f32 %v3267_v52, 0.0  ;;  %v3300_v13 = vmax.f32 %v3268_v10, 0.0  ;;  %v3301_v41 = vmax.f32 %v3269_v59, 0.0  ;;  %v3302_v12 = vmax.f32 %v3270_v17, 0.0 }
 0x43c   : > { %v3303_v60 = vmax.f32 %v3271_v56, 0.0  ;;  %v3304_v37 = vmax.f32 %v3272_v45, 0.0  ;;  %v3305_v53 = vmax.f32 %v3273_v27, 0.0  ;;  %v3306_v28 = vmax.f32 %v3274_v47, 0.0 }
 0x43d   : > { %v3307_v48 = vmax.f32 %v3275_v1, 0.0  ;;  %v3308_v14 = vmax.f32 %v3276_v34, 0.0  ;;  %v3309_v39 = vmax.f32 %v3277_v57, 0.0  ;;  %v3312_v62 = vmax.f32 %v3280_v43, 0.0 }
 0x43e   : > { %v3313_v50 = vmax.f32 %v3281_v3, 0.0  ;;  %v3315_v2 = vpack.c.bf16 %v3285_v19, %v3284_v22  ;;  %v3314_v9 = vpack.c.bf16 %v3283_v29, %v3282_v54  ;;  %v3316_v49 = vpack.c.bf16 %v3287_v61, %v3286_v16 }
 0x43f   : > { %v3317_v21 = vpack.c.bf16 %v3289_v18, %v3288_v5  ;;  %v3318_v11 = vpack.c.bf16 %v3291_v20, %v3290_v36  ;;  %v3319_v44 = vpack.c.bf16 %v3293_v15, %v3292_v35  ;;  %v3320_v6 = vpack.c.bf16 %v3295_v26, %v3294_v24 }
 0x440   : > { %4347 = vmatprep.mubr.msk.bf16.mxu0 %vm8131_vm7, %v3314_v9  ;;  %v3321_v63 = vpack.c.bf16 %v3297_v40, %v3296_v25  ;;  %v3322_v55 = vpack.c.bf16 %v3299_v58, %v3298_v42  ;;  %v3323_v0 = vpack.c.bf16 %v3301_v41, %v3300_v13  ;;  %v3324_v7 = vpack.c.bf16 %v3303_v60, %v3302_v12 }
 0x441   : > { %4348 = vmatmul.mubr.msk.bf16.vlgmr.msra.gmra.mrb[44].mxu0 %vm8132_vm6, %v3315_v2  ;;  %v3325_v31 = vpack.c.bf16 %v3305_v53, %v3304_v37  ;;  %v3326_v4 = vpack.c.bf16 %v3307_v48, %v3306_v28  ;;  %v3327_v33 = vpack.c.bf16 %v3309_v39, %v3308_v14  ;;  %v3329_v32 = vpack.c.bf16 %v3313_v50, %v3312_v62 }
 0x442   : > { %4351 = vmatprep.mubr.msk.bf16.mxu0 %vm8133_vm5, %v3316_v49 }
 0x449   : > { %4352 = vmatmul.mubr.msk.bf16.gmra.mrb[48].mxu0 %vm8134_vm1, %v3317_v21 }
 0x44a   : > { %4355 = vmatprep.mubr.msk.bf16.mxu0 %vm8135_vm15, %v3318_v11 }
 0x451   : > { %4356 = vmatmul.mubr.msk.bf16.gmra.mrb[52].mxu0 %vm8136_vm3, %v3319_v44 }
 0x452   : > { %4359 = vmatprep.mubr.msk.bf16.mxu0 %vm8137_vm12, %v3320_v6 }
 0x459   : > { %4360 = vmatmul.mubr.msk.bf16.gmra.mrb[56].mxu0 %vm8138_vm8, %v3321_v63 }
 0x45a   : > { %4363 = vmatprep.mubr.msk.bf16.mxu0 %vm8078_vm0, %v3322_v55 }
 0x461   : > { %4364 = vmatmul.mubr.msk.bf16.gmra.mrb[60].mxu0 %vm8139_vm13, %v3323_v0 }
 0x462   : > { %4367 = vmatprep.mubr.msk.bf16.mxu0 %vm8140_vm10, %v3324_v7 }
 0x469   : > { %4368 = vmatmul.mubr.msk.bf16.gmra.mrb[64].mxu0 %vm8141_vm2, %v3325_v31 }
 0x46a   : > { %4371 = vmatprep.mubr.msk.bf16.mxu0 %vm8142_vm11, %v3326_v4 }
 0x471   : > { %4372 = vmatmul.mubr.msk.bf16.gmra.mrb[68].mxu0 %vm8143_vm9, %v3327_v33 }
 0x472   : > { %4375 = vmatprep.mubr.msk.bf16.mxu0 %vm8144_vm4, %v7157_v46 }
 0x479   : > { %4376 = vmatmul.mubr.msk.bf16.gmra.mrb[72].mxu0 %vm8145_vm14, %v3329_v32 }
 0x514   : > { %v7178_v30 = vpop.f32.mrb[44].mxu0 }
 0x515   : > { %v7180_v51 = vpop.f32.mrb[45].mxu0  ;;  %v3595_v46 = vmul.f32 %v7178_v30, %v7178_v30 }
 0x516   : > { %v7182_v23 = vpop.f32.mrb[46].mxu0  ;;  %v3593_v38 = vmul.f32 %v7180_v51, %v7180_v51 }
 0x517   : > { %v7184_v8 = vpop.f32.mrb[47].mxu0  ;;  %v3596_v56 = vmul.f32 %v7182_v23, %v7182_v23 }
 0x518   : > { %v3555_v52 = vadd.f32 %v7184_v8, %v7180_v51  ;;  %v3594_v10 = vmul.f32 %v7184_v8, %v7184_v8 }
 0x51a   : > { %v3556_v59 = vadd.f32 %v7178_v30, %v3555_v52  ;;  %v3625_v17 = vadd.f32 %v3594_v10, %v3593_v38 }
 0x51c   : > { %v3626_v45 = vadd.f32 %v3625_v17, %v3595_v46  ;;  %v7197_v27 = vpop.f32.mrb[48].mxu0  ;;  %v3557_v47 = vadd.f32 %v7182_v23, %v3556_v59 }
 0x51d   : > { %v7200_v1 = vpop.f32.mrb[49].mxu0  ;;  %v3599_v16 = vmul.f32 %v7197_v27, %v7197_v27 }
 0x51e   : > { %v3558_v34 = vadd.f32 %v3557_v47, %v7200_v1  ;;  %v3597_v57 = vmul.f32 %v7200_v1, %v7200_v1  ;;  %v3627_v43 = vadd.f32 %v3626_v45, %v3596_v56  ;;  %v7205_v3 = vpop.f32.mrb[50].mxu0 }
 0x51f   : > { %v7207_v54 = vpop.f32.mrb[51].mxu0  ;;  %v3600_v18 = vmul.f32 %v7205_v3, %v7205_v3 }
 0x520   : > { %v3628_v29 = vadd.f32 %v3627_v43, %v3597_v57  ;;  %v3559_v22 = vadd.f32 %v3558_v34, %v7207_v54  ;;  %v3598_v19 = vmul.f32 %v7207_v54, %v7207_v54 }
 0x522   : > { %v3560_v61 = vadd.f32 %v7197_v27, %v3559_v22  ;;  %v3629_v5 = vadd.f32 %v3628_v29, %v3598_v19 }
 0x524   : > { %v3630_v36 = vadd.f32 %v3629_v5, %v3599_v16  ;;  %v7217_v20 = vpop.f32.mrb[52].mxu0  ;;  %v3561_v35 = vadd.f32 %v7205_v3, %v3560_v61 }
 0x525   : > { %v7220_v15 = vpop.f32.mrb[53].mxu0  ;;  %v3603_v12 = vmul.f32 %v7217_v20, %v7217_v20 }
 0x526   : > { %v3562_v24 = vadd.f32 %v3561_v35, %v7220_v15  ;;  %v3601_v26 = vmul.f32 %v7220_v15, %v7220_v15  ;;  %v3631_v25 = vadd.f32 %v3630_v36, %v3600_v18  ;;  %v7225_v40 = vpop.f32.mrb[54].mxu0 }
 0x527   : > { %v7227_v42 = vpop.f32.mrb[55].mxu0  ;;  %v3604_v53 = vmul.f32 %v7225_v40, %v7225_v40 }
 0x528   : > { %v3632_v58 = vadd.f32 %v3631_v25, %v3601_v26  ;;  %v3563_v13 = vadd.f32 %v3562_v24, %v7227_v42  ;;  %v3602_v41 = vmul.f32 %v7227_v42, %v7227_v42 }
 0x52a   : > { %v3564_v60 = vadd.f32 %v7217_v20, %v3563_v13  ;;  %v3633_v37 = vadd.f32 %v3632_v58, %v3602_v41 }
 0x52c   : > { %v3634_v28 = vadd.f32 %v3633_v37, %v3603_v12  ;;  %v7237_v48 = vpop.f32.mrb[56].mxu0  ;;  %v3565_v14 = vadd.f32 %v7225_v40, %v3564_v60 }
 0x52d   : > { %v7240_v39 = vpop.f32.mrb[57].mxu0  ;;  %v3607_v6 = vmul.f32 %v7237_v48, %v7237_v48 }
 0x52e   : > { %v3566_v62 = vadd.f32 %v3565_v14, %v7240_v39  ;;  %v3605_v50 = vmul.f32 %v7240_v39, %v7240_v39  ;;  %v3635_v2 = vadd.f32 %v3634_v28, %v3604_v53  ;;  %v7245_v9 = vpop.f32.mrb[58].mxu0 }
 0x52f   : > { %v7247_v49 = vpop.f32.mrb[59].mxu0  ;;  %v3608_v0 = vmul.f32 %v7245_v9, %v7245_v9 }
 0x530   : > { %v3636_v21 = vadd.f32 %v3635_v2, %v3605_v50  ;;  %v3567_v11 = vadd.f32 %v3566_v62, %v7247_v49  ;;  %v3606_v44 = vmul.f32 %v7247_v49, %v7247_v49 }
 0x532   : > { %v3568_v63 = vadd.f32 %v7237_v48, %v3567_v11  ;;  %v3637_v55 = vadd.f32 %v3636_v21, %v3606_v44 }
 0x534   : > { %v3638_v7 = vadd.f32 %v3637_v55, %v3607_v6  ;;  %v7257_v31 = vpop.f32.mrb[60].mxu0  ;;  %v3569_v4 = vadd.f32 %v7245_v9, %v3568_v63 }
 0x535   : > { %v7260_v33 = vpop.f32.mrb[61].mxu0  ;;  %v3611_v45 = vmul.f32 %v7257_v31, %v7257_v31 }
 0x536   : > { %v3570_v32 = vadd.f32 %v3569_v4, %v7260_v33  ;;  %v3609_v38 = vmul.f32 %v7260_v33, %v7260_v33  ;;  %v3639_v52 = vadd.f32 %v3638_v7, %v3608_v0  ;;  %v7265_v10 = vpop.f32.mrb[62].mxu0 }
 0x537   : > { %v7267_v46 = vpop.f32.mrb[63].mxu0  ;;  %v3612_v57 = vmul.f32 %v7265_v10, %v7265_v10 }
 0x538   : > { %v3640_v59 = vadd.f32 %v3639_v52, %v3609_v38  ;;  %v3571_v17 = vadd.f32 %v3570_v32, %v7267_v46  ;;  %v3610_v56 = vmul.f32 %v7267_v46, %v7267_v46 }
 0x53a   : > { %v3572_v47 = vadd.f32 %v7257_v31, %v3571_v17  ;;  %v3641_v34 = vadd.f32 %v3640_v59, %v3610_v56 }
 0x53c   : > { %v3642_v43 = vadd.f32 %v3641_v34, %v3611_v45  ;;  %v7277_v29 = vpop.f32.mrb[64].mxu0  ;;  %v3573_v22 = vadd.f32 %v7265_v10, %v3572_v47 }
 0x53d   : > { %v7280_v19 = vpop.f32.mrb[65].mxu0  ;;  %v3615_v25 = vmul.f32 %v7277_v29, %v7277_v29 }
 0x53e   : > { %v3574_v16 = vadd.f32 %v3573_v22, %v7280_v19  ;;  %v3613_v61 = vmul.f32 %v7280_v19, %v7280_v19  ;;  %v3643_v5 = vadd.f32 %v3642_v43, %v3612_v57  ;;  %v7285_v18 = vpop.f32.mrb[66].mxu0 }
 0x53f   : > { %v7287_v36 = vpop.f32.mrb[67].mxu0  ;;  %v3616_v41 = vmul.f32 %v7285_v18, %v7285_v18 }
 0x540   : > { %v3644_v35 = vadd.f32 %v3643_v5, %v3613_v61  ;;  %v3575_v24 = vadd.f32 %v3574_v16, %v7287_v36  ;;  %v3614_v26 = vmul.f32 %v7287_v36, %v7287_v36 }
 0x542   : > { %v3576_v58 = vadd.f32 %v7277_v29, %v3575_v24  ;;  %v3645_v13 = vadd.f32 %v3644_v35, %v3614_v26 }
 0x544   : > { %v3646_v12 = vadd.f32 %v3645_v13, %v3615_v25  ;;  %v7297_v60 = vpop.f32.mrb[68].mxu0  ;;  %v3577_v37 = vadd.f32 %v7285_v18, %v3576_v58 }
 0x545   : > { %v7300_v53 = vpop.f32.mrb[69].mxu0  ;;  %v3619_v6 = vmul.f32 %v7297_v60, %v7297_v60 }
 0x546   : > { %v3578_v28 = vadd.f32 %v3577_v37, %v7300_v53  ;;  %v3617_v14 = vmul.f32 %v7300_v53, %v7300_v53  ;;  %v3647_v62 = vadd.f32 %v3646_v12, %v3616_v41  ;;  %v7305_v50 = vpop.f32.mrb[70].mxu0 }
 0x547   : > { %v7307_v2 = vpop.f32.mrb[71].mxu0  ;;  %v3620_v0 = vmul.f32 %v7305_v50, %v7305_v50 }
 0x548   : > { %v3648_v21 = vadd.f32 %v3647_v62, %v3617_v14  ;;  %v3579_v11 = vadd.f32 %v3578_v28, %v7307_v2  ;;  %v3618_v44 = vmul.f32 %v7307_v2, %v7307_v2 }
 0x54a   : > { %v3580_v63 = vadd.f32 %v7297_v60, %v3579_v11  ;;  %v3649_v55 = vadd.f32 %v3648_v21, %v3618_v44 }
 0x54c   : > { %v3650_v7 = vadd.f32 %v3649_v55, %v3619_v6  ;;  %v7317_v4 = vpop.f32.mrb[72].mxu0  ;;  %v3581_v32 = vadd.f32 %v7305_v50, %v3580_v63 }
 0x54d   : > { %v7320_v38 = vpop.f32.mrb[73].mxu0  ;;  %v3623_v43 = vmul.f32 %v7317_v4, %v7317_v4 }
 0x54e   : > { %v3582_v52 = vadd.f32 %v3581_v32, %v7320_v38  ;;  %v3621_v59 = vmul.f32 %v7320_v38, %v7320_v38  ;;  %v3651_v17 = vadd.f32 %v3650_v7, %v3620_v0  ;;  %v7325_v56 = vpop.f32.mrb[74].mxu0 }
 0x54f   : > { %v7327_v45 = vpop.f32.mrb[75].mxu0  ;;  %v3624_v61 = vmul.f32 %v7325_v56, %v7325_v56 }
 0x550   : > { %v3652_v47 = vadd.f32 %v3651_v17, %v3621_v59  ;;  %v3583_v34 = vadd.f32 %v3582_v52, %v7327_v45  ;;  %v3622_v57 = vmul.f32 %v7327_v45, %v7327_v45 }
 0x552   : > { %v3584_v22 = vadd.f32 %v7317_v4, %v3583_v34  ;;  %v3653_v16 = vadd.f32 %v3652_v47, %v3622_v57 }
 0x554   : > { %v3585_v5 = vadd.f32 %v7325_v56, %v3584_v22  ;;  %v3654_v35 = vadd.f32 %v3653_v16, %v3623_v43 }
 0x556   : > { %v3586_v24 = vrot.slane %v3585_v5, 4  ;;  %v3655_v26 = vadd.f32 %v3654_v35, %v3624_v61  ;;  %v4735_v35 = vld [vmem:[%s5204_s25 + $0xe8] sm:$0xff] }
 0x558   : > { %v3587_v25 = vadd.f32 %v3586_v24, %v3585_v5  ;;  %v3656_v58 = vrot.slane %v3655_v26, 4 }
 0x55a   : > { %v3588_v13 = vrot.slane %v3587_v25, 2  ;;  %v3657_v41 = vadd.f32 %v3656_v58, %v3655_v26 }
 0x55c   : > { %v3589_v12 = vadd.f32 %v3588_v13, %v3587_v25  ;;  %v3658_v37 = vrot.slane %v3657_v41, 2 }
 0x55e   : > { %v3590_v28 = vrot.slane %v3589_v12, 1  ;;  %v3659_v14 = vadd.f32 %v3658_v37, %v3657_v41 }
 0x560   : > { %v3591_v62 = vadd.f32 %v3590_v28, %v3589_v12  ;;  %v3660_v21 = vrot.slane %v3659_v14, 1 }
 0x562   : > { %v7338_v11 = vmul.f32 0.00390625, %v3591_v62  ;;  %v3661_v44 = vadd.f32 %v3660_v21, %v3659_v14 }
 0x564   : > { %v3662_v6 = vmul.f32 0.00390625, %v3661_v44  ;;  %v3663_v63 = vmul.f32 %v7338_v11, %v7338_v11  ;;  %v3694_v55 = vsub.f32 %v7327_v45, %v7338_v11  ;;  %v3665_v0 = vsub.f32 %v7180_v51, %v7338_v11 }
 0x565   : > { %v3666_v7 = vsub.f32 %v7184_v8, %v7338_v11  ;;  %v3667_v32 = vsub.f32 %v7178_v30, %v7338_v11  ;;  %v3668_v52 = vsub.f32 %v7182_v23, %v7338_v11  ;;  %v3669_v59 = vsub.f32 %v7200_v1, %v7338_v11 }
 0x566   : > { %v3664_v17 = vsub.f32 %v3662_v6, %v3663_v63  ;;  %v3670_v47 = vsub.f32 %v7207_v54, %v7338_v11  ;;  %v3671_v45 = vsub.f32 %v7197_v27, %v7338_v11  ;;  %v3672_v51 = vsub.f32 %v7205_v3, %v7338_v11 }
 0x567   : > { %v3673_v8 = vsub.f32 %v7220_v15, %v7338_v11  ;;  %v3674_v30 = vsub.f32 %v7227_v42, %v7338_v11  ;;  %v3675_v23 = vsub.f32 %v7217_v20, %v7338_v11  ;;  %v3676_v1 = vsub.f32 %v7225_v40, %v7338_v11 }
 0x568   : > { %v3697_v34 = vadd.f32 1e-05, %v3664_v17  ;;  %v3677_v54 = vsub.f32 %v7240_v39, %v7338_v11  ;;  %v3678_v27 = vsub.f32 %v7247_v49, %v7338_v11  ;;  %v3679_v3 = vsub.f32 %v7237_v48, %v7338_v11  ;;  %v4736_v17 = vld [vmem:[%s5204_s25] sm:$0xff] }
 0x569   : > { %v3680_v15 = vsub.f32 %v7245_v9, %v7338_v11  ;;  %v3681_v42 = vsub.f32 %v7260_v33, %v7338_v11  ;;  %v3682_v20 = vsub.f32 %v7267_v46, %v7338_v11  ;;  %v3683_v40 = vsub.f32 %v7257_v31, %v7338_v11 }
 0x56a   : > { %4733 = vrsqrt.f32 %v3697_v34  ;;  %v3684_v39 = vsub.f32 %v7265_v10, %v7338_v11  ;;  %v3685_v49 = vsub.f32 %v7280_v19, %v7338_v11  ;;  %v3686_v48 = vsub.f32 %v7287_v36, %v7338_v11  ;;  %v4740_v34 = vld [vmem:[%s5204_s25 + $0x20] sm:$0xff] }
 0x56b   : > { %v3687_v9 = vsub.f32 %v7277_v29, %v7338_v11  ;;  %v3688_v33 = vsub.f32 %v7285_v18, %v7338_v11  ;;  %v3689_v46 = vsub.f32 %v7300_v53, %v7338_v11  ;;  %v3690_v31 = vsub.f32 %v7307_v2, %v7338_v11 }
 0x56c   : > { %v3691_v10 = vsub.f32 %v7297_v60, %v7338_v11  ;;  %v3692_v19 = vsub.f32 %v7305_v50, %v7338_v11  ;;  %v3693_v36 = vsub.f32 %v7320_v38, %v7338_v11  ;;  %v3695_v29 = vsub.f32 %v7317_v4, %v7338_v11 }
 0x56d   : > { %v3696_v18 = vsub.f32 %v7325_v56, %v7338_v11 }
 0x574   : > { %v4734_v53 = vpop.eup %4733 }
 0x575   : > { %v3728_v57 = vmul.f32 %v4734_v53, %v3694_v55  ;;  %v3699_v43 = vmul.f32 %v4734_v53, %v3665_v0  ;;  %v3700_v22 = vmul.f32 %v4734_v53, %v3666_v7  ;;  %v3701_v2 = vmul.f32 %v4734_v53, %v3667_v32 }
 0x576   : > { %v3702_v16 = vmul.f32 %v4734_v53, %v3668_v52  ;;  %v3703_v61 = vmul.f32 %v4734_v53, %v3669_v59  ;;  %v3704_v60 = vmul.f32 %v4734_v53, %v3670_v47  ;;  %v3705_v5 = vmul.f32 %v4734_v53, %v3671_v45  ;;  %v4737_v45 = vld [vmem:[%s5204_s25 + $0x8] sm:$0xff] }
 0x577   : > { %v3760_v50 = vadd.f32 %v4735_v35, %v3728_v57  ;;  %v3706_v24 = vmul.f32 %v4734_v53, %v3672_v51  ;;  %v3707_v38 = vmul.f32 %v4734_v53, %v3673_v8  ;;  %v3708_v26 = vmul.f32 %v4734_v53, %v3674_v30  ;;  %v4738_v8 = vld [vmem:[%s5204_s25 + $0x10] sm:$0xff] }
 0x578   : > { %v3709_v25 = vmul.f32 %v4734_v53, %v3675_v23  ;;  %v3710_v4 = vmul.f32 %v4734_v53, %v3676_v1  ;;  %v3711_v58 = vmul.f32 %v4734_v53, %v3677_v54  ;;  %v3712_v13 = vmul.f32 %v4734_v53, %v3678_v27  ;;  %v4739_v23 = vld [vmem:[%s5204_s25 + $0x18] sm:$0xff]  ;;  %v4741_v27 = vld [vmem:[%s5204_s25 + $0x28] sm:$0xff] }
 0x579   : > { %v3792_v56 = vmax.f32 %v3760_v50, 0.0  ;;  %v3713_v41 = vmul.f32 %v4734_v53, %v3679_v3  ;;  %v3714_v12 = vmul.f32 %v4734_v53, %v3680_v15  ;;  %v3715_v37 = vmul.f32 %v4734_v53, %v3681_v42  ;;  %v4742_v15 = vld [vmem:[%s5204_s25 + $0x30] sm:$0xff]  ;;  %v4755_v50 = vld [vmem:[%s5204_s25 + $0x98] sm:$0xff] }
 0x57a   : > { %v3716_v28 = vmul.f32 %v4734_v53, %v3682_v20  ;;  %v3717_v14 = vmul.f32 %v4734_v53, %v3683_v40  ;;  %v3718_v62 = vmul.f32 %v4734_v53, %v3684_v39  ;;  %v3719_v21 = vmul.f32 %v4734_v53, %v3685_v49  ;;  %v4743_v20 = vld [vmem:[%s5204_s25 + $0x38] sm:$0xff]  ;;  %v4744_v39 = vld [vmem:[%s5204_s25 + $0x40] sm:$0xff] }
 0x57b   : > { %3824 = vst [vmem:[%s7409_s29 + $0xe8] sm:$0xff] %v3792_v56  ;;  %v3720_v11 = vmul.f32 %v4734_v53, %v3686_v48  ;;  %v3721_v44 = vmul.f32 %v4734_v53, %v3687_v9  ;;  %v3722_v6 = vmul.f32 %v4734_v53, %v3688_v33  ;;  %v3723_v63 = vmul.f32 %v4734_v53, %v3689_v46  ;;  %v4745_v48 = vld [vmem:[%s5204_s25 + $0x48] sm:$0xff]  ;;  %v4746_v33 = vld [vmem:[%s5204_s25 + $0x50] sm:$0xff]  ;;  %v4759_v56 = vld [vmem:[%s5204_s25 + $0xb8] sm:$0xff] }
 0x57c   : > { %v3724_v55 = vmul.f32 %v4734_v53, %v3690_v31  ;;  %v3725_v0 = vmul.f32 %v4734_v53, %v3691_v10  ;;  %v3726_v7 = vmul.f32 %v4734_v53, %v3692_v19  ;;  %v3727_v32 = vmul.f32 %v4734_v53, %v3693_v36  ;;  %v4747_v31 = vld [vmem:[%s5204_s25 + $0x58] sm:$0xff]  ;;  %v4748_v19 = vld [vmem:[%s5204_s25 + $0x60] sm:$0xff] }
 0x57d   : > { %v3729_v52 = vmul.f32 %v4734_v53, %v3695_v29  ;;  %v3730_v59 = vmul.f32 %v4734_v53, %v3696_v18  ;;  %v7413_v47 = vadd.f32 %v4736_v17, %v3699_v43  ;;  %v7416_v51 = vadd.f32 %v4737_v45, %v3700_v22  ;;  %v4749_v29 = vld [vmem:[%s5204_s25 + $0x68] sm:$0xff]  ;;  %v4750_v53 = vld [vmem:[%s5204_s25 + $0x70] sm:$0xff]  ;;  %v4751_v43 = vld [vmem:[%s5204_s25 + $0x78] sm:$0xff] }
 0x57e   : > { %v7419_v30 = vadd.f32 %v4738_v8, %v3701_v2  ;;  %v7422_v1 = vadd.f32 %v4739_v23, %v3702_v16  ;;  %v7425_v54 = vadd.f32 %v4740_v34, %v3703_v61  ;;  %v7428_v3 = vadd.f32 %v4741_v27, %v3704_v60  ;;  %v4752_v2 = vld [vmem:[%s5204_s25 + $0x80] sm:$0xff]  ;;  %v4753_v61 = vld [vmem:[%s5204_s25 + $0x88] sm:$0xff]  ;;  %v4763_v17 = vld [vmem:[%s5204_s25 + $0xd8] sm:$0xff] }
 0x57f   : > { %v7431_v42 = vadd.f32 %v4742_v15, %v3705_v5  ;;  %v7434_v40 = vadd.f32 %v4743_v20, %v3706_v24  ;;  %v7437_v49 = vadd.f32 %v4744_v39, %v3707_v38  ;;  %v7440_v9 = vadd.f32 %v4745_v48, %v3708_v26  ;;  %v4754_v5 = vld [vmem:[%s5204_s25 + $0x90] sm:$0xff]  ;;  %v4756_v38 = vld [vmem:[%s5204_s25 + $0xa0] sm:$0xff] }
 0x580   : > { %v7443_v46 = vadd.f32 %v4746_v33, %v3709_v25  ;;  %v7446_v10 = vadd.f32 %v4747_v31, %v3710_v4  ;;  %v7449_v36 = vadd.f32 %v4748_v19, %v3711_v58  ;;  %v7452_v18 = vadd.f32 %v4749_v29, %v3712_v13  ;;  %v4757_v25 = vld [vmem:[%s5204_s25 + $0xa8] sm:$0xff]  ;;  %v4758_v58 = vld [vmem:[%s5204_s25 + $0xb0] sm:$0xff] }
 0x581   : > { %v7455_v57 = vadd.f32 %v4750_v53, %v3713_v41  ;;  %v7458_v22 = vadd.f32 %v4751_v43, %v3714_v12  ;;  %v7461_v16 = vadd.f32 %v4752_v2, %v3715_v37  ;;  %v7464_v60 = vadd.f32 %v4753_v61, %v3716_v28  ;;  %v4760_v12 = vld [vmem:[%s5204_s25 + $0xc0] sm:$0xff]  ;;  %v4761_v28 = vld [vmem:[%s5204_s25 + $0xc8] sm:$0xff] }
 0x582   : > { %v7467_v35 = vadd.f32 %v4754_v5, %v3717_v14  ;;  %v7470_v24 = vadd.f32 %v4755_v50, %v3718_v62  ;;  %v7473_v26 = vadd.f32 %v4756_v38, %v3719_v21  ;;  %v7476_v4 = vadd.f32 %v4757_v25, %v3720_v11  ;;  %v4762_v62 = vld [vmem:[%s5204_s25 + $0xd0] sm:$0xff]  ;;  %v4764_v11 = vld [vmem:[%s5204_s25 + $0xe0] sm:$0xff] }
 0x583   : > { %v7479_v13 = vadd.f32 %v4758_v58, %v3721_v44  ;;  %v7482_v41 = vadd.f32 %v4759_v56, %v3722_v6  ;;  %v7485_v37 = vadd.f32 %v4760_v12, %v3723_v63  ;;  %v7488_v14 = vadd.f32 %v4761_v28, %v3724_v55  ;;  %v4765_v44 = vld [vmem:[%s5204_s25 + $0xf0] sm:$0xff]  ;;  %v4766_v63 = vld [vmem:[%s5204_s25 + $0xf8] sm:$0xff] }
 0x584   : > { %v7491_v21 = vadd.f32 %v4762_v62, %v3725_v0  ;;  %v7494_v45 = vadd.f32 %v4763_v17, %v3726_v7  ;;  %v7497_v8 = vadd.f32 %v4764_v11, %v3727_v32  ;;  %v7500_v6 = vadd.f32 %v4765_v44, %v3729_v52 }
 0x585   : > { %v7503_v23 = vadd.f32 %v4766_v63, %v3730_v59  ;;  %v3763_v55 = vmax.f32 %v7413_v47, 0.0  ;;  %v3764_v0 = vmax.f32 %v7416_v51, 0.0  ;;  %v3765_v34 = vmax.f32 %v7419_v30, 0.0 }
 0x586   : > { %v3766_v7 = vmax.f32 %v7422_v1, 0.0  ;;  %v3767_v32 = vmax.f32 %v7425_v54, 0.0  ;;  %v3768_v52 = vmax.f32 %v7428_v3, 0.0  ;;  %v3769_v27 = vmax.f32 %v7431_v42, 0.0 }
 0x587   : > { %v3770_v59 = vmax.f32 %v7434_v40, 0.0  ;;  %v3771_v47 = vmax.f32 %v7437_v49, 0.0  ;;  %v3772_v51 = vmax.f32 %v7440_v9, 0.0  ;;  %v3773_v30 = vmax.f32 %v7443_v46, 0.0  ;;  %3795 = vst [vmem:[%s7409_s29] sm:$0xff] %v3763_v55  ;;  %3796 = vst [vmem:[%s7409_s29 + $0x8] sm:$0xff] %v3764_v0 }
 0x588   : > { %3797 = vst [vmem:[%s7409_s29 + $0x10] sm:$0xff] %v3765_v34  ;;  %v3774_v1 = vmax.f32 %v7446_v10, 0.0  ;;  %v3775_v54 = vmax.f32 %v7449_v36, 0.0  ;;  %v3776_v3 = vmax.f32 %v7452_v18, 0.0  ;;  %v3777_v15 = vmax.f32 %v7455_v57, 0.0  ;;  %3798 = vst [vmem:[%s7409_s29 + $0x18] sm:$0xff] %v3766_v7 }
 0x589   : > { %3799 = vst [vmem:[%s7409_s29 + $0x20] sm:$0xff] %v3767_v32  ;;  %3800 = vst [vmem:[%s7409_s29 + $0x28] sm:$0xff] %v3768_v52  ;;  %v3778_v42 = vmax.f32 %v7458_v22, 0.0  ;;  %v3779_v20 = vmax.f32 %v7461_v16, 0.0  ;;  %v3780_v40 = vmax.f32 %v7464_v60, 0.0  ;;  %v3781_v39 = vmax.f32 %v7467_v35, 0.0 }
 0x58a   : > { %3801 = vst [vmem:[%s7409_s29 + $0x30] sm:$0xff] %v3769_v27  ;;  %3802 = vst [vmem:[%s7409_s29 + $0x38] sm:$0xff] %v3770_v59  ;;  %v3782_v49 = vmax.f32 %v7470_v24, 0.0  ;;  %v3783_v48 = vmax.f32 %v7473_v26, 0.0  ;;  %v3784_v9 = vmax.f32 %v7476_v4, 0.0  ;;  %v3785_v33 = vmax.f32 %v7479_v13, 0.0 }
 0x58b   : > { %3803 = vst [vmem:[%s7409_s29 + $0x40] sm:$0xff] %v3771_v47  ;;  %3804 = vst [vmem:[%s7409_s29 + $0x48] sm:$0xff] %v3772_v51  ;;  %v3786_v46 = vmax.f32 %v7482_v41, 0.0  ;;  %v3787_v31 = vmax.f32 %v7485_v37, 0.0  ;;  %v3788_v10 = vmax.f32 %v7488_v14, 0.0  ;;  %v3789_v19 = vmax.f32 %v7491_v21, 0.0 }
 0x58c   : > { %3805 = vst [vmem:[%s7409_s29 + $0x50] sm:$0xff] %v3773_v30  ;;  %3806 = vst [vmem:[%s7409_s29 + $0x58] sm:$0xff] %v3774_v1  ;;  %v3790_v36 = vmax.f32 %v7494_v45, 0.0  ;;  %v3791_v29 = vmax.f32 %v7497_v8, 0.0  ;;  %v3793_v18 = vmax.f32 %v7500_v6, 0.0  ;;  %v3794_v53 = vmax.f32 %v7503_v23, 0.0 }
 0x58d   : > { %3807 = vst [vmem:[%s7409_s29 + $0x60] sm:$0xff] %v3775_v54  ;;  %3808 = vst [vmem:[%s7409_s29 + $0x68] sm:$0xff] %v3776_v3 }
 0x58e   : > { %3809 = vst [vmem:[%s7409_s29 + $0x70] sm:$0xff] %v3777_v15  ;;  %3810 = vst [vmem:[%s7409_s29 + $0x78] sm:$0xff] %v3778_v42 }
 0x58f   : > { %3811 = vst [vmem:[%s7409_s29 + $0x80] sm:$0xff] %v3779_v20  ;;  %3812 = vst [vmem:[%s7409_s29 + $0x88] sm:$0xff] %v3780_v40 }
 0x590   : > { %3813 = vst [vmem:[%s7409_s29 + $0x90] sm:$0xff] %v3781_v39  ;;  %3814 = vst [vmem:[%s7409_s29 + $0x98] sm:$0xff] %v3782_v49 }
 0x591   : > { %3815 = vst [vmem:[%s7409_s29 + $0xa0] sm:$0xff] %v3783_v48  ;;  %3816 = vst [vmem:[%s7409_s29 + $0xa8] sm:$0xff] %v3784_v9 }
 0x592   : > { %3817 = vst [vmem:[%s7409_s29 + $0xb0] sm:$0xff] %v3785_v33  ;;  %3818 = vst [vmem:[%s7409_s29 + $0xb8] sm:$0xff] %v3786_v46 }
 0x593   : > { %3819 = vst [vmem:[%s7409_s29 + $0xc0] sm:$0xff] %v3787_v31  ;;  %3820 = vst [vmem:[%s7409_s29 + $0xc8] sm:$0xff] %v3788_v10 }
 0x594   : > { %3821 = vst [vmem:[%s7409_s29 + $0xd0] sm:$0xff] %v3789_v19  ;;  %3822 = vst [vmem:[%s7409_s29 + $0xd8] sm:$0xff] %v3790_v36 }
 0x595   : > { %3823 = vst [vmem:[%s7409_s29 + $0xe0] sm:$0xff] %v3791_v29  ;;  %3825 = vst [vmem:[%s7409_s29 + $0xf0] sm:$0xff] %v3793_v18 }
 0x596   : > { %3826 = vst [vmem:[%s7409_s29 + $0xf8] sm:$0xff] %v3794_v53 }
 0x597   : > { %4894 = shalt.err (!%p4891_p4)
}
 0x598   : > { %s4895_s9 = scalar_lea.hbm %s7556_s27, 4096  ;;  %s4899_s25 = scalar_lea.hbm %s7622_s4, 8192 }
 0x599   : > { %p4896_p9 = scmp.ne.s32.totalorder %s7556_s27, %s4895_s9  ;;  %p4900_p8 = scmp.lt.u32.totalorder %s7556_s27, %s7622_s4 }
 0x59a   : > { %p4901_p13 = scmp.lt.u32.totalorder %s4899_s25, %s4895_s9  ;;  %p4903_p10 = scmp.lt.u32.totalorder %s4895_s9, %s7556_s27 }
 0x59b   : > { %p4897_p0 = pnand %p4896_p9, %p5150_p5 }
 0x59c   : > { %p4902_p6 = por %p4901_p13, %p4900_p8 }
 0x59d   : > { %p4898_p11 = pneg %p4897_p0 }
 0x59e   : > { %p4904_p3 = por %p4903_p10, %p4902_p6 }
 0x5a0   : > { %p4905_p7 = pnand %p4904_p3, %p4898_p11 }
 0x5a2   : > { %4908 = shalt.err (!%p4905_p7)
}
 0x5a3   : > { %s4969_s29 = smov 128   ;;  %s4970_s6 = smov 8  }
 0x5a4   : > { %4469 = dma.vmem_to_hbm [thread:$0]  (%p5150_p5), %s7558_s7, 4096, %s7556_s27, %s3828_s24, %s4969_s29, %s4969_s29, %s4970_s6  }
 0x5a5 PF: > { %s3856_s19 = sand.u32 1, %s4943_s15   ;;  %p8146_p12 = scmp.ne.s32.totalorder %s7666_s22, 0 }
 0x5a6   : > { %p8147_p1 = scmp.ge.s32.totalorder %s4955_s18, 2  ;;  %s3857_s8 = scalar_lea.sflag [#allocation4], %s3856_s19 }
 0x5a8   : > { %p4486_p2 = pnand %p8147_p1, %p8146_p12 }
 0x5aa   : > { %4938 = dma.done.wait (!%p4486_p2), %s3857_s8, 4096  }
 0x5ab   : > { %4940 = vsyncadd (!%p4486_p2), %s3857_s8, 4294963200  ;;  %p19_p4 = scmp.ge.s32.totalorder %s5136_s10, 4   ;;  %s8148_s15 = smov %s4947_s16 }
 0x5ac   : > { %s8149_s16 = smov %s4951_s17  ;;  %s8150_s17 = smov %s5146_s12 }
 0x5ad   : > { %s8151_s18 = smov %s5136_s10  ;;  %21 = sbr.rel (!%p19_p4) target bundleno = 7 (0x7), region = 95 }
 0x5b4   :  { %3862 = vsyncpa [#allocation3], 1 }
 0x5b5   :  { %3864 = vsyncpa [#allocation3 + $0x1], 1 }
 0x5b6   :  { %3865 = vsyncpa [#allocation6], 1 }
 0x5b7   :  { %3866 = vsyncpa [#allocation9], 1 }
 0x5b8   :  { %3867 = vsyncpa [#allocation4], 1 }
 0x5b9   :  { %3869 = vsyncpa [#allocation4 + $0x1], 1 }

</bundles_post_ra>
